<compile_context>
chip_gen: v5e
topology: v5e:2x2
jax: 0.10.0
libtpu: 0.0.40
codegen_flags: <defaults>
</compile_context>

<pallas_src>
import math

import jax
import jax.numpy as jnp
import numpy as np
from jax.experimental import pallas as pl
from jax.experimental.pallas import tpu as pltpu

TIME_DIM = 256
LABEL_DIM = 128
NUM_CLASSES = 4
HALF = TIME_DIM // 2


def cond_embed_kernel(
    t_ref,        # [TB, 1]     f32 time steps
    y_ref,        # [TB, 1]     int32 labels
    freqs_ref,    # [1, 256]    f32 (sinusoid freqs, duplicated for sin/cos halves)
    phase_ref,    # [1, 256]    f32 (0 for sin half, pi/2 for cos half)
    w1_ref,       # [256, 1024] bf16
    b1_ref,       # [1, 1024]   f32
    w2_ref,       # [1024, 256] bf16
    b2_ref,       # [1, 256]    f32
    emb_ref,      # [C, 128]    f32 label embedding table
    w3t_ref,      # [256, 512]  bf16 (rows of w3 hit by t_emb)
    w3l_ref,      # [128, 512]  bf16 (rows of w3 hit by l_emb)
    b3_ref,       # [1, 512]    f32
    w4_ref,       # [512, 256]  bf16
    b4_ref,       # [1, 256]    f32
    out_ref,      # [TB, 256]   out dtype
):
    tb = t_ref.shape[0]

    # --- sinusoidal embedding in one shot: [sin(t*f) | cos(t*f)] == sin(t*f + phase) ---
    arg = t_ref[...] * freqs_ref[...] + phase_ref[...]          # [TB, 256] f32
    emb256 = jnp.sin(arg).astype(jnp.bfloat16)                   # [TB, 256] bf16

    # --- time_embed MLP: single K=256 dot (full-depth MXU push on v6e/v7x) ---
    h = (
        jnp.dot(emb256, w1_ref[...], preferred_element_type=jnp.float32)
        + b1_ref[...]
    )                                                            # [TB, 1024] f32
    h = h * jax.nn.sigmoid(h)                                    # SiLU
    t_emb = (
        jnp.dot(h.astype(jnp.bfloat16), w2_ref[...], preferred_element_type=jnp.float32)
        + b2_ref[...]
    )                                                            # [TB, 256] f32

    # --- label embedding: 4-way broadcast select (exact gather, VPU-only) ---
    y = y_ref[...]                                               # [TB, 1] int32
    emb_tbl = emb_ref[...]                                       # [C, 128] f32
    l_emb = jnp.zeros((tb, LABEL_DIM), jnp.float32)
    for c in range(NUM_CLASSES):
        l_emb = jnp.where(y == c, emb_tbl[c:c + 1, :], l_emb)    # [TB, 128] f32

    # --- fusion MLP (split-weight form avoids the [TB,384] lane concat) ---
    g = (
        jnp.dot(t_emb.astype(jnp.bfloat16), w3t_ref[...], preferred_element_type=jnp.float32)
        + jnp.dot(l_emb.astype(jnp.bfloat16), w3l_ref[...], preferred_element_type=jnp.float32)
        + b3_ref[...]
    )                                                            # [TB, 512] f32
    g = g * jax.nn.sigmoid(g)                                    # SiLU
    out = (
        jnp.dot(g.astype(jnp.bfloat16), w4_ref[...], preferred_element_type=jnp.float32)
        + b4_ref[...]
    )                                                            # [TB, 256] f32
    out_ref[...] = out.astype(out_ref.dtype)


def conditional_embedding(t, y, params, *, batch_tile=None, out_dtype=jnp.float32):
    """t: [B] float timesteps, y: [B] int labels -> [B, 256] in out_dtype."""
    B = t.shape[0]

    if batch_tile is None:
        # Latency/step-overhead bound: one grid step for small B; 1024-row tiles
        # (grid >= 2, megacore-splittable on v7x) for big B.
        batch_tile = B if B <= 1024 else 1024

    grid_b = pl.cdiv(B, batch_tile)
    Bp = grid_b * batch_tile
    # Block row dim must be a multiple of 8 unless it spans the whole (padded) array.
    assert grid_b == 1 or batch_tile % 8 == 0, (
        "batch_tile must be a multiple of 8 when the grid has more than one step"
    )

    t2d = t.astype(jnp.float32).reshape(B, 1)
    y2d = y.astype(jnp.int32).reshape(B, 1)
    if Bp != B:
        t2d = jnp.pad(t2d, ((0, Bp - B), (0, 0)))
        y2d = jnp.pad(y2d, ((0, Bp - B), (0, 0)))

    # Sinusoid tables hoisted out of the kernel: [freqs|freqs] and [0|pi/2] so the
    # kernel produces sin and cos halves with a single [TB,256] sin().
    freqs = jnp.exp(
        jnp.arange(HALF, dtype=jnp.float32) * (-math.log(10000.0) / (HALF - 1))
    )
    freqs_full = jnp.concatenate([freqs, freqs]).reshape(1, TIME_DIM)
    phase = jnp.concatenate(
        [jnp.zeros((HALF,), jnp.float32), jnp.full((HALF,), math.pi / 2, jnp.float32)]
    ).reshape(1, TIME_DIM)

    # Resident operands: full-array blocks with a constant index_map -> DMA'd once,
    # kept in VMEM across the whole batch grid.
    def const_spec(arr):
        return pl.BlockSpec(arr.shape, lambda i: (0, 0))

    def row_spec(feat):
        return pl.BlockSpec((batch_tile, feat), lambda i: (i, 0))

    resident = (
        freqs_full, phase,
        params["w1"], params["b1"],
        params["w2"], params["b2"],
        params["emb"],
        params["w3_t"], params["w3_l"], params["b3"],
        params["w4"], params["b4"],
    )

    # Advisory cost estimate so XLA overlaps neighbouring ops with this short call.
    flops_per_row = 2 * (
        TIME_DIM * 4 * TIME_DIM      # 256 x 1024
        + 4 * TIME_DIM * TIME_DIM    # 1024 x 256
        + TIME_DIM * 2 * TIME_DIM    # 256 x 512
        + LABEL_DIM * 2 * TIME_DIM   # 128 x 512
        + 2 * TIME_DIM * TIME_DIM    # 512 x 256
    )
    trans_per_row = TIME_DIM + 4 * TIME_DIM + 2 * TIME_DIM      # sin + two SiLU sigmoids
    weight_bytes = sum(int(a.size) * a.dtype.itemsize for a in resident)
    out_itemsize = jnp.dtype(out_dtype).itemsize
    bytes_accessed = weight_bytes + Bp * (4 + 4 + TIME_DIM * out_itemsize)
    cost = pl.CostEstimate(
        flops=flops_per_row * Bp,
        transcendentals=trans_per_row * Bp,
        bytes_accessed=bytes_accessed,
    )

    out = pl.pallas_call(
        cond_embed_kernel,
        out_shape=jax.ShapeDtypeStruct((Bp, TIME_DIM), out_dtype),
        grid=(grid_b,),
        in_specs=[row_spec(1), row_spec(1)] + [const_spec(a) for a in resident],
        out_specs=row_spec(TIME_DIM),
        compiler_params=pltpu.CompilerParams(
            dimension_semantics=("parallel",),        # split batch across TCs (v7x)
            vmem_limit_bytes=40 * 1024 * 1024,        # room for TB=1024 on v5e's small default
        ),
        cost_estimate=cost,
    )(t2d, y2d, *resident)

    return out[:B]


def init_params(key):
    """Deterministic synthetic parameters.

    Linear weights are stored pre-transposed as [in, out] and cast to bf16 (f32
    accumulation happens inside the kernel); w3 is split along its input axis so
    the fusion layer needs no lane-axis concat. Biases and the (tiny) embedding
    table stay f32.
    """
    ks = jax.random.split(key, 5)

    def lin(k, fan_in, fan_out):
        bound = 1.0 / math.sqrt(fan_in)
        kw, kb = jax.random.split(k)
        w = jax.random.uniform(kw, (fan_in, fan_out), jnp.float32, -bound, bound)
        b = jax.random.uniform(kb, (1, fan_out), jnp.float32, -bound, bound)
        return w, b

    w1, b1 = lin(ks[0], TIME_DIM, TIME_DIM * 4)
    w2, b2 = lin(ks[1], TIME_DIM * 4, TIME_DIM)
    emb = jax.random.normal(ks[2], (NUM_CLASSES, LABEL_DIM), jnp.float32)
    w3, b3 = lin(ks[3], TIME_DIM + LABEL_DIM, TIME_DIM * 2)
    w4, b4 = lin(ks[4], TIME_DIM * 2, TIME_DIM)

    return dict(
        w1=w1.astype(jnp.bfloat16),
        b1=b1,
        w2=w2.astype(jnp.bfloat16),
        b2=b2,
        emb=emb,
        w3_t=w3[:TIME_DIM].astype(jnp.bfloat16),
        w3_l=w3[TIME_DIM:].astype(jnp.bfloat16),
        b3=b3,
        w4=w4.astype(jnp.bfloat16),
        b4=b4,
    )


def reference(t, y, p):
    """Pure-JAX reference mirroring the module semantics with the same bf16 weights."""
    freqs = jnp.exp(
        jnp.arange(HALF, dtype=jnp.float32) * (-math.log(10000.0) / (HALF - 1))
    )
    arg = t.astype(jnp.float32)[:, None] * freqs[None, :]
    sin_emb = jnp.concatenate([jnp.sin(arg), jnp.cos(arg)], axis=-1).astype(jnp.bfloat16)

    h = jnp.dot(sin_emb, p["w1"], preferred_element_type=jnp.float32) + p["b1"]
    h = h * jax.nn.sigmoid(h)
    t_emb = jnp.dot(h.astype(jnp.bfloat16), p["w2"], preferred_element_type=jnp.float32) + p["b2"]

    l_emb = p["emb"][y]                                           # f32 gather

    w3 = jnp.concatenate([p["w3_t"], p["w3_l"]], axis=0)
    c = jnp.concatenate([t_emb, l_emb], axis=-1).astype(jnp.bfloat16)
    g = jnp.dot(c, w3, preferred_element_type=jnp.float32) + p["b3"]
    g = g * jax.nn.sigmoid(g)
    return jnp.dot(g.astype(jnp.bfloat16), p["w4"], preferred_element_type=jnp.float32) + p["b4"]


if __name__ == "__main__":
    key = jax.random.PRNGKey(0)
    kp, kt, ky = jax.random.split(key, 3)

    B = 16  # small demo batch
    params = init_params(kp)
    # timesteps drawn from linspace(0, 1, 1001) like the PyTorch script's `t`
    t_grid = jnp.linspace(0.0, 1.0, 1001)
    t = t_grid[jax.random.randint(kt, (B,), 0, 1001)]
    y = jax.random.randint(ky, (B,), 0, NUM_CLASSES)

    # Default policy: whole batch in one grid step.
    out = conditional_embedding(t, y, params)
    out = jax.block_until_ready(out)

    # Also exercise the multi-step tiled path (grid=(2,)).
    out_tiled = conditional_embedding(t, y, params, batch_tile=8)
    out_tiled = jax.block_until_ready(out_tiled)

    ref = reference(t, y, params)
    assert out.shape == (B, TIME_DIM)
    # bf16 weights/activations on the MXU: tolerance relaxed vs a pure f32 path.
    np.testing.assert_allclose(np.asarray(out), np.asarray(ref), rtol=1e-2, atol=1e-2)
    np.testing.assert_allclose(np.asarray(out_tiled), np.asarray(ref), rtol=1e-2, atol=1e-2)
    print("KERNEL_OK")
</pallas_src>

<mosaic_0001>
module attributes {stable_mosaic.version = 11 : i64} {
  func.func @cond_embed_kernel(%arg0: i32, %arg1: memref<16x1xf32, #tpu.memory_space<vmem>>, %arg2: memref<16x1xi32, #tpu.memory_space<vmem>>, %arg3: memref<1x256xf32, #tpu.memory_space<vmem>>, %arg4: memref<1x256xf32, #tpu.memory_space<vmem>>, %arg5: memref<256x1024xbf16, #tpu.memory_space<vmem>>, %arg6: memref<1x1024xf32, #tpu.memory_space<vmem>>, %arg7: memref<1024x256xbf16, #tpu.memory_space<vmem>>, %arg8: memref<1x256xf32, #tpu.memory_space<vmem>>, %arg9: memref<4x128xf32, #tpu.memory_space<vmem>>, %arg10: memref<256x512xbf16, #tpu.memory_space<vmem>>, %arg11: memref<128x512xbf16, #tpu.memory_space<vmem>>, %arg12: memref<1x512xf32, #tpu.memory_space<vmem>>, %arg13: memref<512x256xbf16, #tpu.memory_space<vmem>>, %arg14: memref<1x256xf32, #tpu.memory_space<vmem>>, %arg15: memref<16x256xf32, #tpu.memory_space<vmem>>) attributes {dimension_semantics = [#tpu.dimension_semantics<parallel>], iteration_bounds = array<i64: 1>, scalar_prefetch = 0 : i64, scratch_operands = 0 : i64, tpu.core_type = #tpu.core_type<tc>, window_params = [{transform_indices = @transform_0, window_bounds = array<i64: 16, 1>}, {transform_indices = @transform_1, window_bounds = array<i64: 16, 1>}, {pipeline_mode = #tpu.pipeline_mode<synchronous>, transform_indices = @transform_2, window_bounds = array<i64: 1, 256>}, {pipeline_mode = #tpu.pipeline_mode<synchronous>, transform_indices = @transform_3, window_bounds = array<i64: 1, 256>}, {pipeline_mode = #tpu.pipeline_mode<synchronous>, transform_indices = @transform_4, window_bounds = array<i64: 256, 1024>}, {pipeline_mode = #tpu.pipeline_mode<synchronous>, transform_indices = @transform_5, window_bounds = array<i64: 1, 1024>}, {pipeline_mode = #tpu.pipeline_mode<synchronous>, transform_indices = @transform_6, window_bounds = array<i64: 1024, 256>}, {pipeline_mode = #tpu.pipeline_mode<synchronous>, transform_indices = @transform_7, window_bounds = array<i64: 1, 256>}, {pipeline_mode = #tpu.pipeline_mode<synchronous>, transform_indices = @transform_8, window_bounds = array<i64: 4, 128>}, {pipeline_mode = #tpu.pipeline_mode<synchronous>, transform_indices = @transform_9, window_bounds = array<i64: 256, 512>}, {pipeline_mode = #tpu.pipeline_mode<synchronous>, transform_indices = @transform_10, window_bounds = array<i64: 128, 512>}, {pipeline_mode = #tpu.pipeline_mode<synchronous>, transform_indices = @transform_11, window_bounds = array<i64: 1, 512>}, {pipeline_mode = #tpu.pipeline_mode<synchronous>, transform_indices = @transform_12, window_bounds = array<i64: 512, 256>}, {pipeline_mode = #tpu.pipeline_mode<synchronous>, transform_indices = @transform_13, window_bounds = array<i64: 1, 256>}, {transform_indices = @transform_14, window_bounds = array<i64: 16, 256>}]} {
    %c0 = arith.constant 0 : index
    %c0_0 = arith.constant 0 : index
    %0 = vector.load %arg1[%c0, %c0_0] : memref<16x1xf32, #tpu.memory_space<vmem>>, vector<16x1xf32>
    %c0_1 = arith.constant 0 : index
    %c0_2 = arith.constant 0 : index
    %1 = vector.load %arg3[%c0_1, %c0_2] : memref<1x256xf32, #tpu.memory_space<vmem>>, vector<1x256xf32>
    %2 = vector.broadcast %0 : vector<16x1xf32> to vector<16x256xf32>
    %3 = vector.broadcast %1 : vector<1x256xf32> to vector<16x256xf32>
    %4 = arith.mulf %2, %3 : vector<16x256xf32>
    %c0_3 = arith.constant 0 : index
    %c0_4 = arith.constant 0 : index
    %5 = vector.load %arg4[%c0_3, %c0_4] : memref<1x256xf32, #tpu.memory_space<vmem>>, vector<1x256xf32>
    %6 = vector.broadcast %5 : vector<1x256xf32> to vector<16x256xf32>
    %7 = arith.addf %4, %6 : vector<16x256xf32>
    %8 = math.sin %7 : vector<16x256xf32>
    %9 = arith.truncf %8 : vector<16x256xf32> to vector<16x256xbf16>
    %c0_5 = arith.constant 0 : index
    %c0_6 = arith.constant 0 : index
    %10 = vector.load %arg5[%c0_5, %c0_6] : memref<256x1024xbf16, #tpu.memory_space<vmem>>, vector<256x1024xbf16>
    %cst = arith.constant dense<0.000000e+00> : vector<16x1024xf32>
    %11 = tpu.matmul %9, %10, %cst {dimension_numbers = #tpu.dot_dimension_numbers<[1], [0], [0], [1], [0, 0, 1, 1], [], []>} : vector<16x256xbf16>, vector<256x1024xbf16>, vector<16x1024xf32> -> vector<16x1024xf32>
    %c0_7 = arith.constant 0 : index
    %c0_8 = arith.constant 0 : index
    %12 = vector.load %arg6[%c0_7, %c0_8] : memref<1x1024xf32, #tpu.memory_space<vmem>>, vector<1x1024xf32>
    %13 = vector.broadcast %12 : vector<1x1024xf32> to vector<16x1024xf32>
    %14 = arith.addf %11, %13 : vector<16x1024xf32>
    %15 = arith.negf %14 : vector<16x1024xf32>
    %16 = math.exp %15 : vector<16x1024xf32>
    %cst_9 = arith.constant 1.000000e+00 : f32
    %17 = vector.broadcast %cst_9 : f32 to vector<16x1024xf32>
    %18 = arith.addf %17, %16 : vector<16x1024xf32>
    %19 = arith.divf %17, %18 : vector<16x1024xf32>
    %20 = arith.mulf %14, %19 : vector<16x1024xf32>
    %21 = arith.truncf %20 : vector<16x1024xf32> to vector<16x1024xbf16>
    %c0_10 = arith.constant 0 : index
    %c0_11 = arith.constant 0 : index
    %22 = vector.load %arg7[%c0_10, %c0_11] : memref<1024x256xbf16, #tpu.memory_space<vmem>>, vector<1024x256xbf16>
    %cst_12 = arith.constant dense<0.000000e+00> : vector<16x256xf32>
    %23 = tpu.matmul %21, %22, %cst_12 {dimension_numbers = #tpu.dot_dimension_numbers<[1], [0], [0], [1], [0, 0, 1, 1], [], []>} : vector<16x1024xbf16>, vector<1024x256xbf16>, vector<16x256xf32> -> vector<16x256xf32>
    %c0_13 = arith.constant 0 : index
    %c0_14 = arith.constant 0 : index
    %24 = vector.load %arg8[%c0_13, %c0_14] : memref<1x256xf32, #tpu.memory_space<vmem>>, vector<1x256xf32>
    %25 = vector.broadcast %24 : vector<1x256xf32> to vector<16x256xf32>
    %26 = arith.addf %23, %25 : vector<16x256xf32>
    %c0_15 = arith.constant 0 : index
    %c0_16 = arith.constant 0 : index
    %27 = vector.load %arg2[%c0_15, %c0_16] : memref<16x1xi32, #tpu.memory_space<vmem>>, vector<16x1xi32>
    %c0_17 = arith.constant 0 : index
    %c0_18 = arith.constant 0 : index
    %28 = vector.load %arg9[%c0_17, %c0_18] : memref<4x128xf32, #tpu.memory_space<vmem>>, vector<4x128xf32>
    %cst_19 = arith.constant 0.000000e+00 : f32
    %29 = vector.broadcast %cst_19 : f32 to vector<16x128xf32>
    %c0_i32 = arith.constant 0 : i32
    %30 = vector.broadcast %c0_i32 : i32 to vector<16x1xi32>
    %31 = arith.cmpi eq, %27, %30 : vector<16x1xi32>
    %32 = vector.extract_strided_slice %28 {offsets = [0, 0], sizes = [1, 128], strides = [1, 1]} : vector<4x128xf32> to vector<1x128xf32>
    %33 = vector.shape_cast %31 : vector<16x1xi1> to vector<16x1xi1>
    %34 = vector.broadcast %33 : vector<16x1xi1> to vector<16x128xi1>
    %35 = vector.shape_cast %32 : vector<1x128xf32> to vector<1x128xf32>
    %36 = vector.broadcast %35 : vector<1x128xf32> to vector<16x128xf32>
    %37 = arith.select %34, %36, %29 : vector<16x128xi1>, vector<16x128xf32>
    %c1_i32 = arith.constant 1 : i32
    %38 = vector.broadcast %c1_i32 : i32 to vector<16x1xi32>
    %39 = arith.cmpi eq, %27, %38 : vector<16x1xi32>
    %40 = vector.extract_strided_slice %28 {offsets = [1, 0], sizes = [1, 128], strides = [1, 1]} : vector<4x128xf32> to vector<1x128xf32>
    %41 = vector.shape_cast %39 : vector<16x1xi1> to vector<16x1xi1>
    %42 = vector.broadcast %41 : vector<16x1xi1> to vector<16x128xi1>
    %43 = vector.shape_cast %40 : vector<1x128xf32> to vector<1x128xf32>
    %44 = vector.broadcast %43 : vector<1x128xf32> to vector<16x128xf32>
    %45 = arith.select %42, %44, %37 : vector<16x128xi1>, vector<16x128xf32>
    %c2_i32 = arith.constant 2 : i32
    %46 = vector.broadcast %c2_i32 : i32 to vector<16x1xi32>
    %47 = arith.cmpi eq, %27, %46 : vector<16x1xi32>
    %48 = vector.extract_strided_slice %28 {offsets = [2, 0], sizes = [1, 128], strides = [1, 1]} : vector<4x128xf32> to vector<1x128xf32>
    %49 = vector.shape_cast %47 : vector<16x1xi1> to vector<16x1xi1>
    %50 = vector.broadcast %49 : vector<16x1xi1> to vector<16x128xi1>
    %51 = vector.shape_cast %48 : vector<1x128xf32> to vector<1x128xf32>
    %52 = vector.broadcast %51 : vector<1x128xf32> to vector<16x128xf32>
    %53 = arith.select %50, %52, %45 : vector<16x128xi1>, vector<16x128xf32>
    %c3_i32 = arith.constant 3 : i32
    %54 = vector.broadcast %c3_i32 : i32 to vector<16x1xi32>
    %55 = arith.cmpi eq, %27, %54 : vector<16x1xi32>
    %56 = vector.extract_strided_slice %28 {offsets = [3, 0], sizes = [1, 128], strides = [1, 1]} : vector<4x128xf32> to vector<1x128xf32>
    %57 = vector.shape_cast %55 : vector<16x1xi1> to vector<16x1xi1>
    %58 = vector.broadcast %57 : vector<16x1xi1> to vector<16x128xi1>
    %59 = vector.shape_cast %56 : vector<1x128xf32> to vector<1x128xf32>
    %60 = vector.broadcast %59 : vector<1x128xf32> to vector<16x128xf32>
    %61 = arith.select %58, %60, %53 : vector<16x128xi1>, vector<16x128xf32>
    %62 = arith.truncf %26 : vector<16x256xf32> to vector<16x256xbf16>
    %c0_20 = arith.constant 0 : index
    %c0_21 = arith.constant 0 : index
    %63 = vector.load %arg10[%c0_20, %c0_21] : memref<256x512xbf16, #tpu.memory_space<vmem>>, vector<256x512xbf16>
    %cst_22 = arith.constant dense<0.000000e+00> : vector<16x512xf32>
    %64 = tpu.matmul %62, %63, %cst_22 {dimension_numbers = #tpu.dot_dimension_numbers<[1], [0], [0], [1], [0, 0, 1, 1], [], []>} : vector<16x256xbf16>, vector<256x512xbf16>, vector<16x512xf32> -> vector<16x512xf32>
    %65 = arith.truncf %61 : vector<16x128xf32> to vector<16x128xbf16>
    %c0_23 = arith.constant 0 : index
    %c0_24 = arith.constant 0 : index
    %66 = vector.load %arg11[%c0_23, %c0_24] : memref<128x512xbf16, #tpu.memory_space<vmem>>, vector<128x512xbf16>
    %cst_25 = arith.constant dense<0.000000e+00> : vector<16x512xf32>
    %67 = tpu.matmul %65, %66, %cst_25 {dimension_numbers = #tpu.dot_dimension_numbers<[1], [0], [0], [1], [0, 0, 1, 1], [], []>} : vector<16x128xbf16>, vector<128x512xbf16>, vector<16x512xf32> -> vector<16x512xf32>
    %68 = arith.addf %64, %67 : vector<16x512xf32>
    %c0_26 = arith.constant 0 : index
    %c0_27 = arith.constant 0 : index
    %69 = vector.load %arg12[%c0_26, %c0_27] : memref<1x512xf32, #tpu.memory_space<vmem>>, vector<1x512xf32>
    %70 = vector.broadcast %69 : vector<1x512xf32> to vector<16x512xf32>
    %71 = arith.addf %68, %70 : vector<16x512xf32>
    %72 = arith.negf %71 : vector<16x512xf32>
    %73 = math.exp %72 : vector<16x512xf32>
    %cst_28 = arith.constant 1.000000e+00 : f32
    %74 = vector.broadcast %cst_28 : f32 to vector<16x512xf32>
    %75 = arith.addf %74, %73 : vector<16x512xf32>
    %76 = arith.divf %74, %75 : vector<16x512xf32>
    %77 = arith.mulf %71, %76 : vector<16x512xf32>
    %78 = arith.truncf %77 : vector<16x512xf32> to vector<16x512xbf16>
    %c0_29 = arith.constant 0 : index
    %c0_30 = arith.constant 0 : index
    %79 = vector.load %arg13[%c0_29, %c0_30] : memref<512x256xbf16, #tpu.memory_space<vmem>>, vector<512x256xbf16>
    %cst_31 = arith.constant dense<0.000000e+00> : vector<16x256xf32>
    %80 = tpu.matmul %78, %79, %cst_31 {dimension_numbers = #tpu.dot_dimension_numbers<[1], [0], [0], [1], [0, 0, 1, 1], [], []>} : vector<16x512xbf16>, vector<512x256xbf16>, vector<16x256xf32> -> vector<16x256xf32>
    %c0_32 = arith.constant 0 : index
    %c0_33 = arith.constant 0 : index
    %81 = vector.load %arg14[%c0_32, %c0_33] : memref<1x256xf32, #tpu.memory_space<vmem>>, vector<1x256xf32>
    %82 = vector.broadcast %81 : vector<1x256xf32> to vector<16x256xf32>
    %83 = arith.addf %80, %82 : vector<16x256xf32>
    %c0_34 = arith.constant 0 : index
    %c0_35 = arith.constant 0 : index
    %84 = vector.load %arg15[%c0_34, %c0_35] : memref<16x256xf32, #tpu.memory_space<vmem>>, vector<16x256xf32>
    tpu.vector_store %arg15[%c0_34, %c0_35], %83 {strides = array<i32>} : memref<16x256xf32, #tpu.memory_space<vmem>>, vector<16x256xf32>,
    return
  }
  func.func @transform_0(%arg0: i32) -> (i32, i32) {
    %c0_i32 = arith.constant 0 : i32
    %c0_i32_0 = arith.constant 0 : i32
    return %arg0, %c0_i32 : i32, i32
  }
  func.func @transform_1(%arg0: i32) -> (i32, i32) {
    %c0_i32 = arith.constant 0 : i32
    %c0_i32_0 = arith.constant 0 : i32
    return %arg0, %c0_i32 : i32, i32
  }
  func.func @transform_2(%arg0: i32) -> (i32, i32) {
    %c0_i32 = arith.constant 0 : i32
    %c0_i32_0 = arith.constant 0 : i32
    %c0_i32_1 = arith.constant 0 : i32
    return %c0_i32, %c0_i32_0 : i32, i32
  }
  func.func @transform_3(%arg0: i32) -> (i32, i32) {
    %c0_i32 = arith.constant 0 : i32
    %c0_i32_0 = arith.constant 0 : i32
    %c0_i32_1 = arith.constant 0 : i32
    return %c0_i32, %c0_i32_0 : i32, i32
  }
  func.func @transform_4(%arg0: i32) -> (i32, i32) {
    %c0_i32 = arith.constant 0 : i32
    %c0_i32_0 = arith.constant 0 : i32
    %c0_i32_1 = arith.constant 0 : i32
    return %c0_i32, %c0_i32_0 : i32, i32
  }
  func.func @transform_5(%arg0: i32) -> (i32, i32) {
    %c0_i32 = arith.constant 0 : i32
    %c0_i32_0 = arith.constant 0 : i32
    %c0_i32_1 = arith.constant 0 : i32
    return %c0_i32, %c0_i32_0 : i32, i32
  }
  func.func @transform_6(%arg0: i32) -> (i32, i32) {
    %c0_i32 = arith.constant 0 : i32
    %c0_i32_0 = arith.constant 0 : i32
    %c0_i32_1 = arith.constant 0 : i32
    return %c0_i32, %c0_i32_0 : i32, i32
  }
  func.func @transform_7(%arg0: i32) -> (i32, i32) {
    %c0_i32 = arith.constant 0 : i32
    %c0_i32_0 = arith.constant 0 : i32
    %c0_i32_1 = arith.constant 0 : i32
    return %c0_i32, %c0_i32_0 : i32, i32
  }
  func.func @transform_8(%arg0: i32) -> (i32, i32) {
    %c0_i32 = arith.constant 0 : i32
    %c0_i32_0 = arith.constant 0 : i32
    %c0_i32_1 = arith.constant 0 : i32
    return %c0_i32, %c0_i32_0 : i32, i32
  }
  func.func @transform_9(%arg0: i32) -> (i32, i32) {
    %c0_i32 = arith.constant 0 : i32
    %c0_i32_0 = arith.constant 0 : i32
    %c0_i32_1 = arith.constant 0 : i32
    return %c0_i32, %c0_i32_0 : i32, i32
  }
  func.func @transform_10(%arg0: i32) -> (i32, i32) {
    %c0_i32 = arith.constant 0 : i32
    %c0_i32_0 = arith.constant 0 : i32
    %c0_i32_1 = arith.constant 0 : i32
    return %c0_i32, %c0_i32_0 : i32, i32
  }
  func.func @transform_11(%arg0: i32) -> (i32, i32) {
    %c0_i32 = arith.constant 0 : i32
    %c0_i32_0 = arith.constant 0 : i32
    %c0_i32_1 = arith.constant 0 : i32
    return %c0_i32, %c0_i32_0 : i32, i32
  }
  func.func @transform_12(%arg0: i32) -> (i32, i32) {
    %c0_i32 = arith.constant 0 : i32
    %c0_i32_0 = arith.constant 0 : i32
    %c0_i32_1 = arith.constant 0 : i32
    return %c0_i32, %c0_i32_0 : i32, i32
  }
  func.func @transform_13(%arg0: i32) -> (i32, i32) {
    %c0_i32 = arith.constant 0 : i32
    %c0_i32_0 = arith.constant 0 : i32
    %c0_i32_1 = arith.constant 0 : i32
    return %c0_i32, %c0_i32_0 : i32, i32
  }
  func.func @transform_14(%arg0: i32) -> (i32, i32) {
    %c0_i32 = arith.constant 0 : i32
    %c0_i32_0 = arith.constant 0 : i32
    return %arg0, %c0_i32 : i32, i32
  }
}

</mosaic_0001>

<bundles_post_ra>
// kernel: tpu_custom_call.1
= control target key start
LH: loop header
LB: loop body
LE: loop exit
PB: predicated region body
PF: predicated region fallthrough
CT: control target
= control target key end

     0   :  { %19 = vsyncpa [#allocation3], 0  ;;  %s8740_s0 = inlined_call_operand.vmem [shape: f32[16,1], index: 0, kind: input, shape index: {}]   ;;  %s8741_s1 = inlined_call_operand.vmem [shape: s32[16,1], index: 1, kind: input, shape index: {}]   ;;  %s8742_s2 = inlined_call_operand.vmem [shape: f32[1,256], index: 2, kind: input, shape index: {}]   ;;  %s8743_s3 = inlined_call_operand.vmem [shape: f32[1,256], index: 3, kind: input, shape index: {}]   ;;  %s8744_s4 = inlined_call_operand.hbm [shape: bf16[256,1024], index: 4, kind: input, shape index: {}]   ;;  %s8745_s5 = inlined_call_operand.vmem [shape: f32[1,1024], index: 5, kind: input, shape index: {}]   ;;  %s8746_s6 = inlined_call_operand.hbm [shape: bf16[1024,256], index: 6, kind: input, shape index: {}]   ;;  %s8747_s7 = inlined_call_operand.vmem [shape: f32[1,256], index: 7, kind: input, shape index: {}]   ;;  %s8748_s8 = inlined_call_operand.vmem [shape: f32[4,128], index: 8, kind: input, shape index: {}]   ;;  %s8749_s9 = inlined_call_operand.hbm [shape: bf16[256,512], index: 9, kind: input, shape index: {}]   ;;  %s8750_s10 = inlined_call_operand.hbm [shape: bf16[128,512], index: 10, kind: input, shape index: {}]   ;;  %s8751_s11 = inlined_call_operand.vmem [shape: f32[1,512], index: 11, kind: input, shape index: {}]   ;;  %s8752_s12 = inlined_call_operand.hbm [shape: bf16[512,256], index: 12, kind: input, shape index: {}]   ;;  %s8753_s13 = inlined_call_operand.vmem [shape: f32[1,256], index: 13, kind: input, shape index: {}]   ;;  %s8754_s14 = inlined_call_operand.hbm [shape: f32[16,256], index: 14, kind: output, shape index: {}]  }
   0x1   :  { %20 = vsyncpa [#allocation6], 0 }
   0x2   :  { %21 = vsyncpa [#allocation9], 0  ;;  %s50_s15 = sshll.u32 %s8746_s6, 4  ;;  %s51_s15 = int_to_ptr.hbm [resolvable:$true] %s50_s15 }
   0x3   :  { %22 = vsyncpa [#allocation4], 0  ;;  %s7021_s16 = smov [#allocation5]   ;;  %s7022_s18 = smov 128  }
   0x4   :  { %s52_s17 = sshll.u32 %s7021_s16, 4  ;;  %s7023_s19 = smov 8   ;;  %s53_s17 = int_to_ptr.vmem [resolvable:$true] %s52_s17 }
   0x5   :  { %58 = dma.hbm_to_vmem [thread:$0]  %s51_s15, 16384, %s53_s17, [#allocation6], %s7022_s18, %s7022_s18, %s7023_s19  }
   0x6   :  { %s80_s22 = sshll.u32 %s8750_s10, 4  ;;  %s7024_s23 = smov [#allocation8]   ;;  %s81_s22 = int_to_ptr.hbm [resolvable:$true] %s80_s22 }
   0x7   :  { %s82_s24 = sshll.u32 %s7024_s23, 4  ;;  %s35_s26 = sshll.u32 %s8744_s4, 4  ;;  %s83_s24 = int_to_ptr.vmem [resolvable:$true] %s82_s24  ;;  %s36_s26 = int_to_ptr.hbm [resolvable:$true] %s35_s26 }
   0x8   :  { %s7025_s27 = smov 256   ;;  %s7026_s28 = smov 16  }
   0x9   :  { %88 = dma.hbm_to_vmem [thread:$0]  %s81_s22, 4096, %s83_s24, [#allocation9], %s7025_s27, %s7025_s27, %s7026_s28  }
   0xa   :  { %s7027_s29 = smov [#allocation2]   ;;  %s67_s16 = sshll.u32 %s8749_s9, 4  ;;  %s68_s16 = int_to_ptr.hbm [resolvable:$true] %s67_s16 }
   0xb   :  { %s37_s30 = sshll.u32 %s7027_s29, 4  ;;  %s7028_s17 = smov 512   ;;  %s38_s30 = int_to_ptr.vmem [resolvable:$true] %s37_s30 }
   0xc   :  { %s7029_s20 = smov 32   ;;  %s7030_s4 = smov [#allocation7]  }
   0xd   :  { %43 = dma.hbm_to_vmem [thread:$0]  %s36_s26, 16384, %s38_s30, [#allocation3], %s7028_s17, %s7028_s17, %s7029_s20  }
   0xe   :  { %s69_s21 = sshll.u32 %s7030_s4, 4  ;;  %s95_s6 = sshll.u32 %s8752_s12, 4  ;;  %s70_s21 = int_to_ptr.vmem [resolvable:$true] %s69_s21  ;;  %s96_s6 = int_to_ptr.hbm [resolvable:$true] %s95_s6 }
   0xf   :  { %75 = dma.hbm_to_vmem [thread:$0]  %s68_s16, 8192, %s70_s21, [#allocation6], %s7025_s27, %s7025_s27, %s7026_s28  }
  0x10   :  { %s7031_s22 = smov [#allocation10]  }
  0x11   :  { %s97_s24 = sshll.u32 %s7031_s22, 4  ;;  %s98_s24 = int_to_ptr.vmem [resolvable:$true] %s97_s24 }
  0x12   :  { %103 = dma.hbm_to_vmem [thread:$0]  %s96_s6, 8192, %s98_s24, [#allocation9], %s7022_s18, %s7022_s18, %s7023_s19  }
  0x13   :  { %7013 = dma.done.wait [#allocation3], 16384  }
  0x14   :  { %7014 = vsyncadd [#allocation3], 4294950912 }
  0x15   :  { %7015 = dma.done.wait [#allocation6], 24576  }
  0x16   :  { %7016 = vsyncadd [#allocation6], 4294942720 }
  0x17   :  { %7017 = dma.done.wait [#allocation9], 12288  }
  0x18   :  { %7018 = vsyncadd [#allocation9], 4294955008  ;;  %v7032_v0 = vmov 0   ;;  %v126_v1 = vld [vmem:[%s8740_s0] sm:$0xff]  ;;  %v3117_v4 = vld [vmem:[%s8741_s1 + $0x8] sm:$0xff]  ;;  %s4620_s22 = sshll.u32 %s8754_s14, 4  ;;  %s4621_s22 = int_to_ptr.hbm [resolvable:$true] %s4620_s22 }
  0x19   :  { %6770 = vset.pattern.permute.xlu0 %v7032_v0  ;;  %6771 = vset.pattern.permute.xlu1 %v7032_v0  ;;  %v3116_v2 = vld [vmem:[%s8741_s1] sm:$0xff]  ;;  %vm3120_vm2 = vcmp.eq.s32.totalorder %v3117_v4, 0  ;;  %v127_v6 = vld [vmem:[%s8740_s0 + $0x8] sm:$0xff]  ;;  %vm3135_vm3 = vcmp.eq.s32.totalorder %v3117_v4, 1  ;;  %vm3150_vm5 = vcmp.eq.s32.totalorder %v3117_v4, 2  ;;  %vm3165_vm7 = vcmp.eq.s32.totalorder %v3117_v4, 3 }
  0x1a   :  { %6772 = vset.pattern.permute.xlu2 %v7032_v0  ;;  %131 = vperm.xlu0 %6770, %v126_v1   ;;  %vm3119_vm0 = vcmp.eq.s32.totalorder %v3116_v2, 0  ;;  %vm3134_vm1 = vcmp.eq.s32.totalorder %v3116_v2, 1  ;;  %v3122_v7 = vsel %vm3120_vm2, 1, %v7032_v0  ;;  %v3137_v8 = vsel %vm3135_vm3, 1, %v7032_v0  ;;  %v7168_v13 = vld [vmem:[%s8742_s2] sm:$0x3] }
  0x1b   :  { %v3121_v3 = vsel %vm3119_vm0, 1, %v7032_v0  ;;  %v3136_v5 = vsel %vm3134_vm1, 1, %v7032_v0  ;;  %vm3149_vm4 = vcmp.eq.s32.totalorder %v3116_v2, 2  ;;  %vm3164_vm6 = vcmp.eq.s32.totalorder %v3116_v2, 3  ;;  %v7173_v14 = vld [vmem:[%s8743_s3] sm:$0x3] }
  0x1c   :  { %3124 = vperm.xlu1 %6771, %v3121_v3   ;;  %3139 = vperm.xlu2 %6772, %v3136_v5   ;;  %v3151_v9 = vsel %vm3149_vm4, 1, %v7032_v0  ;;  %v3152_v10 = vsel %vm3150_vm5, 1, %v7032_v0  ;;  %v3166_v11 = vsel %vm3164_vm6, 1, %v7032_v0  ;;  %v3167_v12 = vsel %vm3165_vm7, 1, %v7032_v0 }
  0x1d   :  { %v140_v15 = vperm.slane %v7168_v13, 0  ;;  %v141_v16 = vperm.slane %v7168_v13, 1  ;;  %v150_v17 = vperm.slane %v7173_v14, 0  ;;  %v151_v18 = vperm.slane %v7173_v14, 1 }
  0x1e   :  { %v7033_v51 = vmov 683565275   ;;  %v7034_v53 = vmov 2475754826   ;;  %v7035_v57 = vmov 2131351028  }
  0x1f   :  { %v7036_v60 = vmov 2102212464   ;;  %v7037_v63 = vmov 920167782   ;;  %v7038_v3 = vmov 1326507024  }
  0x22   :  { %136 = vperm.xlu0 %6770, %v127_v6  }
  0x24   :  { %3127 = vperm.xlu1 %6771, %v3122_v7   ;;  %3142 = vperm.xlu2 %6772, %v3137_v8  }
  0x2a   :  { %3154 = vperm.xlu0 %6770, %v3151_v9  }
  0x2c   :  { %3157 = vperm.xlu1 %6771, %v3152_v10   ;;  %3169 = vperm.xlu2 %6772, %v3166_v11  }
  0x32   :  { %3172 = vperm.xlu0 %6770, %v3167_v12  }
  0x8c   :  { %v132_v19 = vpop.permute.xlu0 %131 }
  0x8d   :  { %v144_v20 = vmul.f32 %v140_v15, %v132_v19  ;;  %v145_v21 = vmul.f32 %v141_v16, %v132_v19 }
  0x8f   :  { %v7181_v22 = vadd.f32 %v150_v17, %v144_v20  ;;  %v7185_v23 = vadd.f32 %v151_v18, %v145_v21 }
  0x91   :  { %v158_v24 = vand.u32 2147483647, %v7181_v22  ;;  %v161_v25 = vand.u32 2139095040, %v7181_v22  ;;  %v313_v26 = vand.u32 2147483647, %v7185_v23  ;;  %v316_v27 = vand.u32 2139095040, %v7185_v23 }
  0x93   :  { %v162_v28 = vshrl.u32 %v161_v25, 23  ;;  %v165_v29 = vand.u32 8388607, %v158_v24  ;;  %v317_v30 = vshrl.u32 %v316_v27, 23  ;;  %v320_v31 = vand.u32 8388607, %v313_v26 }
  0x94   :  { %v7195_v34 = vpop.permute.xlu0 %136 }
  0x95   :  { %v4635_v32 = vadd.s32 4294967169, %v162_v28  ;;  %v166_v33 = vor.u32 8388608, %v165_v29  ;;  %v4638_v35 = vadd.s32 4294967169, %v317_v30  ;;  %v321_v36 = vor.u32 8388608, %v320_v31 }
  0x96   :  { %v146_v39 = vmul.f32 %v140_v15, %v7195_v34 }
  0x97   :  { %v168_v37 = vadd.s32 1, %v4635_v32  ;;  %v323_v38 = vadd.s32 1, %v4638_v35  ;;  %v7198_v40 = vshll.u32 %v166_v33, 8  ;;  %v7200_v42 = vshll.u32 %v321_v36, 8 }
  0x98   :  { %v7202_v45 = vadd.f32 %v150_v17, %v146_v39 }
  0x99   :  { %vm169_vm8 = vcmp.gt.s32.totalorder %v168_v37, 0  ;;  %vm324_vm9 = vcmp.gt.s32.totalorder %v323_v38, 0  ;;  %v7205_v47 = vand.u32 65535, %v7198_v40  ;;  %v7208_v48 = vshrl.u32 %v7198_v40, 16 }
  0x9a   :  { %v170_v41 = vsel %vm169_vm8, %v168_v37, 0  ;;  %v325_v44 = vsel %vm324_vm9, %v323_v38, 0  ;;  %v7217_v55 = vand.u32 65535, %v7200_v42 }
  0x9b   :  { %v172_v43 = vand.u32 31, %v170_v41  ;;  %v7210_v49 = vand.u32 31, %v325_v44  ;;  %v7212_v50 = vshrl.u32 %v170_v41, 5  ;;  %v7259_v41 = vshrl.u32 %v325_v44, 5 }
  0x9d   :  { %v173_v46 = vsub.s32 32, %v172_v43  ;;  %v175_v52 = vshll.u32 %v7033_v51, %v172_v43  ;;  %v178_v54 = vshll.u32 %v7034_v53, %v172_v43  ;;  %v181_v59 = vshll.u32 %v7035_v57, %v172_v43 }
  0x9e   :  { %v184_v62 = vshll.u32 %v7036_v60, %v172_v43  ;;  %v187_v2 = vshll.u32 %v7037_v63, %v172_v43  ;;  %v7228_v8 = vsub.s32 32, %v7210_v49  ;;  %vm190_vm10 = vcmp.lt.s32.totalorder %v7212_v50, 1 }
  0x9f   :  { %v176_v56 = vshrl.u32 %v7034_v53, %v173_v46  ;;  %v179_v58 = vshrl.u32 %v7035_v57, %v173_v46  ;;  %v182_v61 = vshrl.u32 %v7036_v60, %v173_v46  ;;  %v185_v1 = vshrl.u32 %v7037_v63, %v173_v46 }
  0xa0   :  { %v188_v4 = vshrl.u32 %v7038_v3, %v173_v46  ;;  %vm191_vm11 = vcmp.lt.s32.totalorder %v7212_v50, 2  ;;  %v174_v11 = vshrl.u32 %v7033_v51, %v173_v46  ;;  %vm193_vm12 = vcmp.lt.s32.totalorder %v7212_v50, 4 }
  0xa1   :  { %v177_v5 = vor.u32 %v176_v56, %v175_v52  ;;  %v180_v6 = vor.u32 %v179_v58, %v178_v54  ;;  %v183_v7 = vor.u32 %v182_v61, %v181_v59  ;;  %v186_v9 = vor.u32 %v185_v1, %v184_v62 }
  0xa2   :  { %v189_v10 = vor.u32 %v188_v4, %v187_v2  ;;  %vm192_vm13 = vcmp.lt.s32.totalorder %v7212_v50, 3  ;;  %v330_v20 = vshll.u32 %v7033_v51, %v7210_v49  ;;  %v331_v28 = vshrl.u32 %v7034_v53, %v7228_v8 }
  0xa3   :  { %v198_v12 = vsel %vm190_vm10, %v177_v5, %v180_v6  ;;  %v202_v15 = vsel %vm190_vm10, %v180_v6, %v183_v7  ;;  %v199_v17 = vsel %vm193_vm12, %v186_v9, 920167782  ;;  %v195_v21 = vsel %vm193_vm12, %v183_v7, 2102212464 }
  0xa4   :  { %v203_v19 = vsel %vm193_vm12, %v189_v10, 1326507024  ;;  %v200_v25 = vsel %vm192_vm13, %v183_v7, %v199_v17  ;;  %v333_v31 = vshll.u32 %v7034_v53, %v7210_v49  ;;  %v334_v32 = vshrl.u32 %v7035_v57, %v7228_v8 }
  0xa5   :  { %v204_v27 = vsel %vm192_vm13, %v186_v9, %v203_v19  ;;  %v201_v29 = vsel %vm191_vm11, %v198_v12, %v200_v25  ;;  %v194_v38 = vsel %vm190_vm10, %v174_v11, %v177_v5  ;;  %v196_v39 = vsel %vm192_vm13, %v180_v6, %v195_v21 }
  0xa6   :  { %v205_v30 = vsel %vm191_vm11, %v202_v15, %v204_v27  ;;  %v231_v36 = vand.u32 65535, %v201_v29  ;;  %v232_v37 = vshrl.u32 %v201_v29, 16  ;;  %v7261_v43 = vor.u32 %v331_v28, %v330_v20 }
  0xa7   :  { %v209_v33 = vand.u32 65535, %v205_v30  ;;  %v210_v35 = vshrl.u32 %v205_v30, 16  ;;  %v7265_v54 = vor.u32 %v334_v32, %v333_v31  ;;  %v337_v56 = vshrl.u32 %v7036_v60, %v7228_v8 }
  0xa8   :  { %v234_v59 = vmul.u32 %v232_v37, %v7205_v47  ;;  %v235_v61 = vmul.u32 %v231_v36, %v7208_v48  ;;  %v336_v44 = vshll.u32 %v7035_v57, %v7210_v49  ;;  %v233_v2 = vmul.u32 %v231_v36, %v7205_v47 }
  0xa9   :  { %v212_v46 = vmul.u32 %v210_v35, %v7205_v47  ;;  %v213_v52 = vmul.u32 %v209_v33, %v7208_v48  ;;  %v211_v58 = vmul.u32 %v209_v33, %v7205_v47  ;;  %v214_v62 = vmul.u32 %v210_v35, %v7208_v48 }
  0xaa   :  { %v236_v4 = vmul.u32 %v232_v37, %v7208_v48  ;;  %v237_v9 = vshll.u32 %v234_v59, 16  ;;  %v239_v11 = vshll.u32 %v235_v61, 16  ;;  %v7277_v12 = vor.u32 %v337_v56, %v336_v44 }
  0xab   :  { %v215_v1 = vshll.u32 %v212_v46, 16  ;;  %v216_v5 = vshrl.u32 %v212_v46, 16  ;;  %v217_v6 = vshll.u32 %v213_v52, 16  ;;  %v218_v7 = vshrl.u32 %v213_v52, 16 }
  0xac   :  { %vm241_vm15 = vc.u32 %v233_v2, %v237_v9  ;;  %v243_v17 = vadd.s32 %v237_v9, %v233_v2  ;;  %v340_v19 = vshrl.u32 %v7037_v63, %v7228_v8  ;;  %v339_v48 = vshll.u32 %v7036_v60, %v7210_v49 }
  0xad   :  { %vm219_vm14 = vc.u32 %v211_v58, %v215_v1  ;;  %v221_v10 = vadd.s32 %v215_v1, %v211_v58  ;;  %v242_v47 = vsel %vm241_vm15, 1, %v7032_v0  ;;  %v342_v27 = vshll.u32 %v7037_v63, %v7210_v49 }
  0xae   :  { %v220_v15 = vsel %vm219_vm14, 1, %v7032_v0  ;;  %v244_v25 = vadd.s32 %v242_v47, %v236_v4  ;;  %vm245_vm1 = vc.u32 %v243_v17, %v239_v11  ;;  %v341_v30 = vor.u32 %v340_v19, %v339_v48 }
  0xaf   :  { %v222_v20 = vadd.s32 %v220_v15, %v214_v62  ;;  %vm223_vm0 = vc.u32 %v221_v10, %v217_v6  ;;  %v246_v29 = vsel %vm245_vm1, 1, %v7032_v0  ;;  %v343_v31 = vshrl.u32 %v7038_v3, %v7228_v8 }
  0xb0   :  { %v224_v21 = vsel %vm223_vm0, 1, %v7032_v0  ;;  %v238_v32 = vshrl.u32 %v234_v59, 16  ;;  %v240_v33 = vshrl.u32 %v235_v61, 16  ;;  %v7291_v35 = vadd.s32 %v243_v17, %v239_v11 }
  0xb1   :  { %v226_v28 = vadd.s32 %v224_v21, %v222_v20  ;;  %v248_v36 = vadd.s32 %v246_v29, %v244_v25  ;;  %v344_v46 = vor.u32 %v343_v31, %v342_v27  ;;  %vm345_vm2 = vcmp.lt.s32.totalorder %v7259_v41, 1 }
  0xb2   :  { %vm348_vm3 = vcmp.lt.s32.totalorder %v7259_v41, 4  ;;  %vm347_vm4 = vcmp.lt.s32.totalorder %v7259_v41, 3  ;;  %v353_v49 = vsel %vm345_vm2, %v7261_v43, %v7265_v54  ;;  %vm346_vm5 = vcmp.lt.s32.totalorder %v7259_v41, 2 }
  0xb3   :  { %v227_v37 = vadd.s32 %v226_v28, %v216_v5  ;;  %v249_v52 = vadd.s32 %v248_v36, %v238_v32  ;;  %v354_v56 = vsel %vm348_vm3, %v341_v30, 920167782  ;;  %v357_v61 = vsel %vm345_vm2, %v7265_v54, %v7277_v12 }
  0xb4   :  { %v355_v59 = vsel %vm347_vm4, %v7277_v12, %v354_v56  ;;  %v197_v44 = vsel %vm191_vm11, %v194_v38, %v196_v39  ;;  %v358_v2 = vsel %vm348_vm3, %v344_v46, 1326507024  ;;  %v363_v5 = vshrl.u32 %v7200_v42, 16 }
  0xb5   :  { %v7302_v58 = vadd.s32 %v227_v37, %v218_v7  ;;  %v250_v62 = vadd.s32 %v249_v52, %v240_v33  ;;  %v356_v1 = vsel %vm346_vm5, %v353_v49, %v355_v59  ;;  %v359_v4 = vsel %vm347_vm4, %v341_v30, %v358_v2 }
  0xb6   :  { %v386_v6 = vand.u32 65535, %v356_v1  ;;  %v360_v50 = vsel %vm346_vm5, %v357_v61, %v359_v4  ;;  %v387_v38 = vshrl.u32 %v356_v1, 16  ;;  %v471_v39 = vand.u32 2139095040, %v7202_v45 }
  0xb7   :  { %vm253_vm6 = vc.u32 %v7302_v58, %v7291_v35  ;;  %v254_v7 = vadd.s32 1, %v250_v62  ;;  %v251_v9 = vmul.u32 %v7198_v40, %v197_v44  ;;  %v364_v10 = vand.u32 65535, %v360_v50 }
  0xb8   :  { %v365_v11 = vshrl.u32 %v360_v50, 16  ;;  %v389_v17 = vmul.u32 %v387_v38, %v7217_v55  ;;  %v390_v19 = vmul.u32 %v386_v6, %v363_v5  ;;  %v388_v21 = vmul.u32 %v386_v6, %v7217_v55 }
  0xb9   :  { %v255_v15 = vsel %vm253_vm6, %v254_v7, %v250_v62  ;;  %v368_v48 = vmul.u32 %v364_v10, %v363_v5  ;;  %v391_v25 = vmul.u32 %v387_v38, %v363_v5  ;;  %v472_v28 = vshrl.u32 %v471_v39, 23 }
  0xba   :  { %v256_v20 = vadd.s32 %v255_v15, %v251_v9  ;;  %v367_v47 = vmul.u32 %v365_v11, %v7217_v55  ;;  %v392_v27 = vshll.u32 %v389_v17, 16  ;;  %v366_v30 = vmul.u32 %v364_v10, %v7217_v55 }
  0xbb   :  { %v369_v31 = vmul.u32 %v365_v11, %v363_v5  ;;  %v372_v32 = vshll.u32 %v368_v48, 16  ;;  %v394_v33 = vshll.u32 %v390_v19, 16  ;;  %v350_v55 = vsel %vm348_vm3, %v7277_v12, 2102212464 }
  0xbc   :  { %v257_v29 = vadd.s32 536870912, %v256_v20  ;;  %v370_v40 = vshll.u32 %v367_v47, 16  ;;  %vm396_vm7 = vc.u32 %v388_v21, %v392_v27  ;;  %v398_v36 = vadd.s32 %v392_v27, %v388_v21 }
  0xbd   :  { %v397_v52 = vsel %vm396_vm7, 1, %v7032_v0  ;;  %v329_v44 = vshrl.u32 %v7033_v51, %v7228_v8  ;;  %v4641_v2 = vadd.s32 4294967169, %v472_v28  ;;  %v371_v5 = vshrl.u32 %v367_v47, 16 }
  0xbe   :  { %v7331_v37 = vshrl.u32 %v257_v29, 30  ;;  %vm374_vm8 = vc.u32 %v366_v30, %v370_v40  ;;  %v376_v46 = vadd.s32 %v370_v40, %v366_v30  ;;  %v399_v56 = vadd.s32 %v397_v52, %v391_v25 }
  0xbf   :  { %v375_v49 = vsel %vm374_vm8, 1, %v7032_v0  ;;  %vm400_vm9 = vc.u32 %v398_v36, %v394_v33  ;;  %v349_v50 = vsel %vm345_vm2, %v329_v44, %v7261_v43  ;;  %v351_v12 = vsel %vm347_vm4, %v7265_v54, %v350_v55 }
  0xc0   :  { %v259_v59 = vshll.u32 %v7331_v37, 30  ;;  %v377_v61 = vadd.s32 %v375_v49, %v369_v31  ;;  %vm378_vm10 = vc.u32 %v376_v46, %v372_v32  ;;  %v401_v1 = vsel %vm400_vm9, 1, %v7032_v0 }
  0xc1   :  { %v379_v62 = vsel %vm378_vm10, 1, %v7032_v0  ;;  %v403_v7 = vadd.s32 %v401_v1, %v399_v56  ;;  %v393_v38 = vshrl.u32 %v389_v17, 16  ;;  %v478_v39 = vadd.s32 1, %v4641_v2 }
  0xc2   :  { %v260_v4 = vsub.s32 %v256_v20, %v259_v59  ;;  %v381_v6 = vadd.s32 %v379_v62, %v377_v61  ;;  %v373_v9 = vshrl.u32 %v368_v48, 16  ;;  %v395_v11 = vshrl.u32 %v390_v19, 16 }
  0xc3   :  { %v404_v15 = vadd.s32 %v403_v7, %v393_v38  ;;  %v468_v20 = vand.u32 2147483647, %v7202_v45  ;;  %vm479_vm12 = vcmp.gt.s32.totalorder %v478_v39, 0  ;;  %v352_v21 = vsel %vm346_vm5, %v349_v50, %v351_v12 }
  0xc4   :  { %vm261_vm11 = vcmp.lt.s32.totalorder %v260_v4, 0  ;;  %v262_v8 = vsub.s32 0, %v260_v4  ;;  %v382_v10 = vadd.s32 %v381_v6, %v371_v5  ;;  %v480_v25 = vsel %vm479_vm12, %v478_v39, 0 }
  0xc5   :  { %v7354_v54 = vadd.s32 %v398_v36, %v394_v33  ;;  %v405_v17 = vadd.s32 %v404_v15, %v395_v11  ;;  %v482_v28 = vand.u32 31, %v480_v25  ;;  %v252_v30 = vadd.s32 %v7291_v35, %v7302_v58 }
  0xc6   :  { %v263_v47 = vsel %vm261_vm11, %v262_v8, %v260_v4  ;;  %v7352_v43 = vadd.s32 %v382_v10, %v373_v9  ;;  %v406_v41 = vmul.u32 %v7200_v42, %v352_v21  ;;  %v475_v40 = vand.u32 8388607, %v468_v20 }
  0xc7   :  { %v264_v27 = vclz %v263_v47  ;;  %v409_v19 = vadd.s32 1, %v405_v17  ;;  %v7358_v48 = vsub.s32 32, %v482_v28  ;;  %v7365_v32 = vshrl.u32 %v480_v25, 5 }
  0xc8   :  { %vm408_vm13 = vc.u32 %v7352_v43, %v7354_v54  ;;  %v485_v46 = vshll.u32 %v7033_v51, %v482_v28  ;;  %v488_v59 = vshll.u32 %v7034_v53, %v482_v28  ;;  %v494_v55 = vshll.u32 %v7036_v60, %v482_v28 }
  0xc9   :  { %v4636_v29 = vadd.s32 4294967294, %v264_v27  ;;  %v410_v31 = vsel %vm408_vm13, %v409_v19, %v405_v17  ;;  %v486_v52 = vshrl.u32 %v7034_v53, %v7358_v48  ;;  %v489_v35 = vshrl.u32 %v7035_v57, %v7358_v48 }
  0xca   :  { %v411_v36 = vadd.s32 %v410_v31, %v406_v41  ;;  %v492_v42 = vshrl.u32 %v7036_v60, %v7358_v48  ;;  %v495_v61 = vshrl.u32 %v7037_v63, %v7358_v48  ;;  %v491_v1 = vshll.u32 %v7035_v57, %v482_v28 }
  0xcb   :  { %vm4637_vm14 = vcmp.lt.s32.totalorder %v4636_v29, 0  ;;  %v498_v2 = vshrl.u32 %v7038_v3, %v7358_v48  ;;  %v7383_v7 = vor.u32 %v486_v52, %v485_v46  ;;  %v7385_v38 = vor.u32 %v489_v35, %v488_v59 }
  0xcc   :  { %v267_v33 = vsel %vm4637_vm14, 0, %v4636_v29  ;;  %v412_v58 = vadd.s32 536870912, %v411_v36  ;;  %v496_v50 = vor.u32 %v495_v61, %v494_v55  ;;  %v7387_v39 = vor.u32 %v492_v42, %v491_v1 }
  0xcd   :  { %v268_v49 = vsub.s32 32, %v267_v33  ;;  %v272_v56 = vsub.s32 4294967266, %v267_v33  ;;  %v269_v5 = vshll.u32 %v260_v4, %v267_v33  ;;  %v497_v8 = vshll.u32 %v7037_v63, %v482_v28 }
  0xce   :  { %v7381_v6 = vshrl.u32 %v412_v58, 30  ;;  %v476_v10 = vor.u32 8388608, %v475_v40  ;;  %vm503_vm15 = vcmp.lt.s32.totalorder %v7365_v32, 4  ;;  %vm500_vm0 = vcmp.lt.s32.totalorder %v7365_v32, 1 }
  0xcf   :  { %v270_v44 = vshrl.u32 %v252_v30, %v268_v49  ;;  %v273_v62 = vadd.s32 127, %v272_v56  ;;  %v499_v47 = vor.u32 %v498_v2, %v497_v8  ;;  %vm502_vm1 = vcmp.lt.s32.totalorder %v7365_v32, 3 }
  0xd0   :  { %v414_v9 = vshll.u32 %v7381_v6, 30  ;;  %v509_v21 = vsel %vm503_vm15, %v496_v50, 920167782  ;;  %v508_v27 = vsel %vm500_vm0, %v7383_v7, %v7385_v38  ;;  %v7403_v29 = vshll.u32 %v476_v10, 8 }
  0xd1   :  { %v274_v12 = vshll.u32 %v273_v62, 23  ;;  %v271_v11 = vor.u32 %v270_v44, %v269_v5  ;;  %v510_v17 = vsel %vm502_vm1, %v7387_v39, %v509_v21  ;;  %vm501_vm3 = vcmp.lt.s32.totalorder %v7365_v32, 2 }
  0xd2   :  { %v415_v4 = vsub.s32 %v411_v36, %v414_v9  ;;  %v512_v30 = vsel %vm500_vm0, %v7385_v38, %v7387_v39  ;;  %v513_v41 = vsel %vm503_vm15, %v499_v47, 1326507024  ;;  %v511_v40 = vsel %vm501_vm3, %v508_v27, %v510_v17 }
  0xd3   :  { %v275_v15 = vor.u32 4788187, %v274_v12  ;;  %v278_v19 = vcvt.s32.f32 %v271_v11  ;;  %v514_v33 = vsel %vm502_vm1, %v496_v50, %v513_v41  ;;  %v517_v49 = vand.u32 65535, %v7403_v29 }
  0xd4   :  { %vm416_vm2 = vcmp.lt.s32.totalorder %v415_v4, 0  ;;  %v417_v28 = vsub.s32 0, %v415_v4  ;;  %v515_v52 = vsel %vm501_vm3, %v512_v30, %v514_v33  ;;  %v518_v42 = vshrl.u32 %v7403_v29, 16 }
  0xd5   :  { %v276_v25 = vand.u32 2147483647, %v275_v15  ;;  %v519_v56 = vand.u32 65535, %v515_v52  ;;  %v520_v58 = vshrl.u32 %v515_v52, 16  ;;  %v542_v59 = vshrl.u32 %v511_v40, 16 }
  0xd6   :  { %v418_v31 = vsel %vm416_vm2, %v417_v28, %v415_v4  ;;  %vm160_vm5 = vcmp.lt.s32.totalorder %v7181_v22, 0  ;;  %v541_v2 = vand.u32 65535, %v511_v40  ;;  %v407_v50 = vadd.s32 %v7354_v54, %v7352_v43 }
  0xd7   :  { %v279_v36 = vmul.f32 %v278_v19, %v276_v25  ;;  %v419_v46 = vclz %v418_v31  ;;  %v522_v61 = vmul.u32 %v520_v58, %v517_v49  ;;  %v523_v44 = vmul.u32 %v519_v56, %v518_v42 }
  0xd8   :  { %v544_v5 = vmul.u32 %v542_v59, %v517_v49  ;;  %v521_v8 = vmul.u32 %v519_v56, %v517_v49  ;;  %vm7425_vm6 = vcmp.le.f32.partialorder %v158_v24, 0.7853982  ;;  %v524_v15 = vmul.u32 %v520_v58, %v518_v42 }
  0xd9   :  { %v4639_v35 = vadd.s32 4294967294, %v419_v46  ;;  %v280_v55 = vxor.u32 2147483648, %v279_v36  ;;  %v525_v9 = vshll.u32 %v522_v61, 16  ;;  %v527_v47 = vshll.u32 %v523_v44, 16 }
  0xda   :  { %v147_v43 = vmul.f32 %v141_v16, %v7195_v34  ;;  %v545_v17 = vmul.u32 %v541_v2, %v518_v42  ;;  %v547_v24 = vshll.u32 %v544_v5, 16  ;;  %v543_v40 = vmul.u32 %v541_v2, %v517_v49 }
  0xdb   :  { %vm4640_vm4 = vcmp.lt.s32.totalorder %v4639_v35, 0  ;;  %v281_v11 = vsel %vm160_vm5, %v280_v55, %v279_v36  ;;  %vm529_vm7 = vc.u32 %v521_v8, %v525_v9  ;;  %v531_v27 = vadd.s32 %v525_v9, %v521_v8 }
  0xdc   :  { %v422_v62 = vsel %vm4640_vm4, 0, %v4639_v35  ;;  %v530_v54 = vsel %vm529_vm7, 1, %v7032_v0  ;;  %v7438_v41 = vsel %vm7425_vm6, %v7181_v22, %v281_v11  ;;  %v526_v13 = vshrl.u32 %v522_v61, 16 }
  0xdd   :  { %v423_v1 = vsub.s32 32, %v422_v62  ;;  %v427_v12 = vsub.s32 4294967266, %v422_v62  ;;  %v424_v28 = vshll.u32 %v415_v4, %v422_v62  ;;  %v532_v30 = vadd.s32 %v530_v54, %v524_v15 }
  0xde   :  { %vm533_vm8 = vc.u32 %v531_v27, %v527_v47  ;;  %v546_v34 = vmul.u32 %v542_v59, %v518_v42  ;;  %v549_v46 = vshll.u32 %v545_v17, 16  ;;  %vm551_vm9 = vc.u32 %v543_v40, %v547_v24 }
  0xdf   :  { %v425_v21 = vshrl.u32 %v407_v50, %v423_v1  ;;  %v428_v25 = vadd.s32 127, %v427_v12  ;;  %v534_v31 = vsel %vm533_vm8, 1, %v7032_v0  ;;  %v553_v52 = vadd.s32 %v547_v24, %v543_v40 }
  0xe0   :  { %v536_v16 = vadd.s32 %v534_v31, %v532_v30  ;;  %v7443_v56 = vadd.f32 %v151_v18, %v147_v43  ;;  %v552_v58 = vsel %vm551_vm9, 1, %v7032_v0  ;;  %v7448_v55 = vmul.f32 %v7438_v41, %v7438_v41 }
  0xe1   :  { %v429_v19 = vshll.u32 %v428_v25, 23  ;;  %v426_v33 = vor.u32 %v425_v21, %v424_v28  ;;  %v505_v49 = vsel %vm503_vm15, %v7387_v39, 2102212464  ;;  %v554_v42 = vadd.s32 %v552_v58, %v546_v34 }
  0xe2   :  { %v537_v35 = vadd.s32 %v536_v16, %v526_v13  ;;  %vm555_vm10 = vc.u32 %v553_v52, %v549_v46  ;;  %v484_v61 = vshrl.u32 %v7033_v51, %v7358_v48  ;;  %v528_v14 = vshrl.u32 %v523_v44, 16 }
  0xe3   :  { %v430_v36 = vor.u32 4788187, %v429_v19  ;;  %v433_v59 = vcvt.s32.f32 %v426_v33  ;;  %v556_v18 = vsel %vm555_vm10, 1, %v7032_v0  ;;  %v548_v62 = vshrl.u32 %v544_v5, 16 }
  0xe4   :  { %v558_v1 = vadd.s32 %v556_v18, %v554_v42  ;;  %v504_v50 = vsel %vm500_vm0, %v484_v61, %v7383_v7  ;;  %v506_v39 = vsel %vm502_vm1, %v7385_v38, %v505_v49  ;;  %v7462_v12 = vadd.s32 %v537_v35, %v528_v14 }
  0xe5   :  { %v431_v4 = vand.u32 2147483647, %v430_v36  ;;  %v287_v8 = vmul.f32 -0.001358992, %v7448_v55  ;;  %v550_v9 = vshrl.u32 %v545_v17, 16  ;;  %v626_v44 = vand.u32 2139095040, %v7443_v56 }
  0xe6   :  { %v559_v48 = vadd.s32 %v558_v1, %v548_v62  ;;  %v282_v5 = vsub.s32 4, %v7331_v37  ;;  %v7467_v11 = vadd.s32 %v553_v52, %v549_v46  ;;  %v507_v15 = vsel %vm501_vm3, %v504_v50, %v506_v39 }
  0xe7   :  { %v434_v2 = vmul.f32 %v433_v59, %v431_v4  ;;  %v627_v47 = vshrl.u32 %v626_v44, 23  ;;  %v294_v21 = vmul.f32 -0.00019511016, %v7448_v55  ;;  %v288_v25 = vadd.f32 0.041655596, %v287_v8 }
  0xe8   :  { %v560_v7 = vadd.s32 %v559_v48, %v550_v9  ;;  %vm563_vm11 = vc.u32 %v7462_v12, %v7467_v11  ;;  %v283_v54 = vsel %vm160_vm5, %v282_v5, %v7331_v37  ;;  %v561_v17 = vmul.u32 %v7403_v29, %v507_v15 }
  0xe9   :  { %v435_v38 = vxor.u32 2147483648, %v434_v2  ;;  %v4644_v43 = vadd.s32 4294967169, %v627_v47  ;;  %vm315_vm12 = vcmp.lt.s32.totalorder %v7185_v23, 0  ;;  %v295_v28 = vadd.f32 0.008332121, %v294_v21 }
  0xea   :  { %v564_v27 = vadd.s32 1, %v560_v7  ;;  %v285_v31 = vsel %vm7425_vm6, 0, %v283_v54  ;;  %v289_v40 = vmul.f32 %v288_v25, %v7448_v55  ;;  %v623_v33 = vand.u32 2147483647, %v7443_v56 }
  0xeb   :  { %v633_v24 = vadd.s32 1, %v4644_v43  ;;  %v436_v19 = vsel %vm315_vm12, %v435_v38, %v434_v2  ;;  %vm7487_vm14 = vcmp.le.f32.partialorder %v313_v26, 0.7853982  ;;  %v296_v16 = vmul.f32 %v295_v28, %v7448_v55 }
  0xec   :  { %v565_v32 = vsel %vm563_vm11, %v564_v27, %v560_v7  ;;  %v7494_v13 = vsel %vm7487_vm14, %v7185_v23, %v436_v19  ;;  %v302_v34 = vadd.s32 3, %v285_v31  ;;  %v290_v52 = vadd.f32 -0.4999988, %v289_v40 }
  0xed   :  { %v566_v30 = vadd.s32 %v565_v32, %v561_v17  ;;  %vm634_vm13 = vcmp.gt.s32.totalorder %v633_v24, 0  ;;  %v630_v26 = vand.u32 8388607, %v623_v33  ;;  %v7503_v35 = vmul.f32 %v7494_v13, %v7494_v13 }
  0xee   :  { %v635_v36 = vsel %vm634_vm13, %v633_v24, 0  ;;  %v297_v49 = vadd.f32 -0.16666654, %v296_v16  ;;  %v7506_v42 = vand.u32 3, %v302_v34  ;;  %v291_v61 = vmul.f32 %v290_v52, %v7448_v55 }
  0xef   :  { %v567_v29 = vadd.s32 536870912, %v566_v30  ;;  %v637_v10 = vand.u32 31, %v635_v36  ;;  %v631_v14 = vor.u32 8388608, %v630_v26  ;;  %v442_v1 = vmul.f32 -0.001358992, %v7503_v35 }
  0xf0   :  { %v7517_v5 = vshrl.u32 %v635_v36, 5  ;;  %v7522_v27 = vmul.f32 %v297_v49, %v7448_v55  ;;  %v7527_v54 = vadd.f32 1.0, %v291_v61  ;;  %v7530_v17 = vmul.f32 -0.00019511016, %v7503_v35 }
  0xf1   :  { %v7497_v46 = vshrl.u32 %v567_v29, 30  ;;  %v638_v4 = vsub.s32 32, %v637_v10  ;;  %v640_v39 = vshll.u32 %v7033_v51, %v637_v10  ;;  %v643_v8 = vshll.u32 %v7034_v53, %v637_v10 }
  0xf2   :  { %v649_v9 = vshll.u32 %v7036_v60, %v637_v10  ;;  %v646_v15 = vshll.u32 %v7035_v57, %v637_v10  ;;  %vm470_vm0 = vcmp.lt.s32.totalorder %v7202_v45, 0  ;;  %v7535_v32 = vadd.f32 0.041655596, %v442_v1 }
  0xf3   :  { %v569_v58 = vshll.u32 %v7497_v46, 30  ;;  %v641_v18 = vshrl.u32 %v7034_v53, %v638_v4  ;;  %v644_v62 = vshrl.u32 %v7035_v57, %v638_v4  ;;  %v647_v50 = vshrl.u32 %v7036_v60, %v638_v4 }
  0xf4   :  { %v650_v48 = vshrl.u32 %v7037_v63, %v638_v4  ;;  %v653_v7 = vshrl.u32 %v7038_v3, %v638_v4  ;;  %v652_v53 = vshll.u32 %v7037_v63, %v637_v10  ;;  %v7525_v60 = vshll.u32 %v631_v14, 8 }
  0xf5   :  { %v570_v59 = vsub.s32 %v566_v30, %v569_v58  ;;  %v642_v21 = vor.u32 %v641_v18, %v640_v39  ;;  %v645_v38 = vor.u32 %v644_v62, %v643_v8  ;;  %v648_v43 = vor.u32 %v647_v50, %v646_v15 }
  0xf6   :  { %v651_v25 = vor.u32 %v650_v48, %v649_v9  ;;  %v562_v57 = vadd.s32 %v7467_v11, %v7462_v12  ;;  %v654_v55 = vor.u32 %v653_v7, %v652_v53  ;;  %vm655_vm1 = vcmp.lt.s32.totalorder %v7517_v5, 1 }
  0xf7   :  { %vm571_vm15 = vcmp.lt.s32.totalorder %v570_v59, 0  ;;  %v572_v2 = vsub.s32 0, %v570_v59  ;;  %vm658_vm2 = vcmp.lt.s32.totalorder %v7517_v5, 4  ;;  %vm657_vm4 = vcmp.lt.s32.totalorder %v7517_v5, 3 }
  0xf8   :  { %v663_v63 = vsel %vm655_vm1, %v642_v21, %v645_v38  ;;  %v664_v24 = vsel %vm658_vm2, %v651_v25, 920167782  ;;  %v592_v12 = vsub.s32 4, %v7497_v46  ;;  %v672_v19 = vand.u32 65535, %v7525_v60 }
  0xf9   :  { %v573_v44 = vsel %vm571_vm15, %v572_v2, %v570_v59  ;;  %v665_v11 = vsel %vm657_vm4, %v648_v43, %v664_v24  ;;  %vm656_vm5 = vcmp.lt.s32.totalorder %v7517_v5, 2  ;;  %v667_v40 = vsel %vm655_vm1, %v645_v38, %v648_v43  ;;  %v5129_v24 = vld [vmem:[#allocation2 + $0x3c0] sm:$0xf] }
  0xfa   :  { %v574_v47 = vclz %v573_v44  ;;  %v660_v36 = vsel %vm658_vm2, %v648_v43, 2102212464  ;;  %v666_v10 = vsel %vm656_vm5, %v663_v63, %v665_v11  ;;  %v668_v16 = vsel %vm658_vm2, %v654_v55, 1326507024 }
  0xfb   :  { %v669_v26 = vsel %vm657_vm4, %v651_v25, %v668_v16  ;;  %v696_v58 = vand.u32 65535, %v666_v10  ;;  %v639_v49 = vshrl.u32 %v7033_v51, %v638_v4  ;;  %v673_v61 = vshrl.u32 %v7525_v60, 16 }
  0xfc   :  { %v4642_v3 = vadd.s32 4294967294, %v574_v47  ;;  %v697_v14 = vshrl.u32 %v666_v10, 16  ;;  %v7566_v50 = vsel %vm470_vm0, %v592_v12, %v7497_v46  ;;  %v7574_v51 = vsel %vm657_vm4, %v645_v38, %v660_v36 }
  0xfd   :  { %v7570_v39 = vsel %vm655_vm1, %v639_v49, %v642_v21  ;;  %vm7580_vm6 = vcmp.le.f32.partialorder %v468_v20, 0.7853982  ;;  %v698_v46 = vmul.u32 %v696_v58, %v672_v19  ;;  %v7584_v44 = vmul.u32 %v696_v58, %v673_v61  ;;  %v6395_v20 = vld [vmem:[#allocation2 + $0x1dc] sm:$0xf0] }
  0xfe   :  { %vm4643_vm3 = vcmp.lt.s32.totalorder %v4642_v3, 0  ;;  %v7576_v4 = vmul.u32 %v697_v14, %v672_v19  ;;  %v701_v47 = vmul.u32 %v697_v14, %v673_v61  ;;  %v6451_v14 = vld [vmem:[#allocation2 + $0x39c] sm:$0xf0]  ;;  %vm305_vm13 = vcmp.eq.s32.totalorder %v7506_v42, 0 }
  0xff   :  { %v577_v28 = vsel %vm4643_vm3, 0, %v4642_v3  ;;  %v704_v10 = vshll.u32 %v7584_v44, 16  ;;  %vm308_vm15 = vcmp.eq.s32.totalorder %v7506_v42, 2  ;;  %vm611_vm3 = vweird.f32 %v7202_v45 }
 0x100   :  { %v578_v30 = vsub.s32 32, %v577_v28  ;;  %v582_v31 = vsub.s32 4294967266, %v577_v28  ;;  %v579_v29 = vshll.u32 %v570_v59, %v577_v28  ;;  %v670_v59 = vsel %vm656_vm5, %v667_v40, %v669_v26  ;;  %v6459_v28 = vld [vmem:[#allocation2 + $0x3dc] sm:$0xf0]  ;;  %v4875_v40 = vld [vmem:[#allocation2 + $0x1e0] sm:$0xf0] }
 0x101   :  { %v674_v1 = vand.u32 65535, %v670_v59  ;;  %v675_v2 = vshrl.u32 %v670_v59, 16  ;;  %v702_v21 = vshll.u32 %v7576_v4, 16  ;;  %v703_v63 = vshrl.u32 %v7576_v4, 16  ;;  %v6387_v26 = vld [vmem:[#allocation2 + $0x19c] sm:$0xf0] }
 0x102   :  { %v580_v34 = vshrl.u32 %v562_v57, %v578_v30  ;;  %v583_v52 = vadd.s32 127, %v582_v31  ;;  %v4873_v57 = vld [vmem:[#allocation2 + $0x1c0] sm:$0xf]  ;;  %v6391_v31 = vld [vmem:[#allocation2 + $0x1c4] sm:$0xf] }
 0x103   :  { %v677_v48 = vmul.u32 %v675_v2, %v672_v19  ;;  %v7586_v7 = vmul.u32 %v674_v1, %v673_v61  ;;  %v676_v25 = vmul.u32 %v674_v1, %v672_v19  ;;  %v679_v43 = vmul.u32 %v675_v2, %v673_v61  ;;  %v6455_v19 = vld [vmem:[#allocation2 + $0x3c4] sm:$0xf]  ;;  %v5097_v61 = vld [vmem:[#allocation2 + $0x380] sm:$0xf] }
 0x104   :  { %v581_v18 = vor.u32 %v580_v34, %v579_v29  ;;  %v584_v62 = vshll.u32 %v583_v52, 23  ;;  %vm706_vm7 = vc.u32 %v698_v46, %v702_v21  ;;  %v5131_v29 = vld [vmem:[#allocation2 + $0x3e0] sm:$0xf0]  ;;  %v708_v16 = vadd.s32 %v702_v21, %v698_v46  ;;  %v4841_v52 = vld [vmem:[#allocation2 + $0x180] sm:$0xf] }
 0x105   :  { %v680_v53 = vshll.u32 %v677_v48, 16  ;;  %v681_v3 = vshrl.u32 %v677_v48, 16  ;;  %v682_v55 = vshll.u32 %v7586_v7, 16  ;;  %v707_v30 = vsel %vm706_vm7, 1, %v7032_v0  ;;  %v6383_v2 = vld [vmem:[#allocation2 + $0x184] sm:$0xf] }
 0x106   :  { %v585_v9 = vor.u32 4788187, %v584_v62  ;;  %v588_v15 = vcvt.s32.f32 %v581_v18  ;;  %v709_v34 = vadd.s32 %v707_v30, %v701_v47  ;;  %v683_v49 = vshrl.u32 %v7586_v7, 16  ;;  %v4843_v4 = vld [vmem:[#allocation2 + $0x1a0] sm:$0xf0] }
 0x107   :  { %vm684_vm8 = vc.u32 %v676_v25, %v680_v53  ;;  %v686_v11 = vadd.s32 %v680_v53, %v676_v25  ;;  %v705_v62 = vshrl.u32 %v7584_v44, 16  ;;  %vm710_vm10 = vc.u32 %v708_v16, %v704_v10  ;;  %v6447_v7 = vld [vmem:[#allocation2 + $0x384] sm:$0xf] }
 0x108   :  { %v586_v38 = vand.u32 2147483647, %v585_v9  ;;  %v685_v36 = vsel %vm684_vm8, 1, %v7032_v0  ;;  %v4874_v1 = vor.u32 %v6395_v20, %v4873_v57  ;;  %v711_v46 = vsel %vm710_vm10, 1, %v7032_v0  ;;  %v5099_v47 = vld [vmem:[#allocation2 + $0x3a0] sm:$0xf0] }
 0x109   :  { %v687_v59 = vadd.s32 %v685_v36, %v679_v43  ;;  %vm688_vm9 = vc.u32 %v686_v11, %v682_v55  ;;  %v4878_v44 = vor.u32 %v6391_v31, %v4875_v40  ;;  %v5134_v25 = vor.u32 %v6455_v19, %v5131_v29  ;;  %v4809_v43 = vld [vmem:[#allocation2 + $0x140] sm:$0xf]  ;;  %v6375_v36 = vld [vmem:[#allocation2 + $0x144] sm:$0xf] }
 0x10a   :  { %v589_v12 = vmul.f32 %v588_v15, %v586_v38  ;;  %v689_v18 = vsel %vm688_vm9, 1, %v7032_v0  ;;  %v5130_v15 = vor.u32 %v6459_v28, %v5129_v24  ;;  %v713_v38 = vadd.s32 %v711_v46, %v709_v34  ;;  %1566 = vmatpush.bf16.msra.mxu0 %v4874_v1  ;;  %v6379_v55 = vld [vmem:[#allocation2 + $0x15c] sm:$0xf0]  ;;  %v4811_v31 = vld [vmem:[#allocation2 + $0x160] sm:$0xf0] }
 0x10b   :  { %v691_v48 = vadd.s32 %v689_v18, %v687_v59  ;;  %v4842_v0 = vor.u32 %v6387_v26, %v4841_v52  ;;  %v5098_v20 = vor.u32 %v6451_v14, %v5097_v61  ;;  %v5065_v24 = vld [vmem:[#allocation2 + $0x340] sm:$0xf]  ;;  %1594 = vmatpush.bf16.msra.mxu2 %v4878_v44  ;;  %1608 = vmatpush.bf16.msra.mxu3 %v5134_v25  ;;  %v6439_v40 = vld [vmem:[#allocation2 + $0x344] sm:$0xf]  ;;  %vm301_vm7 = vweird.f32 %v7181_v22  ;;  %v4817_v22 = vld [vmem:[#allocation2 + $0x148] sm:$0xf] }
 0x10c   :  { %v590_v58 = vxor.u32 2147483648, %v589_v12  ;;  %1580 = vmatpush.bf16.msra.mxu1 %v5130_v15  ;;  %v6443_v28 = vld [vmem:[#allocation2 + $0x35c] sm:$0xf0]  ;;  %v4846_v11 = vor.u32 %v6383_v2, %v4843_v4  ;;  %v5102_v30 = vor.u32 %v6447_v7, %v5099_v47  ;;  %v5067_v52 = vld [vmem:[#allocation2 + $0x360] sm:$0xf0]  ;;  %v662_v26 = vsel %vm656_vm5, %v7570_v39, %v7574_v51 }
 0x10d   :  { %v692_v57 = vadd.s32 %v691_v48, %v681_v3  ;;  %v7613_v3 = vadd.s32 %v708_v16, %v704_v10  ;;  %v4810_v59 = vor.u32 %v6379_v55, %v4809_v43  ;;  %v4777_v61 = vld [vmem:[#allocation2 + $0x100] sm:$0xf]  ;;  %v5066_v10 = vor.u32 %v6443_v28, %v5065_v24  ;;  %v6431_v48 = vld [vmem:[#allocation2 + $0x304] sm:$0xf] }
 0x10e   :  { %v591_v9 = vsel %vm470_vm0, %v590_v58, %v589_v12  ;;  %v714_v12 = vadd.s32 %v713_v38, %v703_v63  ;;  %v595_v63 = vsel %vm7580_vm6, 0, %v7566_v50  ;;  %1567 = vmatpush.bf16.msra.mxu0 %v4842_v0  ;;  %v6371_v14 = vld [vmem:[#allocation2 + $0x11c] sm:$0xf0]  ;;  %v299_v50 = vadd.f32 1.0, %v7522_v27  ;;  %v5035_v46 = vld [vmem:[#allocation2 + $0x320] sm:$0xf0] }
 0x10f   :  { %v7603_v21 = vsel %vm7580_vm6, %v7202_v45, %v591_v9  ;;  %v7611_v34 = vadd.s32 %v692_v57, %v683_v49  ;;  %v5033_v16 = vld [vmem:[#allocation2 + $0x300] sm:$0xf]  ;;  %1595 = vmatpush.bf16.msra.mxu2 %v4846_v11  ;;  %1609 = vmatpush.bf16.msra.mxu3 %v5102_v30  ;;  %v4814_v5 = vor.u32 %v6375_v36, %v4811_v31  ;;  %v4779_v9 = vld [vmem:[#allocation2 + $0x120] sm:$0xf0]  ;;  %v437_v15 = vsub.s32 4, %v7381_v6 }
 0x110   :  { %v7607_v53 = vmul.f32 %v7603_v21, %v7603_v21  ;;  %v715_v58 = vadd.s32 %v714_v12, %v705_v62  ;;  %1581 = vmatpush.bf16.msra.mxu1 %v5098_v20  ;;  %v5070_v39 = vor.u32 %v6439_v40, %v5067_v52  ;;  %v6435_v51 = vld [vmem:[#allocation2 + $0x31c] sm:$0xf0]  ;;  %v6367_v62 = vld [vmem:[#allocation2 + $0x104] sm:$0xf]  ;;  %v716_v4 = vmul.u32 %v7525_v60, %v662_v26 }
 0x111   :  { %vm718_vm11 = vc.u32 %v7611_v34, %v7613_v3  ;;  %v612_v7 = vadd.s32 3, %v595_v63  ;;  %v4778_v47 = vor.u32 %v6371_v14, %v4777_v61  ;;  %v4745_v38 = vld [vmem:[#allocation2 + $0xc0] sm:$0xf]  ;;  %v5034_v0 = vor.u32 %v6435_v51, %v5033_v16  ;;  %v6359_v12 = vld [vmem:[#allocation2 + $0xc4] sm:$0xf] }
 0x112   :  { %v597_v19 = vmul.f32 -0.001358992, %v7607_v53  ;;  %v604_v29 = vmul.f32 -0.00019511016, %v7607_v53  ;;  %v719_v8 = vadd.s32 1, %v715_v58  ;;  %1568 = vmatpush.bf16.msra.mxu0 %v4810_v59  ;;  %v7633_v20 = vmul.f32 %v299_v50, %v7438_v41 }
 0x113   :  { %v6363_v44 = vld [vmem:[#allocation2 + $0xdc] sm:$0xf0]  ;;  %1596 = vmatpush.bf16.msra.mxu2 %v4814_v5  ;;  %1610 = vmatpush.bf16.msra.mxu3 %v5070_v39  ;;  %v4782_v55 = vor.u32 %v6367_v62, %v4779_v9  ;;  %v5038_v24 = vor.u32 %v6431_v48, %v5035_v46  ;;  %v4747_v11 = vld [vmem:[#allocation2 + $0xe0] sm:$0xf0]  ;;  %v309_v30 = vxor.u32 2147483648, %v7527_v54  ;;  %v444_v41 = vmul.f32 %v7535_v32, %v7503_v35 }
 0x114   :  { %v598_v18 = vadd.f32 0.041655596, %v597_v19  ;;  %v605_v49 = vadd.f32 0.008332121, %v604_v29  ;;  %v720_v27 = vsel %vm718_vm11, %v719_v8, %v715_v58  ;;  %1582 = vmatpush.bf16.msra.mxu1 %v5066_v10  ;;  %v5001_v60 = vld [vmem:[#allocation2 + $0x2c0] sm:$0xf]  ;;  %v4746_v26 = vor.u32 %v6363_v44, %v4745_v38 }
 0x115   :  { %v721_v57 = vadd.s32 %v720_v27, %v716_v4  ;;  %v6427_v28 = vld [vmem:[#allocation2 + $0x2dc] sm:$0xf0]  ;;  %v6423_v19 = vld [vmem:[#allocation2 + $0x2c4] sm:$0xf]  ;;  %v7642_v52 = vadd.f32 0.008332121, %v7530_v17  ;;  %v4750_v32 = vor.u32 %v6359_v12, %v4747_v11 }
 0x116   :  { %v599_v1 = vmul.f32 %v598_v18, %v7607_v53  ;;  %v606_v2 = vmul.f32 %v605_v49, %v7607_v53  ;;  %v5003_v29 = vld [vmem:[#allocation2 + $0x2e0] sm:$0xf0]  ;;  %v7644_v63 = vand.u32 3, %v612_v7  ;;  %1569 = vmatpush.bf16.msra.mxu0 %v4778_v47  ;;  %v4713_v58 = vld [vmem:[#allocation2 + $0x80] sm:$0xf]  ;;  %vm304_vm0 = vcmp.lt.s32.totalorder %v7506_v42, 2 }
 0x117   :  { %v722_v40 = vadd.s32 536870912, %v721_v57  ;;  %v6355_v14 = vld [vmem:[#allocation2 + $0x9c] sm:$0xf0]  ;;  %1597 = vmatpush.bf16.msra.mxu2 %v4782_v55  ;;  %1611 = vmatpush.bf16.msra.mxu3 %v5038_v24  ;;  %v5006_v49 = vor.u32 %v6423_v19, %v5003_v29  ;;  %v6351_v10 = vld [vmem:[#allocation2 + $0x84] sm:$0xf]  ;;  %v306_v62 = vxor.u32 2147483648, %v7633_v20 }
 0x118   :  { %v600_v25 = vadd.f32 -0.4999988, %v599_v1  ;;  %v607_v43 = vadd.f32 -0.16666654, %v606_v2  ;;  %1583 = vmatpush.bf16.msra.mxu1 %v5034_v0  ;;  %v4969_v18 = vld [vmem:[#allocation2 + $0x280] sm:$0xf]  ;;  %v4714_v2 = vor.u32 %v6355_v14, %v4713_v58 }
 0x119   :  { %v7646_v61 = vshrl.u32 %v722_v40, 30  ;;  %v6419_v17 = vld [vmem:[#allocation2 + $0x29c] sm:$0xf0]  ;;  %v4715_v16 = vld [vmem:[#allocation2 + $0xa0] sm:$0xf0]  ;;  %vm615_vm1 = vcmp.eq.s32.totalorder %v7644_v63, 0  ;;  %v307_v11 = vsel %vm305_vm13, %v7527_v54, %v306_v62 }
 0x11a   :  { %v601_v36 = vmul.f32 %v600_v25, %v7607_v53  ;;  %v608_v31 = vmul.f32 %v607_v43, %v7607_v53  ;;  %v5002_v53 = vor.u32 %v6427_v28, %v5001_v60  ;;  %v6415_v39 = vld [vmem:[#allocation2 + $0x284] sm:$0xf]  ;;  %v7657_v1 = vadd.f32 -0.4999988, %v444_v41  ;;  %1570 = vmatpush.bf16.msra.mxu0 %v4746_v26  ;;  %v4681_v4 = vld [vmem:[#allocation2 + $0x40] sm:$0xf] }
 0x11b   :  { %v724_v5 = vshll.u32 %v7646_v61, 30  ;;  %v4971_v51 = vld [vmem:[#allocation2 + $0x2a0] sm:$0xf0]  ;;  %v4970_v48 = vor.u32 %v6419_v17, %v4969_v18  ;;  %v6347_v46 = vld [vmem:[#allocation2 + $0x5c] sm:$0xf0]  ;;  %1598 = vmatpush.bf16.msra.mxu2 %v4750_v32  ;;  %1612 = vmatpush.bf16.msra.mxu3 %v5006_v49  ;;  %v4718_v27 = vor.u32 %v6351_v10, %v4715_v16  ;;  %v310_v18 = vsel %vm308_vm15, %v309_v30, %v7633_v20 }
 0x11c   :  { %v609_v59 = vadd.f32 1.0, %v608_v31  ;;  %v7650_v50 = vadd.f32 1.0, %v601_v36  ;;  %1584 = vmatpush.bf16.msra.mxu1 %v5002_v53  ;;  %v6411_v7 = vld [vmem:[#allocation2 + $0x25c] sm:$0xf0]  ;;  %v4974_v47 = vor.u32 %v6415_v39, %v4971_v51  ;;  %v6343_v38 = vld [vmem:[#allocation2 + $0x44] sm:$0xf]  ;;  %v4682_v55 = vor.u32 %v6347_v46, %v4681_v4 }
 0x11d   :  { %v7660_v9 = vsub.s32 %v721_v57, %v724_v5  ;;  %v4683_v44 = vld [vmem:[#allocation2 + $0x60] sm:$0xf0]  ;;  %v4649_v24 = vld [vmem:[#allocation2] sm:$0xf]  ;;  %v4881_v53 = vld [vmem:[#allocation2 + $0x1c8] sm:$0xf]  ;;  %v311_v16 = vsel %vm304_vm0, %v307_v11, %v310_v18  ;;  %vm456_vm0 = vweird.f32 %v7185_v23 }
 0x11e   :  { %v7653_v8 = vmul.f32 %v609_v59, %v7603_v21  ;;  %v4937_v21 = vld [vmem:[#allocation2 + $0x240] sm:$0xf]  ;;  %v6407_v25 = vld [vmem:[#allocation2 + $0x244] sm:$0xf]  ;;  %v619_v0 = vxor.u32 2147483648, %v7650_v50  ;;  %1571 = vmatpush.bf16.msra.mxu0 %v4714_v2  ;;  %v4686_v26 = vor.u32 %v6343_v38, %v4683_v44  ;;  %vm618_vm4 = vcmp.eq.s32.totalorder %v7644_v63, 2 }
 0x11f   :  { %vm726_vm2 = vcmp.lt.s32.totalorder %v7660_v9, 0  ;;  %v727_v57 = vsub.s32 0, %v7660_v9  ;;  %v4939_v60 = vld [vmem:[#allocation2 + $0x260] sm:$0xf0]  ;;  %v6339_v28 = vld [vmem:[#allocation2 + $0x1c] sm:$0xf0]  ;;  %v4938_v31 = vor.u32 %v6411_v7, %v4937_v21  ;;  %1599 = vmatpush.bf16.msra.mxu2 %v4718_v27  ;;  %1613 = vmatpush.bf16.msra.mxu3 %v4974_v47  ;;  %v451_v7 = vmul.f32 %v7642_v52, %v7503_v35 }
 0x120   :  { %v616_v43 = vxor.u32 2147483648, %v7653_v8  ;;  %v4905_v12 = vld [vmem:[#allocation2 + $0x200] sm:$0xf]  ;;  %1585 = vmatpush.bf16.msra.mxu1 %v4970_v48  ;;  %v7670_v19 = vld [vmem:[#allocation2 + $0x4] sm:$0xf]  ;;  %v4942_v58 = vor.u32 %v6407_v25, %v4939_v60  ;;  %v4650_v54 = vor.u32 %v6339_v28, %v4649_v24  ;;  %vm614_vm5 = vcmp.lt.s32.totalorder %v7644_v63, 2 }
 0x121   :  { %v728_v36 = vsel %vm726_vm2, %v727_v57, %v7660_v9  ;;  %v6403_v40 = vld [vmem:[#allocation2 + $0x21c] sm:$0xf0]  ;;  %v4651_v29 = vld [vmem:[#allocation2 + $0x20] sm:$0xf0]  ;;  %v6396_v14 = vld [vmem:[#allocation2 + $0x1e4] sm:$0xf0]  ;;  %v620_v20 = vsel %vm618_vm4, %v619_v0, %v7653_v8  ;;  %v717_v44 = vadd.s32 %v7613_v3, %v7611_v34  ;;  %v438_v52 = vsel %vm315_vm12, %v437_v15, %v7381_v6 }
 0x122   :  { %v729_v41 = vclz %v728_v36  ;;  %v6399_v59 = vld [vmem:[#allocation2 + $0x204] sm:$0xf]  ;;  %v617_v32 = vsel %vm615_vm1, %v7650_v50, %v616_v43  ;;  %v5137_v17 = vld [vmem:[#allocation2 + $0x3c8] sm:$0xf]  ;;  %1572 = vmatpush.bf16.msra.mxu0 %v4682_v55  ;;  %v6392_v39 = vld [vmem:[#allocation2 + $0x1cc] sm:$0xf]  ;;  %v4906_v30 = vor.u32 %v6403_v40, %v4905_v12  ;;  %v4882_v50 = vor.u32 %v6396_v14, %v4881_v53 }
 0x123   :  { %v4907_v49 = vld [vmem:[#allocation2 + $0x220] sm:$0xf0]  ;;  %v6460_v10 = vld [vmem:[#allocation2 + $0x3e4] sm:$0xf0]  ;;  %v4883_v51 = vld [vmem:[#allocation2 + $0x1e8] sm:$0xf0]  ;;  %v621_v4 = vsel %vm614_vm5, %v617_v32, %v620_v20  ;;  %1600 = vmatpush.bf16.msra.mxu2 %v4686_v26  ;;  %1614 = vmatpush.bf16.msra.mxu3 %v4942_v58  ;;  %v4654_v42 = vor.u32 %v7670_v19, %v4651_v29  ;;  %vm766_vm1 = vweird.f32 %v7443_v56 }
 0x124   :  { %v4645_v5 = vadd.s32 4294967294, %v729_v41  ;;  %1586 = vmatpush.bf16.msra.mxu1 %v4938_v31  ;;  %v6456_v62 = vld [vmem:[#allocation2 + $0x3cc] sm:$0xf]  ;;  %v4910_v48 = vor.u32 %v6399_v59, %v4907_v49  ;;  %v4849_v46 = vld [vmem:[#allocation2 + $0x188] sm:$0xf]  ;;  %v5138_v27 = vor.u32 %v6460_v10, %v5137_v17  ;;  %v4886_v8 = vor.u32 %v6392_v39, %v4883_v51 }
 0x125   :  { %v5139_v2 = vld [vmem:[#allocation2 + $0x3e8] sm:$0xf0]  ;;  %v6388_v21 = vld [vmem:[#allocation2 + $0x1a4] sm:$0xf0]  ;;  %v622_v55 = vsel %vm611_vm3, nan, %v621_v4  ;;  %v312_v28 = vsel %vm301_vm7, nan, %v311_v16 }
 0x126   :  { %vm4646_vm6 = vcmp.lt.s32.totalorder %v4645_v5, 0  ;;  %v5105_v47 = vld [vmem:[#allocation2 + $0x388] sm:$0xf]  ;;  %1573 = vmatpush.bf16.msra.mxu0 %v4650_v54  ;;  %v5142_v0 = vor.u32 %v6456_v62, %v5139_v2  ;;  %v6384_v57 = vld [vmem:[#allocation2 + $0x18c] sm:$0xf]  ;;  %v4850_v34 = vor.u32 %v6388_v21, %v4849_v46  ;;  %v7700_v26 = vpack.c.bf16 %v622_v55, %v312_v28 }
 0x127   :  { %v732_v63 = vsel %vm4646_vm6, 0, %v4645_v5  ;;  %v6452_v38 = vld [vmem:[#allocation2 + $0x3a4] sm:$0xf0]  ;;  %v4851_v60 = vld [vmem:[#allocation2 + $0x1a8] sm:$0xf0]  ;;  %1601 = vmatpush.bf16.msra.mxu2 %v4654_v42  ;;  %1615 = vmatpush.bf16.msra.mxu3 %v4910_v48  ;;  %v440_v53 = vsel %vm7487_vm14, 0, %v438_v52  ;;  %v446_v21 = vmul.f32 %v7657_v1, %v7503_v35 }
 0x128   :  { %v733_v25 = vsub.s32 32, %v732_v63  ;;  %v737_v43 = vsub.s32 4294967266, %v732_v63  ;;  %1587 = vmatpush.bf16.msra.mxu1 %v4906_v30  ;;  %v6448_v3 = vld [vmem:[#allocation2 + $0x38c] sm:$0xf]  ;;  %v734_v12 = vshll.u32 %v7660_v9, %v732_v63  ;;  %v6380_v31 = vld [vmem:[#allocation2 + $0x164] sm:$0xf0]  ;;  %v5106_v6 = vor.u32 %v6452_v38, %v5105_v47 }
 0x129   :  { %v5107_v24 = vld [vmem:[#allocation2 + $0x3a8] sm:$0xf0]  ;;  %v452_v40 = vadd.f32 -0.16666654, %v451_v7  ;;  %v4854_v45 = vor.u32 %v6384_v57, %v4851_v60  ;;  %v5073_v15 = vld [vmem:[#allocation2 + $0x348] sm:$0xf]  ;;  %v4818_v18 = vor.u32 %v6380_v31, %v4817_v22  ;;  %1574 = vmatmul.bf16.vlgmr.msra.gmra.mxu0 %v7700_v26 }
 0x12a   :  { %1622 = vmatpush.bf16.msrb.mxu0 %v4882_v50  ;;  %v735_v11 = vshrl.u32 %v717_v44, %v733_v25  ;;  %v738_v36 = vadd.s32 127, %v737_v43  ;;  %v6444_v19 = vld [vmem:[#allocation2 + $0x364] sm:$0xf0]  ;;  %v5110_v58 = vor.u32 %v6448_v3, %v5107_v24  ;;  %v6376_v9 = vld [vmem:[#allocation2 + $0x14c] sm:$0xf]  ;;  %v747_v14 = vsub.s32 4, %v7646_v61  ;;  %1602 = vmatmul.bf16.vlgmr.msra.gmra.mxu2 %v7700_v26 }
 0x12b   :  { %1650 = vmatpush.bf16.msrb.mxu2 %v4886_v8  ;;  %1664 = vmatpush.bf16.msrb.mxu3 %v5142_v0  ;;  %v4819_v59 = vld [vmem:[#allocation2 + $0x168] sm:$0xf0]  ;;  %v4785_v10 = vld [vmem:[#allocation2 + $0x108] sm:$0xf]  ;;  %vm625_vm12 = vcmp.lt.s32.totalorder %v7443_v56, 0  ;;  %v5074_v5 = vor.u32 %v6444_v19, %v5073_v15  ;;  %v457_v2 = vadd.s32 3, %v440_v53  ;;  %v453_v7 = vmul.f32 %v452_v40, %v7503_v35 }
 0x12c   :  { %1636 = vmatpush.bf16.msrb.mxu1 %v5138_v27  ;;  %v736_v29 = vor.u32 %v735_v11, %v734_v12  ;;  %v739_v41 = vshll.u32 %v738_v36, 23  ;;  %v6440_v32 = vld [vmem:[#allocation2 + $0x34c] sm:$0xf]  ;;  %v6372_v16 = vld [vmem:[#allocation2 + $0x124] sm:$0xf0]  ;;  %v4822_v37 = vor.u32 %v6376_v9, %v4819_v59  ;;  %v748_v4 = vsel %vm625_vm12, %v747_v14, %v7646_v61 }
 0x12d   :  { %v5075_v49 = vld [vmem:[#allocation2 + $0x368] sm:$0xf0]  ;;  %v5041_v54 = vld [vmem:[#allocation2 + $0x308] sm:$0xf]  ;;  %v4786_v42 = vor.u32 %v6372_v16, %v4785_v10  ;;  %vm7716_vm14 = vcmp.le.f32.partialorder %v623_v33, 0.7853982 }
 0x12e   :  { %1623 = vmatpush.bf16.msrb.mxu0 %v4850_v34  ;;  %v740_v17 = vor.u32 4788187, %v739_v41  ;;  %v6436_v39 = vld [vmem:[#allocation2 + $0x324] sm:$0xf0]  ;;  %v743_v20 = vcvt.s32.f32 %v736_v29  ;;  %v5078_v30 = vor.u32 %v6440_v32, %v5075_v49  ;;  %v6368_v50 = vld [vmem:[#allocation2 + $0x10c] sm:$0xf] }
 0x12f   :  { %1651 = vmatpush.bf16.msrb.mxu2 %v4854_v45  ;;  %1665 = vmatpush.bf16.msrb.mxu3 %v5110_v58  ;;  %v4787_v62 = vld [vmem:[#allocation2 + $0x128] sm:$0xf0]  ;;  %v4753_v27 = vld [vmem:[#allocation2 + $0xc8] sm:$0xf]  ;;  %v5042_v61 = vor.u32 %v6436_v39, %v5041_v54  ;;  %v750_v1 = vsel %vm7716_vm14, 0, %v748_v4  ;;  %v7722_v60 = vand.u32 3, %v457_v2 }
 0x130   :  { %1637 = vmatpush.bf16.msrb.mxu1 %v5106_v6  ;;  %v741_v51 = vand.u32 2147483647, %v740_v17  ;;  %v6432_v48 = vld [vmem:[#allocation2 + $0x30c] sm:$0xf]  ;;  %v6364_v8 = vld [vmem:[#allocation2 + $0xe4] sm:$0xf0]  ;;  %v4790_v38 = vor.u32 %v6368_v50, %v4787_v62 }
 0x131   :  { %v5043_v46 = vld [vmem:[#allocation2 + $0x328] sm:$0xf0]  ;;  %v5009_v44 = vld [vmem:[#allocation2 + $0x2c8] sm:$0xf]  ;;  %v4754_v33 = vor.u32 %v6364_v8, %v4753_v27  ;;  %v7724_v34 = vadd.f32 1.0, %v446_v21  ;;  %v454_v3 = vadd.f32 1.0, %v453_v7 }
 0x132   :  { %1624 = vmatpush.bf16.msrb.mxu0 %v4818_v18  ;;  %v744_v63 = vmul.f32 %v743_v20, %v741_v51  ;;  %v6428_v25 = vld [vmem:[#allocation2 + $0x2e4] sm:$0xf0]  ;;  %v5046_v35 = vor.u32 %v6432_v48, %v5043_v46  ;;  %v6360_v0 = vld [vmem:[#allocation2 + $0xcc] sm:$0xf]  ;;  %v7733_v36 = vadd.s32 3, %v750_v1  ;;  %vm460_vm8 = vcmp.eq.s32.totalorder %v7722_v60, 0 }
 0x133   :  { %1652 = vmatpush.bf16.msrb.mxu2 %v4822_v37  ;;  %1666 = vmatpush.bf16.msrb.mxu3 %v5078_v30  ;;  %v4755_v57 = vld [vmem:[#allocation2 + $0xe8] sm:$0xf0]  ;;  %v4721_v28 = vld [vmem:[#allocation2 + $0x88] sm:$0xf]  ;;  %v5010_v22 = vor.u32 %v6428_v25, %v5009_v44  ;;  %v455_v2 = vmul.f32 %v454_v3, %v7494_v13  ;;  %v4889_v8 = vld [vmem:[#allocation2 + $0x1d0] sm:$0xf] }
 0x134   :  { %1638 = vmatpush.bf16.msrb.mxu1 %v5074_v5  ;;  %v745_v43 = vxor.u32 2147483648, %v744_v63  ;;  %v6424_v52 = vld [vmem:[#allocation2 + $0x2cc] sm:$0xf]  ;;  %v6356_v12 = vld [vmem:[#allocation2 + $0xa4] sm:$0xf0]  ;;  %v4758_v31 = vor.u32 %v6360_v0, %v4755_v57  ;;  %v768_v3 = vand.u32 3, %v7733_v36 }
 0x135   :  { %v5011_v55 = vld [vmem:[#allocation2 + $0x2e8] sm:$0xf0]  ;;  %v4977_v40 = vld [vmem:[#allocation2 + $0x288] sm:$0xf]  ;;  %v4722_v58 = vor.u32 %v6356_v12, %v4721_v28  ;;  %v6397_v47 = vld [vmem:[#allocation2 + $0x1ec] sm:$0xf0] }
 0x136   :  { %1625 = vmatpush.bf16.msrb.mxu0 %v4786_v42  ;;  %v746_v24 = vsel %vm625_vm12, %v745_v43, %v744_v63  ;;  %v6420_v6 = vld [vmem:[#allocation2 + $0x2a4] sm:$0xf0]  ;;  %v5014_v15 = vor.u32 %v6424_v52, %v5011_v55  ;;  %v6352_v19 = vld [vmem:[#allocation2 + $0x8c] sm:$0xf]  ;;  %v6393_v1 = vld [vmem:[#allocation2 + $0x1d4] sm:$0xf]  ;;  %v4890_v52 = vor.u32 %v6397_v47, %v4889_v8 }
 0x137   :  { %v7731_v11 = vsel %vm7716_vm14, %v7443_v56, %v746_v24  ;;  %1653 = vmatpush.bf16.msrb.mxu2 %v4790_v38  ;;  %1667 = vmatpush.bf16.msrb.mxu3 %v5046_v35  ;;  %v4723_v29 = vld [vmem:[#allocation2 + $0xa8] sm:$0xf0]  ;;  %v4689_v59 = vld [vmem:[#allocation2 + $0x48] sm:$0xf]  ;;  %v4978_v49 = vor.u32 %v6420_v6, %v4977_v40  ;;  %v4891_v35 = vld [vmem:[#allocation2 + $0x1f0] sm:$0xf0] }
 0x138   :  { %1639 = vmatpush.bf16.msrb.mxu1 %v5042_v61  ;;  %v751_v45 = vmul.f32 %v7731_v11, %v7731_v11  ;;  %v6416_v41 = vld [vmem:[#allocation2 + $0x28c] sm:$0xf]  ;;  %v6348_v53 = vld [vmem:[#allocation2 + $0x64] sm:$0xf0]  ;;  %v4726_v17 = vor.u32 %v6352_v19, %v4723_v29  ;;  %v461_v0 = vxor.u32 2147483648, %v455_v2  ;;  %v464_v55 = vxor.u32 2147483648, %v7724_v34 }
 0x139   :  { %v4979_v9 = vld [vmem:[#allocation2 + $0x2a8] sm:$0xf0]  ;;  %v4945_v32 = vld [vmem:[#allocation2 + $0x248] sm:$0xf]  ;;  %v4690_v20 = vor.u32 %v6348_v53, %v4689_v59  ;;  %v4857_v12 = vld [vmem:[#allocation2 + $0x190] sm:$0xf] }
 0x13a   :  { %1626 = vmatpush.bf16.msrb.mxu0 %v4754_v33  ;;  %v752_v14 = vmul.f32 -0.001358992, %v751_v45  ;;  %v759_v18 = vmul.f32 -0.00019511016, %v751_v45  ;;  %v6412_v10 = vld [vmem:[#allocation2 + $0x264] sm:$0xf0]  ;;  %v4982_v39 = vor.u32 %v6416_v41, %v4979_v9  ;;  %v462_v36 = vsel %vm460_vm8, %v7724_v34, %v461_v0 }
 0x13b   :  { %1654 = vmatpush.bf16.msrb.mxu2 %v4758_v31  ;;  %v6344_v16 = vld [vmem:[#allocation2 + $0x4c] sm:$0xf]  ;;  %1668 = vmatpush.bf16.msrb.mxu3 %v5014_v15  ;;  %v4657_v50 = vld [vmem:[#allocation2 + $0x8] sm:$0xf]  ;;  %v4946_v7 = vor.u32 %v6412_v10, %v4945_v32  ;;  %v4894_v15 = vor.u32 %v6393_v1, %v4891_v35  ;;  %vm463_vm9 = vcmp.eq.s32.totalorder %v7722_v60, 2  ;;  %vm459_vm10 = vcmp.lt.s32.totalorder %v7722_v60, 2 }
 0x13c   :  { %1640 = vmatpush.bf16.msrb.mxu1 %v5010_v22  ;;  %v4691_v5 = vld [vmem:[#allocation2 + $0x68] sm:$0xf0]  ;;  %v753_v37 = vadd.f32 0.041655596, %v752_v14  ;;  %v760_v54 = vadd.f32 0.008332121, %v759_v18  ;;  %v465_v9 = vsel %vm463_vm9, %v464_v55, %v455_v2 }
 0x13d   :  { %v6408_v51 = vld [vmem:[#allocation2 + $0x24c] sm:$0xf]  ;;  %v6340_v62 = vld [vmem:[#allocation2 + $0x24] sm:$0xf0]  ;;  %v4694_v63 = vor.u32 %v6344_v16, %v4691_v5  ;;  %v6389_v22 = vld [vmem:[#allocation2 + $0x1ac] sm:$0xf0]  ;;  %v466_v34 = vsel %vm459_vm10, %v462_v36, %v465_v9 }
 0x13e   :  { %1627 = vmatpush.bf16.msrb.mxu0 %v4722_v58  ;;  %v4947_v30 = vld [vmem:[#allocation2 + $0x268] sm:$0xf0]  ;;  %v754_v4 = vmul.f32 %v753_v37, %v751_v45  ;;  %v761_v42 = vmul.f32 %v760_v54, %v751_v45  ;;  %v4913_v48 = vld [vmem:[#allocation2 + $0x208] sm:$0xf]  ;;  %v4658_v43 = vor.u32 %v6340_v62, %v4657_v50  ;;  %v4859_v19 = vld [vmem:[#allocation2 + $0x1b0] sm:$0xf0]  ;;  %v4858_v58 = vor.u32 %v6389_v22, %v4857_v12 }
 0x13f   :  { %v6404_v46 = vld [vmem:[#allocation2 + $0x224] sm:$0xf0]  ;;  %v6336_v21 = vld [vmem:[#allocation2 + $0xc] sm:$0xf]  ;;  %1655 = vmatpush.bf16.msrb.mxu2 %v4726_v17  ;;  %1669 = vmatpush.bf16.msrb.mxu3 %v4982_v39  ;;  %v4950_v44 = vor.u32 %v6408_v51, %v4947_v30  ;;  %v4825_v59 = vld [vmem:[#allocation2 + $0x150] sm:$0xf] }
 0x140   :  { %1641 = vmatpush.bf16.msrb.mxu1 %v4978_v49  ;;  %v4659_v27 = vld [vmem:[#allocation2 + $0x28] sm:$0xf0]  ;;  %v755_v61 = vadd.f32 -0.4999988, %v754_v4  ;;  %v762_v38 = vadd.f32 -0.16666654, %v761_v42  ;;  %v4914_v24 = vor.u32 %v6404_v46, %v4913_v48 }
 0x141   :  { %v6400_v25 = vld [vmem:[#allocation2 + $0x20c] sm:$0xf]  ;;  %v4662_v28 = vor.u32 %v6336_v21, %v4659_v27  ;;  %v6381_v53 = vld [vmem:[#allocation2 + $0x16c] sm:$0xf0]  ;;  %vm770_vm11 = vcmp.eq.s32.totalorder %v768_v3, 0  ;;  %vm773_vm13 = vcmp.eq.s32.totalorder %v768_v3, 2 }
 0x142   :  { %1628 = vmatpush.bf16.msrb.mxu0 %v4690_v20  ;;  %v4915_v13 = vld [vmem:[#allocation2 + $0x228] sm:$0xf0]  ;;  %v756_v57 = vmul.f32 %v755_v61, %v751_v45  ;;  %v763_v33 = vmul.f32 %v762_v38, %v751_v45  ;;  %v6385_v45 = vld [vmem:[#allocation2 + $0x194] sm:$0xf]  ;;  %v5145_v18 = vld [vmem:[#allocation2 + $0x3d0] sm:$0xf]  ;;  %v4826_v16 = vor.u32 %v6381_v53, %v4825_v59 }
 0x143   :  { %1656 = vmatpush.bf16.msrb.mxu2 %v4694_v63  ;;  %1670 = vmatpush.bf16.msrb.mxu3 %v4950_v44  ;;  %v4918_v6 = vor.u32 %v6400_v25, %v4915_v13  ;;  %v4862_v32 = vor.u32 %v6385_v45, %v4859_v19  ;;  %v6461_v49 = vld [vmem:[#allocation2 + $0x3ec] sm:$0xf0]  ;;  %v5147_v17 = vld [vmem:[#allocation2 + $0x3f0] sm:$0xf0]  ;;  %vm769_vm15 = vcmp.lt.s32.totalorder %v768_v3, 2  ;;  %v467_v20 = vsel %vm456_vm0, nan, %v466_v34 }
 0x144   :  { %1642 = vmatpush.bf16.msrb.mxu1 %v4946_v7  ;;  %v757_v31 = vadd.f32 1.0, %v756_v57  ;;  %v764_v40 = vadd.f32 1.0, %v763_v33  ;;  %v6377_v5 = vld [vmem:[#allocation2 + $0x154] sm:$0xf]  ;;  %v4793_v39 = vld [vmem:[#allocation2 + $0x110] sm:$0xf]  ;;  %v5146_v50 = vor.u32 %v6461_v49, %v5145_v18 }
 0x145   :  { %v4827_v37 = vld [vmem:[#allocation2 + $0x170] sm:$0xf0]  ;;  %v6373_v51 = vld [vmem:[#allocation2 + $0x12c] sm:$0xf0] }
 0x146   :  { %1629 = vmatpush.bf16.msrb.mxu0 %v4658_v43  ;;  %v765_v29 = vmul.f32 %v764_v40, %v7731_v11  ;;  %v774_v41 = vxor.u32 2147483648, %v757_v31  ;;  %v6457_v11 = vld [vmem:[#allocation2 + $0x3d4] sm:$0xf]  ;;  %v5113_v2 = vld [vmem:[#allocation2 + $0x390] sm:$0xf]  ;;  %v4830_v21 = vor.u32 %v6377_v5, %v4827_v37  ;;  %v4794_v7 = vor.u32 %v6373_v51, %v4793_v39 }
 0x147   :  { %1657 = vmatpush.bf16.msrb.mxu2 %v4662_v28  ;;  %1671 = vmatpush.bf16.msrb.mxu3 %v4918_v6  ;;  %v5150_v62 = vor.u32 %v6457_v11, %v5147_v17  ;;  %v6453_v42 = vld [vmem:[#allocation2 + $0x3ac] sm:$0xf0]  ;;  %v6449_v48 = vld [vmem:[#allocation2 + $0x394] sm:$0xf]  ;;  %v4897_v17 = vld [vmem:[#allocation2 + $0x1d8] sm:$0xf] }
 0x148   :  { %1643 = vmatpush.bf16.msrb.mxu1 %v4914_v24  ;;  %v771_v14 = vxor.u32 2147483648, %v765_v29  ;;  %v775_v10 = vsel %vm773_vm13, %v774_v41, %v765_v29  ;;  %v5115_v46 = vld [vmem:[#allocation2 + $0x3b0] sm:$0xf0]  ;;  %v4761_v56 = vld [vmem:[#allocation2 + $0xd0] sm:$0xf]  ;;  %v5114_v8 = vor.u32 %v6453_v42, %v5113_v2 }
 0x149   :  { %1630 = vmatmul.bf16.vlgmr.msrb.gmra.mxu0 %v7700_v26  ;;  %v6369_v23 = vld [vmem:[#allocation2 + $0x114] sm:$0xf]  ;;  %v6365_v27 = vld [vmem:[#allocation2 + $0xec] sm:$0xf0]  ;;  %v5118_v47 = vor.u32 %v6449_v48, %v5115_v46  ;;  %v4865_v48 = vld [vmem:[#allocation2 + $0x198] sm:$0xf] }
 0x14a   :  { %1678 = vmatpush.bf16.msra.mxu0 %v4890_v52  ;;  %v772_v60 = vsel %vm770_vm11, %v757_v31, %v771_v14  ;;  %1658 = vmatmul.bf16.vlgmr.msrb.gmra.mxu2 %v7700_v26  ;;  %v4795_v63 = vld [vmem:[#allocation2 + $0x130] sm:$0xf0]  ;;  %v5081_v61 = vld [vmem:[#allocation2 + $0x350] sm:$0xf]  ;;  %v4762_v13 = vor.u32 %v6365_v27, %v4761_v56  ;;  %v6390_v46 = vld [vmem:[#allocation2 + $0x1b4] sm:$0xf0] }
 0x14b   :  { %1706 = vmatpush.bf16.msra.mxu2 %v4894_v15  ;;  %v776_v54 = vsel %vm769_vm15, %v772_v60, %v775_v10  ;;  %v6445_v38 = vld [vmem:[#allocation2 + $0x36c] sm:$0xf0]  ;;  %v6441_v44 = vld [vmem:[#allocation2 + $0x354] sm:$0xf]  ;;  %v4798_v43 = vor.u32 %v6369_v23, %v4795_v63  ;;  %v6398_v60 = vld [vmem:[#allocation2 + $0x1f4] sm:$0xf0] }
 0x14c   :  { %v777_v30 = vsel %vm766_vm1, nan, %v776_v54  ;;  %v5083_v25 = vld [vmem:[#allocation2 + $0x370] sm:$0xf0]  ;;  %v4729_v0 = vld [vmem:[#allocation2 + $0x90] sm:$0xf]  ;;  %v5082_v33 = vor.u32 %v6445_v38, %v5081_v61 }
 0x14d   :  { %v7749_v4 = vpack.c.bf16 %v777_v30, %v467_v20  ;;  %v6361_v1 = vld [vmem:[#allocation2 + $0xd4] sm:$0xf]  ;;  %v6357_v57 = vld [vmem:[#allocation2 + $0xac] sm:$0xf0]  ;;  %v5086_v52 = vor.u32 %v6441_v44, %v5083_v25  ;;  %v4898_v20 = vor.u32 %v6398_v60, %v4897_v17  ;;  %v6394_v30 = vld [vmem:[#allocation2 + $0x1dc] sm:$0xf] }
 0x14e   :  { %1679 = vmatpush.bf16.msra.mxu0 %v4858_v58  ;;  %v4763_v35 = vld [vmem:[#allocation2 + $0xf0] sm:$0xf0]  ;;  %v5049_v55 = vld [vmem:[#allocation2 + $0x310] sm:$0xf]  ;;  %v4730_v22 = vor.u32 %v6357_v57, %v4729_v0  ;;  %v4867_v61 = vld [vmem:[#allocation2 + $0x1b8] sm:$0xf0] }
 0x14f   :  { %1707 = vmatpush.bf16.msra.mxu2 %v4862_v32  ;;  %1588 = vmatmul.bf16.vlgmr.msra.gmra.mxu1 %v7749_v4  ;;  %v6437_v3 = vld [vmem:[#allocation2 + $0x32c] sm:$0xf0]  ;;  %v6433_v24 = vld [vmem:[#allocation2 + $0x314] sm:$0xf]  ;;  %v4766_v12 = vor.u32 %v6361_v1, %v4763_v35  ;;  %v5153_v0 = vld [vmem:[#allocation2 + $0x3d8] sm:$0xf] }
 0x150   :  { %1616 = vmatmul.bf16.vlgmr.msra.gmra.mxu3 %v7749_v4  ;;  %1692 = vmatpush.bf16.msra.mxu1 %v5146_v50  ;;  %v5051_v28 = vld [vmem:[#allocation2 + $0x330] sm:$0xf0]  ;;  %v4697_v6 = vld [vmem:[#allocation2 + $0x50] sm:$0xf]  ;;  %v5050_v45 = vor.u32 %v6437_v3, %v5049_v55  ;;  %v4899_v50 = vld [vmem:[#allocation2 + $0x1f8] sm:$0xf0] }
 0x151   :  { %1720 = vmatpush.bf16.msra.mxu3 %v5150_v62  ;;  %v6353_v31 = vld [vmem:[#allocation2 + $0x94] sm:$0xf]  ;;  %v6349_v15 = vld [vmem:[#allocation2 + $0x6c] sm:$0xf0]  ;;  %v5054_v19 = vor.u32 %v6433_v24, %v5051_v28  ;;  %v4902_v56 = vor.u32 %v6394_v30, %v4899_v50  ;;  %v6462_v57 = vld [vmem:[#allocation2 + $0x3f4] sm:$0xf0] }
 0x152   :  { %1680 = vmatpush.bf16.msra.mxu0 %v4826_v16  ;;  %v4731_v40 = vld [vmem:[#allocation2 + $0xb0] sm:$0xf0]  ;;  %v5017_v36 = vld [vmem:[#allocation2 + $0x2d0] sm:$0xf]  ;;  %v4698_v59 = vor.u32 %v6349_v15, %v4697_v6  ;;  %v6378_v24 = vld [vmem:[#allocation2 + $0x15c] sm:$0xf] }
 0x153   :  { %1708 = vmatpush.bf16.msra.mxu2 %v4830_v21  ;;  %v6429_v29 = vld [vmem:[#allocation2 + $0x2ec] sm:$0xf0]  ;;  %v6425_v41 = vld [vmem:[#allocation2 + $0x2d4] sm:$0xf]  ;;  %v4734_v9 = vor.u32 %v6353_v31, %v4731_v40  ;;  %v4835_v28 = vld [vmem:[#allocation2 + $0x178] sm:$0xf0]  ;;  %v5154_v31 = vor.u32 %v6462_v57, %v5153_v0 }
 0x154   :  { %1693 = vmatpush.bf16.msra.mxu1 %v5114_v8  ;;  %v5019_v58 = vld [vmem:[#allocation2 + $0x2f0] sm:$0xf0]  ;;  %v4665_v18 = vld [vmem:[#allocation2 + $0x10] sm:$0xf]  ;;  %v5018_v34 = vor.u32 %v6429_v29, %v5017_v36  ;;  %v4866_v8 = vor.u32 %v6390_v46, %v4865_v48  ;;  %v5121_v6 = vld [vmem:[#allocation2 + $0x398] sm:$0xf] }
 0x155   :  { %1721 = vmatpush.bf16.msra.mxu3 %v5118_v47  ;;  %v6345_v53 = vld [vmem:[#allocation2 + $0x54] sm:$0xf]  ;;  %v6341_v32 = vld [vmem:[#allocation2 + $0x2c] sm:$0xf0]  ;;  %v5022_v49 = vor.u32 %v6425_v41, %v5019_v58  ;;  %v6386_v47 = vld [vmem:[#allocation2 + $0x19c] sm:$0xf]  ;;  %v4838_v41 = vor.u32 %v6378_v24, %v4835_v28 }
 0x156   :  { %1681 = vmatpush.bf16.msra.mxu0 %v4794_v7  ;;  %v4699_v14 = vld [vmem:[#allocation2 + $0x70] sm:$0xf0]  ;;  %v4985_v11 = vld [vmem:[#allocation2 + $0x290] sm:$0xf]  ;;  %v4666_v54 = vor.u32 %v6341_v32, %v4665_v18  ;;  %v4870_v55 = vor.u32 %v6386_v47, %v4867_v61  ;;  %v4801_v15 = vld [vmem:[#allocation2 + $0x118] sm:$0xf] }
 0x157   :  { %1709 = vmatpush.bf16.msra.mxu2 %v4798_v43  ;;  %v6421_v10 = vld [vmem:[#allocation2 + $0x2ac] sm:$0xf0]  ;;  %v6417_v16 = vld [vmem:[#allocation2 + $0x294] sm:$0xf]  ;;  %v4702_v37 = vor.u32 %v6345_v53, %v4699_v14  ;;  %v4833_v43 = vld [vmem:[#allocation2 + $0x158] sm:$0xf] }
 0x158   :  { %1694 = vmatpush.bf16.msra.mxu1 %v5082_v33  ;;  %v4987_v5 = vld [vmem:[#allocation2 + $0x2b0] sm:$0xf0]  ;;  %v4986_v62 = vor.u32 %v6421_v10, %v4985_v11  ;;  %v4953_v42 = vld [vmem:[#allocation2 + $0x250] sm:$0xf]  ;;  %v6458_v33 = vld [vmem:[#allocation2 + $0x3dc] sm:$0xf] }
 0x159   :  { %1722 = vmatpush.bf16.msra.mxu3 %v5086_v52  ;;  %v6337_v39 = vld [vmem:[#allocation2 + $0x14] sm:$0xf]  ;;  %v4990_v2 = vor.u32 %v6417_v16, %v4987_v5  ;;  %v6413_v21 = vld [vmem:[#allocation2 + $0x26c] sm:$0xf0]  ;;  %v5155_v52 = vld [vmem:[#allocation2 + $0x3f8] sm:$0xf0] }
 0x15a   :  { %1682 = vmatpush.bf16.msra.mxu0 %v4762_v13  ;;  %v4667_v51 = vld [vmem:[#allocation2 + $0x30] sm:$0xf0]  ;;  %v4921_v27 = vld [vmem:[#allocation2 + $0x210] sm:$0xf]  ;;  %v4954_v38 = vor.u32 %v6413_v21, %v4953_v42  ;;  %v6382_v13 = vld [vmem:[#allocation2 + $0x174] sm:$0xf0]  ;;  %v5158_v40 = vor.u32 %v6458_v33, %v5155_v52 }
 0x15b   :  { %1710 = vmatpush.bf16.msra.mxu2 %v4766_v12  ;;  %v6409_v7 = vld [vmem:[#allocation2 + $0x254] sm:$0xf]  ;;  %v4670_v63 = vor.u32 %v6337_v39, %v4667_v51  ;;  %v6405_v25 = vld [vmem:[#allocation2 + $0x22c] sm:$0xf0]  ;;  %v4834_v3 = vor.u32 %v6382_v13, %v4833_v43  ;;  %v6450_v36 = vld [vmem:[#allocation2 + $0x39c] sm:$0xf] }
 0x15c   :  { %1695 = vmatpush.bf16.msra.mxu1 %v5050_v45  ;;  %v4955_v23 = vld [vmem:[#allocation2 + $0x270] sm:$0xf0]  ;;  %v4922_v12 = vor.u32 %v6405_v25, %v4921_v27  ;;  %v6374_v45 = vld [vmem:[#allocation2 + $0x134] sm:$0xf0]  ;;  %v5123_v29 = vld [vmem:[#allocation2 + $0x3b8] sm:$0xf0] }
 0x15d   :  { %1723 = vmatpush.bf16.msra.mxu3 %v5054_v19  ;;  %v4958_v44 = vor.u32 %v6409_v7, %v4955_v23  ;;  %v6401_v1 = vld [vmem:[#allocation2 + $0x214] sm:$0xf]  ;;  %v6454_v19 = vld [vmem:[#allocation2 + $0x3b4] sm:$0xf0]  ;;  %v6370_v58 = vld [vmem:[#allocation2 + $0x11c] sm:$0xf]  ;;  %v5126_v14 = vor.u32 %v6450_v36, %v5123_v29 }
 0x15e   :  { %1683 = vmatpush.bf16.msra.mxu0 %v4730_v22  ;;  %v4923_v35 = vld [vmem:[#allocation2 + $0x230] sm:$0xf0]  ;;  %v5122_v53 = vor.u32 %v6454_v19, %v5121_v6  ;;  %v5089_v18 = vld [vmem:[#allocation2 + $0x358] sm:$0xf]  ;;  %v6442_v11 = vld [vmem:[#allocation2 + $0x35c] sm:$0xf] }
 0x15f   :  { %1711 = vmatpush.bf16.msra.mxu2 %v4734_v9  ;;  %1644 = vmatmul.bf16.vlgmr.msrb.gmra.mxu1 %v7749_v4  ;;  %v4926_v22 = vor.u32 %v6401_v1, %v4923_v35  ;;  %v4803_v9 = vld [vmem:[#allocation2 + $0x138] sm:$0xf0]  ;;  %v4769_v32 = vld [vmem:[#allocation2 + $0xd8] sm:$0xf]  ;;  %v5233_v28 = vld [vmem:[#allocation5 + $0x70] sm:$0xf] }
 0x160   :  { %1672 = vmatmul.bf16.vlgmr.msrb.gmra.mxu3 %v7749_v4  ;;  %1696 = vmatpush.bf16.msra.mxu1 %v5018_v34  ;;  %v6366_v34 = vld [vmem:[#allocation2 + $0xf4] sm:$0xf0]  ;;  %v5091_v17 = vld [vmem:[#allocation2 + $0x378] sm:$0xf0]  ;;  %v4806_v60 = vor.u32 %v6370_v58, %v4803_v9  ;;  %v6476_v58 = vld [vmem:[#allocation5 + $0x64] sm:$0xf0] }
 0x161   :  { %1724 = vmatpush.bf16.msra.mxu3 %v5022_v49  ;;  %v6446_v49 = vld [vmem:[#allocation2 + $0x374] sm:$0xf0]  ;;  %v6362_v10 = vld [vmem:[#allocation2 + $0xdc] sm:$0xf]  ;;  %v4770_v5 = vor.u32 %v6366_v34, %v4769_v32 }
 0x162   :  { %1684 = vmatpush.bf16.msra.mxu0 %v4698_v59  ;;  %v4802_v59 = vor.u32 %v6374_v45, %v4801_v15  ;;  %v4771_v16 = vld [vmem:[#allocation2 + $0xf8] sm:$0xf0]  ;;  %v5057_v39 = vld [vmem:[#allocation2 + $0x318] sm:$0xf] }
 0x163   :  { %1712 = vmatpush.bf16.msra.mxu2 %v4702_v37  ;;  %v5090_v37 = vor.u32 %v6446_v49, %v5089_v18  ;;  %v4737_v51 = vld [vmem:[#allocation2 + $0x98] sm:$0xf]  ;;  %v6434_v50 = vld [vmem:[#allocation2 + $0x31c] sm:$0xf]  ;;  %v5297_v49 = vld [vmem:[#allocation5 + $0xf0] sm:$0xf] }
 0x164   :  { %1697 = vmatpush.bf16.msra.mxu1 %v4986_v62  ;;  %v6438_v30 = vld [vmem:[#allocation2 + $0x334] sm:$0xf0]  ;;  %v5059_v62 = vld [vmem:[#allocation2 + $0x338] sm:$0xf0] }
 0x165   :  { %1725 = vmatpush.bf16.msra.mxu3 %v4990_v2  ;;  %v4774_v2 = vor.u32 %v6362_v10, %v4771_v16  ;;  %v6354_v42 = vld [vmem:[#allocation2 + $0x9c] sm:$0xf]  ;;  %v5058_v21 = vor.u32 %v6438_v30, %v5057_v39  ;;  %v5062_v7 = vor.u32 %v6434_v50, %v5059_v62  ;;  %v5025_v23 = vld [vmem:[#allocation2 + $0x2d8] sm:$0xf]  ;;  %v6492_v39 = vld [vmem:[#allocation5 + $0xe4] sm:$0xf0] }
 0x166   :  { %1685 = vmatpush.bf16.msra.mxu0 %v4666_v54  ;;  %v5094_v54 = vor.u32 %v6442_v11, %v5091_v17  ;;  %v4739_v48 = vld [vmem:[#allocation2 + $0xb8] sm:$0xf0]  ;;  %v6430_v27 = vld [vmem:[#allocation2 + $0x2f4] sm:$0xf0]  ;;  %v5217_v17 = vld [vmem:[#allocation5 + $0x50] sm:$0xf] }
 0x167   :  { %1713 = vmatpush.bf16.msra.mxu2 %v4670_v63  ;;  %v4705_v63 = vld [vmem:[#allocation2 + $0x58] sm:$0xf]  ;;  %v5027_v47 = vld [vmem:[#allocation2 + $0x2f8] sm:$0xf0]  ;;  %v4742_v61 = vor.u32 %v6354_v42, %v4739_v48  ;;  %v5026_v13 = vor.u32 %v6430_v27, %v5025_v23  ;;  %v6472_v30 = vld [vmem:[#allocation5 + $0x44] sm:$0xf0] }
 0x168   :  { %1698 = vmatpush.bf16.msra.mxu1 %v4954_v38  ;;  %v6346_v38 = vld [vmem:[#allocation2 + $0x5c] sm:$0xf]  ;;  %v4993_v25 = vld [vmem:[#allocation2 + $0x298] sm:$0xf]  ;;  %v5281_v62 = vld [vmem:[#allocation5 + $0xd0] sm:$0xf] }
 0x169   :  { %1686 = vmatmul.bf16.vlgmr.msra.gmra.mxu0 %v7700_v26  ;;  %1726 = vmatpush.bf16.msra.mxu3 %v4958_v44  ;;  %v4707_v44 = vld [vmem:[#allocation2 + $0x78] sm:$0xf0]  ;;  %v6422_v35 = vld [vmem:[#allocation2 + $0x2b4] sm:$0xf0]  ;;  %v5201_v48 = vld [vmem:[#allocation5 + $0x30] sm:$0xf] }
 0x16a   :  { %1734 = vmatpush.bf16.msrb.mxu0 %v4898_v20  ;;  %1714 = vmatmul.bf16.vlgmr.msra.gmra.mxu2 %v7700_v26  ;;  %v6358_v20 = vld [vmem:[#allocation2 + $0xb4] sm:$0xf0]  ;;  %v6418_v33 = vld [vmem:[#allocation2 + $0x29c] sm:$0xf]  ;;  %v6488_v23 = vld [vmem:[#allocation5 + $0xc4] sm:$0xf0] }
 0x16b   :  { %1762 = vmatpush.bf16.msrb.mxu2 %v4902_v56  ;;  %v4738_v46 = vor.u32 %v6358_v20, %v4737_v51  ;;  %v6350_v56 = vld [vmem:[#allocation2 + $0x74] sm:$0xf0]  ;;  %v4995_v52 = vld [vmem:[#allocation2 + $0x2b8] sm:$0xf0]  ;;  %v5209_v20 = vld [vmem:[#allocation5 + $0x40] sm:$0xf] }
 0x16c   :  { %1699 = vmatpush.bf16.msra.mxu1 %v4922_v12  ;;  %v4706_v43 = vor.u32 %v6350_v56, %v4705_v63  ;;  %v4673_v0 = vld [vmem:[#allocation2 + $0x18] sm:$0xf]  ;;  %v4675_v24 = vld [vmem:[#allocation2 + $0x38] sm:$0xf0]  ;;  %v5210_v50 = vor.u32 %v6472_v30, %v5209_v20  ;;  %v5193_v56 = vld [vmem:[#allocation5 + $0x20] sm:$0xf] }
 0x16d   :  { %1727 = vmatpush.bf16.msra.mxu3 %v4926_v22  ;;  %v6342_v57 = vld [vmem:[#allocation2 + $0x34] sm:$0xf0]  ;;  %v6410_v45 = vld [vmem:[#allocation2 + $0x25c] sm:$0xf]  ;;  %v6468_v27 = vld [vmem:[#allocation5 + $0x24] sm:$0xf0] }
 0x16e   :  { %1735 = vmatpush.bf16.msrb.mxu0 %v4866_v8  ;;  %v6426_v8 = vld [vmem:[#allocation2 + $0x2dc] sm:$0xf]  ;;  %v6478_v12 = vld [vmem:[#allocation5 + $0x74] sm:$0xf0]  ;;  %v4674_v22 = vor.u32 %v6342_v57, %v4673_v0  ;;  %v5257_v0 = vld [vmem:[#allocation5 + $0xa0] sm:$0xf] }
 0x16f   :  { %1763 = vmatpush.bf16.msrb.mxu2 %v4870_v55  ;;  %1700 = vmatmul.bf16.vlgmr.msra.gmra.mxu1 %v7749_v4  ;;  %v5030_v1 = vor.u32 %v6426_v8, %v5027_v47  ;;  %v4710_v55 = vor.u32 %v6346_v38, %v4707_v44  ;;  %v4961_v6 = vld [vmem:[#allocation2 + $0x258] sm:$0xf]  ;;  %v4963_v19 = vld [vmem:[#allocation2 + $0x278] sm:$0xf0]  ;;  %v5234_v29 = vor.u32 %v6478_v12, %v5233_v28  ;;  %v7766_v8 = vld [vmem:[%s8745_s5] sm:$0xff] }
 0x170   :  { %1748 = vmatpush.bf16.msrb.mxu1 %v5154_v31  ;;  %1728 = vmatmul.bf16.vlgmr.msra.gmra.mxu3 %v7749_v4  ;;  %v4994_v31 = vor.u32 %v6422_v35, %v4993_v25  ;;  %v6414_v15 = vld [vmem:[#allocation2 + $0x274] sm:$0xf0]  ;;  %v6402_v18 = vld [vmem:[#allocation2 + $0x21c] sm:$0xf]  ;;  %v5194_v47 = vor.u32 %v6468_v27, %v5193_v56  ;;  %v910_v25 = vperm.slane %v7766_v8, 0 }
 0x171   :  { %1776 = vmatpush.bf16.msrb.mxu3 %v5158_v40  ;;  %v4998_v40 = vor.u32 %v6418_v33, %v4995_v52  ;;  %v4962_v9 = vor.u32 %v6414_v15, %v4961_v6  ;;  %v4931_v32 = vld [vmem:[#allocation2 + $0x238] sm:$0xf0]  ;;  %v6494_v11 = vld [vmem:[#allocation5 + $0xf4] sm:$0xf0]  ;;  %v6484_v57 = vld [vmem:[#allocation5 + $0xa4] sm:$0xf0] }
 0x172   :  { %1736 = vmatpush.bf16.msrb.mxu0 %v4834_v3  ;;  %v6338_v3 = vld [vmem:[#allocation2 + $0x1c] sm:$0xf]  ;;  %v4934_v16 = vor.u32 %v6402_v18, %v4931_v32  ;;  %v6486_v38 = vld [vmem:[#allocation5 + $0xb4] sm:$0xf0]  ;;  %v5258_v33 = vor.u32 %v6484_v57, %v5257_v0  ;;  %v5361_v12 = vld [vmem:[#allocation5 + $0x170] sm:$0xf] }
 0x173   :  { %1764 = vmatpush.bf16.msrb.mxu2 %v4838_v41  ;;  %v4678_v36 = vor.u32 %v6338_v3, %v4675_v24  ;;  %v5225_v41 = vld [vmem:[#allocation5 + $0x60] sm:$0xf]  ;;  %v6464_v24 = vld [vmem:[#allocation5 + $0x4] sm:$0xf0]  ;;  %v6542_v15 = vld [vmem:[#allocation5 + $0x274] sm:$0xf0] }
 0x174   :  { %1749 = vmatpush.bf16.msrb.mxu1 %v5122_v53  ;;  %v4929_v53 = vld [vmem:[#allocation2 + $0x218] sm:$0xf]  ;;  %v5226_v34 = vor.u32 %v6476_v58, %v5225_v41  ;;  %v5177_v3 = vld [vmem:[#allocation5] sm:$0xf]  ;;  %v6540_v18 = vld [vmem:[#allocation5 + $0x264] sm:$0xf0] }
 0x175   :  { %1777 = vmatpush.bf16.msrb.mxu3 %v5126_v14  ;;  %v6406_v14 = vld [vmem:[#allocation2 + $0x234] sm:$0xf0]  ;;  %v5178_v28 = vor.u32 %v6464_v24, %v5177_v3  ;;  %v5345_v20 = vld [vmem:[#allocation5 + $0x150] sm:$0xf]  ;;  %v5545_v56 = vld [vmem:[#allocation5 + $0x2e0] sm:$0xf] }
 0x176   :  { %1737 = vmatpush.bf16.msrb.mxu0 %v4802_v59  ;;  %v4966_v59 = vor.u32 %v6410_v45, %v4963_v19  ;;  %v4930_v10 = vor.u32 %v6406_v14, %v4929_v53  ;;  %v5249_v45 = vld [vmem:[#allocation5 + $0x90] sm:$0xf]  ;;  %v6482_v19 = vld [vmem:[#allocation5 + $0x94] sm:$0xf0]  ;;  %v5481_v14 = vld [vmem:[#allocation5 + $0x260] sm:$0xf] }
 0x177   :  { %1765 = vmatpush.bf16.msrb.mxu2 %v4806_v60  ;;  %v6474_v60 = vld [vmem:[#allocation5 + $0x54] sm:$0xf0]  ;;  %v5250_v41 = vor.u32 %v6482_v19, %v5249_v45  ;;  %v6556_v27 = vld [vmem:[#allocation5 + $0x2e4] sm:$0xf0]  ;;  %v5409_v3 = vld [vmem:[#allocation5 + $0x1d0] sm:$0xf] }
 0x178   :  { %1750 = vmatpush.bf16.msrb.mxu1 %v5090_v37  ;;  %v5218_v37 = vor.u32 %v6474_v60, %v5217_v17  ;;  %v6480_v17 = vld [vmem:[#allocation5 + $0x84] sm:$0xf0]  ;;  %v5425_v60 = vld [vmem:[#allocation5 + $0x1f0] sm:$0xf]  ;;  %v6522_v24 = vld [vmem:[#allocation5 + $0x1d4] sm:$0xf0] }
 0x179   :  { %1778 = vmatpush.bf16.msrb.mxu3 %v5094_v54  ;;  %v5289_v54 = vld [vmem:[#allocation5 + $0xe0] sm:$0xf]  ;;  %v5329_v45 = vld [vmem:[#allocation5 + $0x130] sm:$0xf]  ;;  %v6502_v19 = vld [vmem:[#allocation5 + $0x134] sm:$0xf0] }
 0x17a   :  { %1738 = vmatpush.bf16.msrb.mxu0 %v4770_v5  ;;  %v5298_v5 = vor.u32 %v6494_v11, %v5297_v49  ;;  %v5290_v51 = vor.u32 %v6492_v39, %v5289_v54  ;;  %v5482_v49 = vor.u32 %v6540_v18, %v5481_v14  ;;  %v5241_v11 = vld [vmem:[#allocation5 + $0x80] sm:$0xf]  ;;  %v5553_v39 = vld [vmem:[#allocation5 + $0x2f0] sm:$0xf]  ;;  %v913_v18 = vperm.slane %v7766_v8, 3 }
 0x17b   :  { %1766 = vmatpush.bf16.msrb.mxu2 %v4774_v2 }
 0x17c   :  { %1751 = vmatpush.bf16.msrb.mxu1 %v5058_v21 }
 0x17d   :  { %1779 = vmatpush.bf16.msrb.mxu3 %v5062_v7  ;;  %v5273_v7 = vld [vmem:[#allocation5 + $0xc0] sm:$0xf] }
 0x17e   :  { %1739 = vmatpush.bf16.msrb.mxu0 %v4738_v46  ;;  %v6470_v46 = vld [vmem:[#allocation5 + $0x34] sm:$0xf0] }
 0x17f   :  { %1767 = vmatpush.bf16.msrb.mxu2 %v4742_v61  ;;  %v5202_v21 = vor.u32 %v6470_v46, %v5201_v48  ;;  %v5265_v61 = vld [vmem:[#allocation5 + $0xb0] sm:$0xf]  ;;  %v5417_v46 = vld [vmem:[#allocation5 + $0x1e0] sm:$0xf] }
 0x180   :  { %1752 = vmatpush.bf16.msrb.mxu1 %v5026_v13  ;;  %v5266_v44 = vor.u32 %v6486_v38, %v5265_v61  ;;  %v6466_v13 = vld [vmem:[#allocation5 + $0x14] sm:$0xf0] }
 0x181   :  { %1780 = vmatpush.bf16.msrb.mxu3 %v5030_v1 }
 0x182   :  { %1740 = vmatpush.bf16.msrb.mxu0 %v4706_v43  ;;  %v5185_v43 = vld [vmem:[#allocation5 + $0x10] sm:$0xf] }
 0x183   :  { %1768 = vmatpush.bf16.msrb.mxu2 %v4710_v55  ;;  %v5186_v1 = vor.u32 %v6466_v13, %v5185_v43  ;;  %v911_v55 = vperm.slane %v7766_v8, 1  ;;  %v6504_v43 = vld [vmem:[#allocation5 + $0x144] sm:$0xf0] }
 0x184   :  { %1753 = vmatpush.bf16.msrb.mxu1 %v4994_v31  ;;  %v5489_v31 = vld [vmem:[#allocation5 + $0x270] sm:$0xf] }
 0x185   :  { %1781 = vmatpush.bf16.msrb.mxu3 %v4998_v40 }
 0x186   :  { %1741 = vmatpush.bf16.msrb.mxu0 %v4674_v22  ;;  %v6510_v22 = vld [vmem:[#allocation5 + $0x174] sm:$0xf0] }
 0x187   :  { %1769 = vmatpush.bf16.msrb.mxu2 %v4678_v36  ;;  %v5362_v6 = vor.u32 %v6510_v22, %v5361_v12  ;;  %v5410_v12 = vor.u32 %v6522_v24, %v5409_v3  ;;  %v5537_v22 = vld [vmem:[#allocation5 + $0x2d0] sm:$0xf] }
 0x188   :  { %1754 = vmatpush.bf16.msrb.mxu1 %v4962_v9  ;;  %v5353_v9 = vld [vmem:[#allocation5 + $0x160] sm:$0xf] }
 0x189   :  { %1742 = vmatmul.bf16.vlgmr.msrb.gmra.mxu0 %v7700_v26  ;;  %1782 = vmatpush.bf16.msrb.mxu3 %v4966_v59  ;;  %v6508_v59 = vld [vmem:[#allocation5 + $0x164] sm:$0xf0] }
 0x18a   :  { %2892 = vmatpush.bf16.msra.mxu0 %v5234_v29  ;;  %1770 = vmatmul.bf16.vlgmr.msrb.gmra.mxu2 %v7700_v26  ;;  %v6490_v26 = vld [vmem:[#allocation5 + $0xd4] sm:$0xf0]  ;;  %v5490_v29 = vor.u32 %v6542_v15, %v5489_v31  ;;  %v5354_v53 = vor.u32 %v6508_v59, %v5353_v9  ;;  %v5401_v59 = vld [vmem:[#allocation5 + $0x1c0] sm:$0xf] }
 0x18b   :  { %v5282_v2 = vor.u32 %v6490_v26, %v5281_v62  ;;  %2920 = vmatpush.bf16.msra.mxu2 %v5362_v6  ;;  %v6506_v62 = vld [vmem:[#allocation5 + $0x154] sm:$0xf0]  ;;  %v5473_v26 = vld [vmem:[#allocation5 + $0x250] sm:$0xf] }
 0x18c   :  { %1755 = vmatpush.bf16.msrb.mxu1 %v4930_v10  ;;  %v6526_v10 = vld [vmem:[#allocation5 + $0x1f4] sm:$0xf0]  ;;  %v5346_v48 = vor.u32 %v6506_v62, %v5345_v20  ;;  %v6532_v20 = vld [vmem:[#allocation5 + $0x224] sm:$0xf0] }
 0x18d   :  { %1783 = vmatpush.bf16.msrb.mxu3 %v4934_v16  ;;  %v5426_v54 = vor.u32 %v6526_v10, %v5425_v60  ;;  %v6554_v31 = vld [vmem:[#allocation5 + $0x2d4] sm:$0xf0] }
 0x18e   :  { %2893 = vmatpush.bf16.msra.mxu0 %v5226_v34  ;;  %v5538_v15 = vor.u32 %v6554_v31, %v5537_v22  ;;  %v6534_v9 = vld [vmem:[#allocation5 + $0x234] sm:$0xf0]  ;;  %v5385_v31 = vld [vmem:[#allocation5 + $0x1a0] sm:$0xf] }
 0x18f   :  { %1756 = vmatmul.bf16.vlgmr.msrb.gmra.mxu1 %v7749_v4  ;;  %2921 = vmatpush.bf16.msra.mxu2 %v5354_v53  ;;  %v6520_v53 = vld [vmem:[#allocation5 + $0x1c4] sm:$0xf0]  ;;  %v6530_v22 = vld [vmem:[#allocation5 + $0x214] sm:$0xf0] }
 0x190   :  { %2906 = vmatpush.bf16.msra.mxu1 %v5298_v5  ;;  %1784 = vmatmul.bf16.vlgmr.msrb.gmra.mxu3 %v7749_v4  ;;  %v5274_v4 = vor.u32 %v6488_v23, %v5273_v7  ;;  %v912_v23 = vperm.slane %v7766_v8, 2 }
 0x191   :  { %2934 = vmatpush.bf16.msra.mxu3 %v5426_v54 }
 0x192   :  { %2894 = vmatpush.bf16.msra.mxu0 %v5218_v37  ;;  %v5242_v37 = vor.u32 %v6480_v17, %v5241_v11  ;;  %v6552_v11 = vld [vmem:[#allocation5 + $0x2c4] sm:$0xf0] }
 0x193   :  { %2922 = vmatpush.bf16.msra.mxu2 %v5346_v48 }
 0x194   :  { %2907 = vmatpush.bf16.msra.mxu1 %v5290_v51  ;;  %v6558_v51 = vld [vmem:[#allocation5 + $0x2f4] sm:$0xf0] }
 0x196   :  { %2895 = vmatpush.bf16.msra.mxu0 %v5210_v50  ;;  %v5554_v50 = vor.u32 %v6558_v51, %v5553_v39  ;;  %v5449_v51 = vld [vmem:[#allocation5 + $0x220] sm:$0xf] }
 0x198   :  { %2908 = vmatpush.bf16.msra.mxu1 %v5282_v2  ;;  %v6538_v2 = vld [vmem:[#allocation5 + $0x254] sm:$0xf0] }
 0x19a   :  { %2896 = vmatpush.bf16.msra.mxu0 %v5202_v21  ;;  %v6524_v21 = vld [vmem:[#allocation5 + $0x1e4] sm:$0xf0] }
 0x19c   :  { %2909 = vmatpush.bf16.msra.mxu1 %v5274_v4  ;;  %v5474_v4 = vor.u32 %v6538_v2, %v5473_v26  ;;  %v5450_v26 = vor.u32 %v6532_v20, %v5449_v51  ;;  %v5393_v2 = vld [vmem:[#allocation5 + $0x1b0] sm:$0xf] }
 0x19e   :  { %2897 = vmatpush.bf16.msra.mxu0 %v5194_v47 }
 0x1a0   :  { %2910 = vmatpush.bf16.msra.mxu1 %v5266_v44  ;;  %v5546_v44 = vor.u32 %v6556_v27, %v5545_v56 }
 0x1a2   :  { %2898 = vmatpush.bf16.msra.mxu0 %v5186_v1  ;;  %v5465_v1 = vld [vmem:[#allocation5 + $0x240] sm:$0xf] }
 0x1a4   :  { %2911 = vmatpush.bf16.msra.mxu1 %v5258_v33 }
 0x1a6   :  { %v1575_v42 = vpop.f32.mrf.mxu0  ;;  %2899 = vmatpush.bf16.msra.mxu0 %v5178_v28 }
 0x1a7   :  { %v1576_v52 = vadd.f32 %v1575_v42, %v910_v25 }
 0x1a8   :  { %2912 = vmatpush.bf16.msra.mxu1 %v5250_v41  ;;  %v5330_v41 = vor.u32 %v6502_v19, %v5329_v45 }
 0x1aa   :  { %2948 = vmatpush.bf16.msrb.mxu0 %v5490_v29 }
 0x1ac   :  { %2913 = vmatpush.bf16.msra.mxu1 %v5242_v37  ;;  %v6500_v37 = vld [vmem:[#allocation5 + $0x124] sm:$0xf0] }
 0x1ad   :  { %v1603_v63 = vpop.f32.mrf.mxu2 }
 0x1ae   :  { %v1577_v35 = vpop.f32.mrf.mxu0  ;;  %v1604_v34 = vadd.f32 %v1603_v63, %v911_v55  ;;  %2949 = vmatpush.bf16.msrb.mxu0 %v5482_v49  ;;  %v5418_v63 = vor.u32 %v6524_v21, %v5417_v46  ;;  %v5529_v49 = vld [vmem:[#allocation5 + $0x2c0] sm:$0xf] }
 0x1af   :  { %v1578_v16 = vadd.f32 %v1577_v35, %v910_v25  ;;  %v5337_v25 = vld [vmem:[#allocation5 + $0x140] sm:$0xf]  ;;  %v6536_v35 = vld [vmem:[#allocation5 + $0x244] sm:$0xf0] }
 0x1b0   :  { %2962 = vmatpush.bf16.msrb.mxu1 %v5554_v50  ;;  %v5338_v13 = vor.u32 %v6504_v43, %v5337_v25  ;;  %2935 = vmatpush.bf16.msra.mxu3 %v5418_v63 }
 0x1b2   :  { %2950 = vmatpush.bf16.msrb.mxu0 %v5474_v4  ;;  %2923 = vmatpush.bf16.msra.mxu2 %v5338_v13  ;;  %v6518_v4 = vld [vmem:[#allocation5 + $0x1b4] sm:$0xf0] }
 0x1b3   :  { %v5394_v13 = vor.u32 %v6518_v4, %v5393_v2 }
 0x1b4   :  { %2963 = vmatpush.bf16.msrb.mxu1 %v5546_v44  ;;  %2936 = vmatpush.bf16.msra.mxu3 %v5410_v12  ;;  %v6550_v44 = vld [vmem:[#allocation5 + $0x2b4] sm:$0xf0] }
 0x1b5   :  { %v7770_v40 = vpop.f32.mrf.mxu2 }
 0x1b6   :  { %v1606_v33 = vadd.f32 %v7770_v40, %v911_v55  ;;  %v5457_v40 = vld [vmem:[#allocation5 + $0x230] sm:$0xf]  ;;  %2924 = vmatpush.bf16.msra.mxu2 %v5330_v41 }
 0x1b8   :  { %2964 = vmatpush.bf16.msrb.mxu1 %v5538_v15 }
 0x1c6   :  { %v1631_v5 = vpop.f32.mrf.mxu0 }
 0x1c7   :  { %v1632_v6 = vadd.f32 %v1631_v5, %v912_v23  ;;  %v5321_v5 = vld [vmem:[#allocation5 + $0x120] sm:$0xf] }
 0x1c8   :  { %v5322_v39 = vor.u32 %v6500_v37, %v5321_v5 }
 0x1ca   :  { %2925 = vmatpush.bf16.msra.mxu2 %v5322_v39 }
 0x1cc   :  { %v1589_v36 = vpop.f32.mrf.mxu1 }
 0x1cd   :  { %v7772_v58 = vadd.f32 %v1589_v36, %v1576_v52  ;;  %v7783_v38 = vpop.f32.mrf.mxu2  ;;  %v5466_v52 = vor.u32 %v6536_v35, %v5465_v1  ;;  %v5313_v1 = vld [vmem:[#allocation5 + $0x110] sm:$0xf]  ;;  %v6498_v35 = vld [vmem:[#allocation5 + $0x114] sm:$0xf0] }
 0x1ce   :  { %v1633_v29 = vpop.f32.mrf.mxu0  ;;  %v5314_v12 = vor.u32 %v6498_v35, %v5313_v1 }
 0x1cf   :  { %v5159_v32 = vmul.f32 -1.442695, %v7772_v58  ;;  %2951 = vmatpush.bf16.msrb.mxu0 %v5466_v52  ;;  %v1634_v27 = vadd.f32 %v1633_v29, %v912_v23  ;;  %v6516_v29 = vld [vmem:[#allocation5 + $0x1a4] sm:$0xf0] }
 0x1d0   :  { %2926 = vmatpush.bf16.msra.mxu2 %v5314_v12 }
 0x1d1   :  { %6773 = vpow2.f32 %v5159_v32  ;;  %v5458_v32 = vor.u32 %v6534_v9, %v5457_v40 }
 0x1d3   :  { %v1617_v30 = vpop.f32.mrf.mxu3  ;;  %2952 = vmatpush.bf16.msrb.mxu0 %v5458_v32 }
 0x1d4   :  { %v7777_v42 = vadd.f32 %v1617_v30, %v1604_v34  ;;  %v1591_v7 = vpop.f32.mrf.mxu1  ;;  %v5402_v34 = vor.u32 %v6520_v53, %v5401_v59  ;;  %v5386_v53 = vor.u32 %v6516_v29, %v5385_v31 }
 0x1d5   :  { %v7781_v61 = vadd.f32 %v1591_v7, %v1578_v16  ;;  %v5530_v16 = vor.u32 %v6552_v11, %v5529_v49  ;;  %v1661_v62 = vpop.f32.mrf.mxu2  ;;  %v1660_v7 = vadd.f32 %v7783_v38, %v913_v18  ;;  %v915_v49 = vperm.slane %v7766_v8, 5 }
 0x1d6   :  { %v5160_v47 = vmul.f32 -1.442695, %v7777_v42  ;;  %2937 = vmatpush.bf16.msra.mxu3 %v5402_v34  ;;  %v7815_v43 = vadd.f32 %v1661_v62, %v913_v18 }
 0x1d7   :  { %v6774_v0 = vpop.eup %6773  ;;  %v5167_v57 = vmul.f32 -1.442695, %v7781_v61  ;;  %2965 = vmatpush.bf16.msrb.mxu1 %v5530_v16  ;;  %2953 = vmatpush.bf16.msrb.mxu0 %v5450_v26 }
 0x1d8   :  { %6775 = vpow2.f32 %v5160_v47  ;;  %v7789_v28 = vadd.f32 1.0, %v6774_v0  ;;  %v5521_v47 = vld [vmem:[#allocation5 + $0x2b0] sm:$0xf] }
 0x1d9   :  { %6777 = vpow2.f32 %v5167_v57  ;;  %v5522_v38 = vor.u32 %v6550_v44, %v5521_v47  ;;  %v914_v57 = vperm.slane %v7766_v8, 4 }
 0x1da   :  { %6779 = vrcp.f32 %v7789_v28  ;;  %v1863_v46 = vand.u32 2147483647, %v7789_v28  ;;  %v1865_v21 = vand.u32 2147483648, %v7789_v28  ;;  %vm1859_vm2 = vweird.f32 %v7789_v28  ;;  %2938 = vmatpush.bf16.msra.mxu3 %v5394_v13 }
 0x1db   :  { %v1619_v55 = vpop.f32.mrf.mxu3  ;;  %2966 = vmatpush.bf16.msrb.mxu1 %v5522_v38 }
 0x1dc   :  { %v7794_v36 = vadd.f32 %v1619_v55, %v1606_v33  ;;  %v1645_v14 = vpop.f32.mrf.mxu1  ;;  %v5441_v33 = vld [vmem:[#allocation5 + $0x210] sm:$0xf]  ;;  %vm7820_vm3 = vcmp.eq.f32.partialorder %v1863_v46, 8.507059e+37  ;;  %v1866_v52 = vor.u32 1.1754944e-38, %v1865_v21 }
 0x1dd   :  { %v7798_v10 = vadd.f32 %v1645_v14, %v1632_v6  ;;  %v5442_v40 = vor.u32 %v6530_v22, %v5441_v33 }
 0x1de   :  { %v6776_v17 = vpop.eup %6775  ;;  %v5168_v60 = vmul.f32 -1.442695, %v7794_v36  ;;  %2939 = vmatpush.bf16.msra.mxu3 %v5386_v53 }
 0x1df   :  { %v7800_v54 = vadd.f32 1.0, %v6776_v17  ;;  %v6778_v30 = vpop.eup %6777  ;;  %v5161_v50 = vmul.f32 -1.442695, %v7798_v10  ;;  %2954 = vmatpush.bf16.msrb.mxu0 %v5442_v40 }
 0x1e0   :  { %6781 = vpow2.f32 %v5168_v60  ;;  %v7803_v48 = vpop.eup %6779  ;;  %v7811_v56 = vadd.f32 1.0, %v6778_v30 }
 0x1e1   :  { %6783 = vrcp.f32 %v7800_v54  ;;  %v1855_v63 = vmul.f32 %v7803_v48, %v7789_v28  ;;  %v1880_v45 = vand.u32 2147483648, %v7800_v54  ;;  %vm1860_vm4 = vweird.f32 %v7803_v48 }
 0x1e2   :  { %6785 = vpow2.f32 %v5161_v50  ;;  %v1878_v34 = vand.u32 2147483647, %v7800_v54  ;;  %v1983_v11 = vand.u32 2147483647, %v7811_v56  ;;  %v1985_v17 = vand.u32 2147483648, %v7811_v56  ;;  %vm7850_vm5 = vmor %vm1859_vm2, %vm1860_vm4 }
 0x1e3   :  { %v1673_v25 = vpop.f32.mrf.mxu3  ;;  %v1856_v0 = vsub.f32 1.0, %v1855_v63  ;;  %6787 = vrcp.f32 %v7811_v56  ;;  %vm1874_vm6 = vweird.f32 %v7800_v54  ;;  %v1881_v30 = vor.u32 1.1754944e-38, %v1880_v45 }
 0x1e4   :  { %v7824_v3 = vadd.f32 %v1673_v25, %v1660_v7  ;;  %v1647_v24 = vpop.f32.mrf.mxu1  ;;  %vm1979_vm7 = vweird.f32 %v7811_v56  ;;  %vm7866_vm12 = vcmp.eq.f32.partialorder %v1983_v11, 8.507059e+37  ;;  %vm7873_vm14 = vcmp.eq.f32.partialorder %v1878_v34, 8.507059e+37 }
 0x1e5   :  { %v1857_v15 = vmul.f32 %v7803_v48, %v1856_v0  ;;  %v7828_v19 = vadd.f32 %v1647_v24, %v1634_v27 }
 0x1e6   :  { %v6782_v6 = vpop.eup %6781  ;;  %v1687_v55 = vpop.f32.mrf.mxu0  ;;  %v5162_v59 = vmul.f32 -1.442695, %v7824_v3 }
 0x1e7   :  { %v7830_v41 = vpop.eup %6783  ;;  %v7833_v9 = vadd.f32 1.0, %v6782_v6  ;;  %v1858_v18 = vadd.f32 %v7803_v48, %v1857_v15  ;;  %v1688_v60 = vadd.f32 %v1687_v55, %v914_v57  ;;  %v5169_v51 = vmul.f32 -1.442695, %v7828_v19 }
 0x1e8   :  { %v6786_v14 = vpop.eup %6785  ;;  %v1870_v32 = vmul.f32 %v7830_v41, %v7800_v54  ;;  %vm1875_vm8 = vweird.f32 %v7830_v41 }
 0x1e9   :  { %6789 = vrcp.f32 %v7833_v9  ;;  %v6788_v16 = vpop.eup %6787  ;;  %v7854_v39 = vadd.f32 1.0, %v6786_v14  ;;  %v1862_v20 = vsel %vm7850_vm5, %v7803_v48, %v1858_v18  ;;  %v1998_v26 = vand.u32 2147483647, %v7833_v9  ;;  %vm7905_vm15 = vmor %vm1874_vm6, %vm1875_vm8 }
 0x1ea   :  { %v1871_v37 = vsub.f32 1.0, %v1870_v32  ;;  %6791 = vpow2.f32 %v5162_v59  ;;  %v1975_v50 = vmul.f32 %v6788_v16, %v7811_v56  ;;  %v1986_v48 = vor.u32 1.1754944e-38, %v1985_v17 }
 0x1eb   :  { %v1675_v28 = vpop.f32.mrf.mxu3  ;;  %6793 = vrcp.f32 %v7854_v39  ;;  %v2000_v21 = vand.u32 2147483648, %v7833_v9  ;;  %v1867_v4 = vsel %vm7820_vm3, %v1866_v52, %v1862_v20  ;;  %vm1980_vm9 = vweird.f32 %v6788_v16 }
 0x1ec   :  { %v1872_v62 = vmul.f32 %v7830_v41, %v1871_v37  ;;  %v1976_v2 = vsub.f32 1.0, %v1975_v50  ;;  %v1701_v7 = vpop.f32.mrf.mxu1  ;;  %6795 = vpow2.f32 %v5169_v51  ;;  %v7878_v27 = vadd.f32 %v1675_v28, %v7815_v43  ;;  %vm1981_vm13 = vmor %vm1979_vm7, %vm1980_vm9 }
 0x1ed   :  { %v7880_v47 = vadd.f32 %v1701_v7, %v1688_v60  ;;  %vm1994_vm10 = vweird.f32 %v7833_v9  ;;  %v1715_v13 = vpop.f32.mrf.mxu2  ;;  %vm7886_vm11 = vcmp.eq.f32.partialorder %v1998_v26, 8.507059e+37  ;;  %v2094_v33 = vmul.f32 %v1867_v4, %v7772_v58 }
 0x1ee   :  { %v1977_v25 = vmul.f32 %v6788_v16, %v1976_v2  ;;  %v1873_v1 = vadd.f32 %v7830_v41, %v1872_v62  ;;  %v5170_v43 = vmul.f32 -1.442695, %v7878_v27  ;;  %v2001_v52 = vor.u32 1.1754944e-38, %v2000_v21  ;;  %v1689_v51 = vpop.f32.mrf.mxu0 }
 0x1ef   :  { %v6790_v44 = vpop.eup %6789  ;;  %v5163_v31 = vmul.f32 -1.442695, %v7880_v47  ;;  %v1716_v6 = vadd.f32 %v1715_v13, %v915_v49  ;;  %v1893_v45 = vand.u32 2147483647, %v7854_v39  ;;  %vm1889_vm1 = vweird.f32 %v7854_v39 }
 0x1f0   :  { %v6792_v38 = vpop.eup %6791  ;;  %v1990_v35 = vmul.f32 %v6790_v44, %v7833_v9  ;;  %v1978_v23 = vadd.f32 %v6788_v16, %v1977_v25  ;;  %6797 = vpow2.f32 %v5170_v43  ;;  %v1877_v40 = vsel %vm7905_vm15, %v7830_v41, %v1873_v1  ;;  %v6548_v43 = vld [vmem:[#allocation5 + $0x2a4] sm:$0xf0] }
 0x1f1   :  { %v7892_v24 = vadd.f32 1.0, %v6792_v38  ;;  %v7894_v12 = vpop.eup %6793  ;;  %vm1995_vm0 = vweird.f32 %v6790_v44  ;;  %v1895_v34 = vand.u32 2147483648, %v7854_v39  ;;  %v1882_v41 = vsel %vm7873_vm14, %v1881_v30, %v1877_v40 }
 0x1f2   :  { %v1991_v22 = vsub.f32 1.0, %v1990_v35  ;;  %v1982_v15 = vsel %vm1981_vm13, %v6788_v16, %v1978_v23  ;;  %v1885_v56 = vmul.f32 %v7894_v12, %v7854_v39  ;;  %v6796_v55 = vpop.eup %6795  ;;  %vm1996_vm2 = vmor %vm1994_vm10, %vm1995_vm0  ;;  %vm1890_vm3 = vweird.f32 %v7894_v12  ;;  %v5305_v23 = vld [vmem:[#allocation5 + $0x100] sm:$0xf] }
 0x1f3   :  { %6799 = vrcp.f32 %v7892_v24  ;;  %v1987_v54 = vsel %vm7866_vm12, %v1986_v48, %v1982_v15  ;;  %v7920_v14 = vadd.f32 1.0, %v6796_v55  ;;  %v1729_v18 = vpop.f32.mrf.mxu3  ;;  %vm7934_vm4 = vcmp.eq.f32.partialorder %v1893_v45, 8.507059e+37  ;;  %vm7955_vm5 = vmor %vm1889_vm1, %vm1890_vm3 }
 0x1f4   :  { %v1992_v29 = vmul.f32 %v6790_v44, %v1991_v22  ;;  %v2102_v59 = vmul.f32 %v1987_v54, %v7781_v61  ;;  %v1886_v53 = vsub.f32 1.0, %v1885_v56  ;;  %6801 = vpow2.f32 %v5163_v31 }
 0x1f5   :  { %v7923_v11 = vadd.f32 %v1729_v18, %v1716_v6  ;;  %6803 = vrcp.f32 %v7920_v14  ;;  %v1910_v37 = vand.u32 2147483648, %v7892_v24  ;;  %v2095_v62 = vmul.f32 %v1882_v41, %v7777_v42  ;;  %v1703_v6 = vpop.f32.mrf.mxu1  ;;  %v6528_v41 = vld [vmem:[#allocation5 + $0x204] sm:$0xf0] }
 0x1f6   :  { %v1993_v32 = vadd.f32 %v6790_v44, %v1992_v29  ;;  %v7927_v17 = vpack.c.bf16 %v2102_v59, %v2094_v33  ;;  %v1887_v61 = vmul.f32 %v7894_v12, %v1886_v53  ;;  %v6798_v60 = vpop.eup %6797  ;;  %v1908_v46 = vand.u32 2147483647, %v7892_v24  ;;  %v1717_v33 = vpop.f32.mrf.mxu2  ;;  %v5433_v59 = vld [vmem:[#allocation5 + $0x200] sm:$0xf] }
 0x1f7   :  { %v7944_v50 = vadd.f32 1.0, %v6798_v60  ;;  %v5164_v28 = vmul.f32 -1.442695, %v7923_v11  ;;  %v1896_v21 = vor.u32 1.1754944e-38, %v1895_v34  ;;  %v2013_v7 = vand.u32 2147483647, %v7920_v14 }
 0x1f8   :  { %v1997_v16 = vsel %vm1996_vm2, %v6790_v44, %v1993_v32  ;;  %v1888_v30 = vadd.f32 %v7894_v12, %v1887_v61  ;;  %2900 = vmatmul.bf16.vlgmr.msra.gmra.mxu0 %v7927_v17  ;;  %v1690_v42 = vadd.f32 %v1689_v51, %v914_v57  ;;  %v2015_v44 = vand.u32 2147483648, %v7920_v14  ;;  %v5513_v57 = vld [vmem:[#allocation5 + $0x2a0] sm:$0xf]  ;;  %v5617_v61 = vld [vmem:[#allocation5 + $0x370] sm:$0xf] }
 0x1f9   :  { %v7939_v20 = vpop.eup %6799  ;;  %v2002_v9 = vsel %vm7886_vm11, %v2001_v52, %v1997_v16  ;;  %6805 = vrcp.f32 %v7944_v50  ;;  %vm1904_vm6 = vweird.f32 %v7892_v24  ;;  %v7972_v13 = vor.u32 1.1754944e-38, %v1910_v37  ;;  %v6496_v52 = vld [vmem:[#allocation5 + $0x104] sm:$0xf0]  ;;  %v6574_v60 = vld [vmem:[#allocation5 + $0x374] sm:$0xf0] }
 0x1fa   :  { %v2103_v26 = vmul.f32 %v2002_v9, %v7794_v36  ;;  %v1900_v2 = vmul.f32 %v7939_v20, %v7892_v24  ;;  %v6802_v36 = vpop.eup %6801  ;;  %v1892_v63 = vsel %vm7955_vm5, %v7894_v12, %v1888_v30  ;;  %6807 = vpow2.f32 %v5164_v28 }
 0x1fb   :  { %v7969_v25 = vpop.eup %6803  ;;  %v7974_v38 = vadd.f32 1.0, %v6802_v36  ;;  %vm1905_vm7 = vweird.f32 %v7939_v20  ;;  %vm7978_vm12 = vcmp.eq.f32.partialorder %v1908_v46, 8.507059e+37  ;;  %vm2009_vm14 = vweird.f32 %v7920_v14  ;;  %v1731_v34 = vpop.f32.mrf.mxu3  ;;  %v5219_v46 = vld [vmem:[#allocation5 + $0x58] sm:$0xf0] }
 0x1fc   :  { %v7963_v4 = vpack.c.bf16 %v2103_v26, %v2095_v62  ;;  %v1901_v39 = vsub.f32 1.0, %v1900_v2  ;;  %v2005_v0 = vmul.f32 %v7969_v25, %v7920_v14  ;;  %v1897_v12 = vsel %vm7934_vm4, %v1896_v21, %v1892_v63  ;;  %vm8011_vm11 = vmor %vm1904_vm6, %vm1905_vm7  ;;  %v5377_v62 = vld [vmem:[#allocation5 + $0x190] sm:$0xf]  ;;  %v6514_v26 = vld [vmem:[#allocation5 + $0x194] sm:$0xf0] }
 0x1fd   :  { %vm7988_vm8 = vcmp.eq.f32.partialorder %v2013_v7, 8.507059e+37  ;;  %v2028_v31 = vand.u32 2147483647, %v7944_v50  ;;  %6809 = vrcp.f32 %v7974_v38  ;;  %v2016_v56 = vor.u32 1.1754944e-38, %v2015_v44  ;;  %v6477_v7 = vld [vmem:[#allocation5 + $0x74] sm:$0xf] }
 0x1fe   :  { %v1902_v1 = vmul.f32 %v7939_v20, %v1901_v39  ;;  %2914 = vmatmul.bf16.vlgmr.msra.gmra.mxu1 %v7963_v4  ;;  %v2006_v15 = vsub.f32 1.0, %v2005_v0  ;;  %v7995_v45 = vadd.f32 %v1703_v6, %v1690_v42  ;;  %vm2024_vm9 = vweird.f32 %v7944_v50  ;;  %v5235_v42 = vld [vmem:[#allocation5 + $0x78] sm:$0xf0]  ;;  %v5505_v39 = vld [vmem:[#allocation5 + $0x290] sm:$0xf] }
 0x1ff   :  { %v7997_v55 = vpop.eup %6805  ;;  %v5514_v40 = vor.u32 %v6548_v43, %v5513_v57  ;;  %v1718_v54 = vadd.f32 %v1717_v33, %v915_v49  ;;  %v5306_v29 = vor.u32 %v6496_v52, %v5305_v23  ;;  %v2096_v53 = vmul.f32 %v1897_v12, %v7798_v10  ;;  %v6546_v44 = vld [vmem:[#allocation5 + $0x294] sm:$0xf0]  ;;  %v5609_v57 = vld [vmem:[#allocation5 + $0x360] sm:$0xf]  ;;  %v6512_v23 = vld [vmem:[#allocation5 + $0x184] sm:$0xf0] }
 0x200   :  { %v1903_v58 = vadd.f32 %v7939_v20, %v1902_v1  ;;  %v2007_v18 = vmul.f32 %v7969_v25, %v2006_v15  ;;  %vm2010_vm10 = vweird.f32 %v7969_v25  ;;  %v2020_v32 = vmul.f32 %v7997_v55, %v7944_v50  ;;  %v6808_v16 = vpop.eup %6807  ;;  %v6572_v1 = vld [vmem:[#allocation5 + $0x364] sm:$0xf0]  ;;  %v6493_v49 = vld [vmem:[#allocation5 + $0xf4] sm:$0xf] }
 0x201   :  { %vm8015_vm13 = vcmp.eq.f32.partialorder %v2028_v31, 8.507059e+37  ;;  %v2030_v5 = vand.u32 2147483648, %v7944_v50  ;;  %v5171_v37 = vmul.f32 -1.442695, %v7995_v45  ;;  %2967 = vmatpush.bf16.msrb.mxu1 %v5514_v40  ;;  %v8021_v51 = vadd.f32 %v1731_v34, %v1718_v54  ;;  %2927 = vmatpush.bf16.msra.mxu2 %v5306_v29  ;;  %vm8035_vm15 = vmor %vm2009_vm14, %vm2010_vm10 }
 0x202   :  { %v1907_v24 = vsel %vm8011_vm11, %v7939_v20, %v1903_v58  ;;  %v2008_v9 = vadd.f32 %v7969_v25, %v2007_v18  ;;  %v2021_v30 = vsub.f32 1.0, %v2020_v32  ;;  %v8027_v28 = vadd.f32 1.0, %v6808_v16  ;;  %v6475_v58 = vld [vmem:[#allocation5 + $0x64] sm:$0xf]  ;;  %v5681_v18 = vld [vmem:[#allocation5 + $0x3f0] sm:$0xf] }
 0x203   :  { %v8029_v2 = vpop.eup %6809  ;;  %6811 = vpow2.f32 %v5171_v37  ;;  %v5172_v20 = vmul.f32 -1.442695, %v8021_v51  ;;  %v5434_v48 = vor.u32 %v6528_v41, %v5433_v59  ;;  %v5618_v21 = vor.u32 %v6574_v60, %v5617_v61  ;;  %v6544_v59 = vld [vmem:[#allocation5 + $0x284] sm:$0xf0]  ;;  %v6590_v32 = vld [vmem:[#allocation5 + $0x3f4] sm:$0xf0] }
 0x204   :  { %v2012_v36 = vsel %vm8035_vm15, %v7969_v25, %v2008_v9  ;;  %v2022_v63 = vmul.f32 %v7997_v55, %v2021_v30  ;;  %vm2025_vm0 = vweird.f32 %v7997_v55  ;;  %v1915_v14 = vmul.f32 %v8029_v2, %v7974_v38  ;;  %v5369_v25 = vld [vmem:[#allocation5 + $0x180] sm:$0xf]  ;;  %v5601_v37 = vld [vmem:[#allocation5 + $0x350] sm:$0xf] }
 0x205   :  { %v1912_v0 = vsel %vm7978_vm12, %v7972_v13, %v1907_v24  ;;  %v2017_v43 = vsel %vm7988_vm8, %v2016_v56, %v2012_v36  ;;  %v2031_v33 = vor.u32 1.1754944e-38, %v2030_v5  ;;  %6813 = vrcp.f32 %v8027_v28  ;;  %2955 = vmatpush.bf16.msrb.mxu0 %v5434_v48  ;;  %2976 = vmatpush.bf16.msrb.mxu2 %v5618_v21  ;;  %vm8060_vm1 = vmor %vm2024_vm9, %vm2025_vm0  ;;  %v5497_v56 = vld [vmem:[#allocation5 + $0x280] sm:$0xf]  ;;  %v5299_v5 = vld [vmem:[#allocation5 + $0xf8] sm:$0xf0] }
 0x206   :  { %v2104_v52 = vmul.f32 %v2017_v43, %v7828_v19  ;;  %v2023_v12 = vadd.f32 %v7997_v55, %v2022_v63  ;;  %v1916_v31 = vsub.f32 1.0, %v1915_v14  ;;  %v1923_v6 = vand.u32 2147483647, %v7974_v38  ;;  %v5227_v19 = vld [vmem:[#allocation5 + $0x68] sm:$0xf0] }
 0x207   :  { %v1925_v35 = vand.u32 2147483648, %v7974_v38  ;;  %6815 = vpow2.f32 %v5172_v20  ;;  %v5378_v22 = vor.u32 %v6514_v26, %v5377_v62  ;;  %v5238_v15 = vor.u32 %v6477_v7, %v5235_v42  ;;  %v6570_v24 = vld [vmem:[#allocation5 + $0x354] sm:$0xf0]  ;;  %v6473_v26 = vld [vmem:[#allocation5 + $0x54] sm:$0xf]  ;;  %v1743_v20 = vpop.f32.mrf.mxu0 }
 0x208   :  { %v2097_v40 = vmul.f32 %v1912_v0, %v7824_v3  ;;  %v8066_v54 = vpack.c.bf16 %v2104_v52, %v2096_v53  ;;  %v2027_v29 = vsel %vm8060_vm1, %v7997_v55, %v2023_v12  ;;  %v1917_v50 = vmul.f32 %v8029_v2, %v1916_v31  ;;  %v5673_v7 = vld [vmem:[#allocation5 + $0x3e0] sm:$0xf]  ;;  %v6588_v42 = vld [vmem:[#allocation5 + $0x3e4] sm:$0xf0]  ;;  %v8088_v36 = vld [vmem:[#allocation5 + $0xe4] sm:$0xf] }
 0x209   :  { %v6812_v34 = vpop.eup %6811  ;;  %v2032_v41 = vsel %vm8015_vm13, %v2031_v33, %v2027_v29  ;;  %vm1920_vm2 = vweird.f32 %v8029_v2  ;;  %2940 = vmatpush.bf16.msra.mxu3 %v5378_v22  ;;  %3004 = vmatpush.bf16.msra.mxu0 %v5238_v15  ;;  %v5506_v3 = vor.u32 %v6546_v44, %v5505_v39  ;;  %v5610_v53 = vor.u32 %v6572_v1, %v5609_v57  ;;  %v8090_v63 = vld [vmem:[#allocation5 + $0xe8] sm:$0xf0]  ;;  %v5593_v1 = vld [vmem:[#allocation5 + $0x340] sm:$0xf]  ;;  %v6568_v0 = vld [vmem:[#allocation5 + $0x344] sm:$0xf0] }
 0x20a   :  { %v2105_v61 = vmul.f32 %v2032_v41, %v7878_v27  ;;  %v1918_v60 = vadd.f32 %v8029_v2, %v1917_v50  ;;  %v8077_v55 = vadd.f32 1.0, %v6812_v34  ;;  %v5370_v16 = vor.u32 %v6512_v23, %v5369_v25  ;;  %2928 = vmatmul.bf16.vlgmr.msra.gmra.mxu2 %v8066_v54  ;;  %v8104_v43 = vld [vmem:[#allocation5 + $0x44] sm:$0xf]  ;;  %v5211_v12 = vld [vmem:[#allocation5 + $0x48] sm:$0xf0] }
 0x20b   :  { %v8080_v10 = vpop.eup %6813  ;;  %v1940_v9 = vand.u32 2147483648, %v8027_v28  ;;  %2968 = vmatpush.bf16.msrb.mxu1 %v5506_v3  ;;  %2977 = vmatpush.bf16.msrb.mxu2 %v5610_v53  ;;  %v5230_v30 = vor.u32 %v6475_v58, %v5227_v19  ;;  %v5498_v62 = vor.u32 %v6544_v59, %v5497_v56  ;;  %v5682_v27 = vor.u32 %v6590_v32, %v5681_v18  ;;  %v5665_v22 = vld [vmem:[#allocation5 + $0x3d0] sm:$0xf]  ;;  %v6586_v15 = vld [vmem:[#allocation5 + $0x3d4] sm:$0xf0] }
 0x20c   :  { %v8083_v48 = vpack.c.bf16 %v2105_v61, %v2097_v40  ;;  %vm1919_vm3 = vweird.f32 %v7974_v38  ;;  %v1930_v21 = vmul.f32 %v8080_v10, %v8027_v28  ;;  %vm8098_vm5 = vcmp.eq.f32.partialorder %v1923_v6, 8.507059e+37  ;;  %v8118_v56 = vld [vmem:[#allocation5 + $0xd4] sm:$0xf]  ;;  %v5283_v32 = vld [vmem:[#allocation5 + $0xd8] sm:$0xf0] }
 0x20d   :  { %v6816_v14 = vpop.eup %6815  ;;  %vm8094_vm4 = vmor %vm1919_vm3, %vm1920_vm2  ;;  %v1926_v38 = vor.u32 1.1754944e-38, %v1925_v35  ;;  %v1938_v57 = vand.u32 2147483647, %v8027_v28  ;;  %6817 = vrcp.f32 %v8077_v55  ;;  %2941 = vmatpush.bf16.msra.mxu3 %v5370_v16  ;;  %3005 = vmatpush.bf16.msra.mxu0 %v5230_v30  ;;  %v916_v52 = vperm.slane %v7766_v8, 6  ;;  %v1757_v35 = vpop.f32.mrf.mxu1  ;;  %v5585_v34 = vld [vmem:[#allocation5 + $0x330] sm:$0xf] }
 0x20e   :  { %v1922_v33 = vsel %vm8094_vm4, %v8029_v2, %v1918_v60  ;;  %v1931_v25 = vsub.f32 1.0, %v1930_v21  ;;  %v8109_v23 = vadd.f32 1.0, %v6816_v14  ;;  %v8112_v31 = vor.u32 1.1754944e-38, %v1940_v9  ;;  %v1771_v19 = vpop.f32.mrf.mxu2  ;;  %v6566_v60 = vld [vmem:[#allocation5 + $0x334] sm:$0xf0] }
 0x20f   :  { %2969 = vmatpush.bf16.msrb.mxu1 %v5498_v62  ;;  %v5302_v6 = vor.u32 %v6493_v49, %v5299_v5  ;;  %v5602_v58 = vor.u32 %v6570_v24, %v5601_v37  ;;  %v5222_v13 = vor.u32 %v6473_v26, %v5219_v46  ;;  %vm1934_vm6 = vweird.f32 %v8027_v28  ;;  %v6469_v16 = vld [vmem:[#allocation5 + $0x34] sm:$0xf]  ;;  %v5203_v49 = vld [vmem:[#allocation5 + $0x38] sm:$0xf0]  ;;  %v5657_v30 = vld [vmem:[#allocation5 + $0x3c0] sm:$0xf]  ;;  %v1745_v39 = vpop.f32.mrf.mxu0 }
 0x210   :  { %vm1935_vm7 = vweird.f32 %v8080_v10  ;;  %v2043_v2 = vand.u32 2147483647, %v8077_v55  ;;  %6819 = vrcp.f32 %v8109_v23  ;;  %v917_v40 = vperm.slane %v7766_v8, 7  ;;  %2942 = vmatmul.bf16.vlgmr.msra.gmra.mxu3 %v8083_v48  ;;  %v6584_v21 = vld [vmem:[#allocation5 + $0x3c4] sm:$0xf0] }
 0x211   :  { %2990 = vmatpush.bf16.msrb.mxu3 %v5682_v27  ;;  %v1927_v29 = vsel %vm8098_vm5, %v1926_v38, %v1922_v33  ;;  %v2045_v50 = vand.u32 2147483648, %v8077_v55  ;;  %2978 = vmatpush.bf16.msrb.mxu2 %v5602_v58  ;;  %v5674_v59 = vor.u32 %v6588_v42, %v5673_v7  ;;  %v5294_v18 = vor.u32 %v8088_v36, %v8090_v63  ;;  %v8147_v7 = vld [vmem:[#allocation5 + $0xc4] sm:$0xf]  ;;  %v8153_v63 = vld [vmem:[#allocation5 + $0xc8] sm:$0xf0]  ;;  %vm8189_vm13 = vmor %vm1934_vm6, %vm1935_vm7 }
 0x212   :  { %v1932_v41 = vmul.f32 %v8080_v10, %v1931_v25  ;;  %3006 = vmatpush.bf16.msra.mxu0 %v5222_v13  ;;  %v5594_v3 = vor.u32 %v6568_v0, %v5593_v1  ;;  %v1744_v53 = vadd.f32 %v1743_v20, %v916_v52  ;;  %v5214_v61 = vor.u32 %v8104_v43, %v5211_v12  ;;  %v8155_v14 = vld [vmem:[#allocation5 + $0x320] sm:$0xf]  ;;  %v6564_v25 = vld [vmem:[#allocation5 + $0x324] sm:$0xf0]  ;;  %v6463_v8 = vld [vmem:[#allocation5 + $0x4] sm:$0xf] }
 0x213   :  { %3018 = vmatpush.bf16.msra.mxu1 %v5302_v6  ;;  %v8131_v5 = vpop.eup %6817  ;;  %vm2039_vm12 = vweird.f32 %v8077_v55  ;;  %v2058_v37 = vand.u32 2147483647, %v8109_v23  ;;  %v2060_v24 = vand.u32 2147483648, %v8109_v23  ;;  %v5666_v9 = vor.u32 %v6586_v15, %v5665_v22  ;;  %v1785_v62 = vpop.f32.mrf.mxu3  ;;  %v5195_v22 = vld [vmem:[#allocation5 + $0x28] sm:$0xf0] }
 0x214   :  { %v8137_v27 = vmul.f32 %v1927_v29, %v7880_v47  ;;  %v2035_v26 = vmul.f32 %v8131_v5, %v8077_v55  ;;  %vm8141_vm14 = vcmp.eq.f32.partialorder %v2043_v2, 8.507059e+37  ;;  %v8145_v20 = vadd.f32 %v1757_v35, %v1744_v53  ;;  %v6467_v35 = vld [vmem:[#allocation5 + $0x24] sm:$0xf]  ;;  %v6582_v29 = vld [vmem:[#allocation5 + $0x3b4] sm:$0xf0] }
 0x215   :  { %2991 = vmatpush.bf16.msrb.mxu3 %v5674_v59  ;;  %v8149_v42 = vor.u32 1.1754944e-38, %v2045_v50  ;;  %vm2054_vm8 = vweird.f32 %v8109_v23  ;;  %2979 = vmatpush.bf16.msrb.mxu2 %v5594_v3  ;;  %v5286_v47 = vor.u32 %v8118_v56, %v5283_v32  ;;  %v5586_v36 = vor.u32 %v6566_v60, %v5585_v34  ;;  %v5649_v56 = vld [vmem:[#allocation5 + $0x3b0] sm:$0xf]  ;;  %v8183_v50 = vld [vmem:[#allocation5 + $0xb4] sm:$0xf]  ;;  %v1759_v34 = vpop.f32.mrf.mxu1 }
 0x216   :  { %v8157_v44 = vpop.eup %6819  ;;  %v8160_v38 = vadd.f32 %v8080_v10, %v1932_v41  ;;  %vm8164_vm9 = vcmp.eq.f32.partialorder %v1938_v57, 8.507059e+37  ;;  %v2036_v0 = vsub.f32 1.0, %v2035_v26  ;;  %v5165_v43 = vmul.f32 -1.442695, %v8145_v20  ;;  %3007 = vmatpush.bf16.msra.mxu0 %v5214_v61  ;;  %v5267_v41 = vld [vmem:[#allocation5 + $0xb8] sm:$0xf0]  ;;  %v1773_v53 = vpop.f32.mrf.mxu2 }
 0x217   :  { %3019 = vmatpush.bf16.msra.mxu1 %v5294_v18  ;;  %v5206_v33 = vor.u32 %v6469_v16, %v5203_v49  ;;  %v2050_v12 = vmul.f32 %v8157_v44, %v8109_v23  ;;  %vm8171_vm10 = vcmp.eq.f32.partialorder %v2058_v37, 8.507059e+37  ;;  %v8175_v58 = vor.u32 1.1754944e-38, %v2060_v24  ;;  %v5569_v3 = vld [vmem:[#allocation5 + $0x310] sm:$0xf]  ;;  %v6562_v49 = vld [vmem:[#allocation5 + $0x314] sm:$0xf0] }
 0x218   :  { %v5658_v57 = vor.u32 %v6584_v21, %v5657_v30  ;;  %v1772_v13 = vadd.f32 %v1771_v19, %v917_v40  ;;  %v2037_v15 = vmul.f32 %v8131_v5, %v2036_v0  ;;  %vm2040_vm11 = vweird.f32 %v8131_v5  ;;  %v6465_v37 = vld [vmem:[#allocation5 + $0x14] sm:$0xf]  ;;  %v5187_v24 = vld [vmem:[#allocation5 + $0x18] sm:$0xf0]  ;;  %v5641_v26 = vld [vmem:[#allocation5 + $0x3a0] sm:$0xf] }
 0x219   :  { %2992 = vmatpush.bf16.msrb.mxu3 %v5666_v9  ;;  %6821 = vpow2.f32 %v5165_v43  ;;  %v1746_v2 = vadd.f32 %v1745_v39, %v916_v52  ;;  %v2051_v59 = vsub.f32 1.0, %v2050_v12  ;;  %2980 = vmatpush.bf16.msrb.mxu2 %v5586_v36  ;;  %v5278_v52 = vor.u32 %v8147_v7, %v8153_v63  ;;  %vm8209_vm15 = vmor %vm2039_vm12, %vm2040_vm11  ;;  %v6580_v21 = vld [vmem:[#allocation5 + $0x3a4] sm:$0xf0]  ;;  %v8223_v63 = vld [vmem:[#allocation5 + $0xa4] sm:$0xf] }
 0x21a   :  { %v8193_v18 = vadd.f32 %v1785_v62, %v1772_v13  ;;  %v5578_v32 = vor.u32 %v6564_v25, %v8155_v14  ;;  %v1937_v28 = vsel %vm8189_vm13, %v8080_v10, %v8160_v38  ;;  %v2038_v61 = vadd.f32 %v8131_v5, %v2037_v15  ;;  %3008 = vmatpush.bf16.msra.mxu0 %v5206_v33  ;;  %v8225_v14 = vld [vmem:[#allocation5 + $0xa8] sm:$0xf0]  ;;  %v8227_v39 = vld [vmem:[#allocation5 + $0x300] sm:$0xf]  ;;  %v6560_v33 = vld [vmem:[#allocation5 + $0x304] sm:$0xf0] }
 0x21b   :  { %3020 = vmatpush.bf16.msra.mxu1 %v5286_v47  ;;  %v8203_v60 = vadd.f32 %v1759_v34, %v1746_v2  ;;  %v5198_v16 = vor.u32 %v6467_v35, %v5195_v22  ;;  %v2052_v30 = vmul.f32 %v8157_v44, %v2051_v59  ;;  %vm2055_vm0 = vweird.f32 %v8157_v44  ;;  %v1787_v43 = vpop.f32.mrf.mxu3  ;;  %v6509_v13 = vld [vmem:[#allocation5 + $0x174] sm:$0xf]  ;;  %v5363_v35 = vld [vmem:[#allocation5 + $0x178] sm:$0xf0]  ;;  %v5633_v2 = vld [vmem:[#allocation5 + $0x390] sm:$0xf] }
 0x21c   :  { %v5166_v10 = vmul.f32 -1.442695, %v8193_v18  ;;  %v5650_v62 = vor.u32 %v6582_v29, %v5649_v56  ;;  %v2042_v7 = vsel %vm8209_vm15, %v8131_v5, %v2038_v61  ;;  %v5270_v47 = vor.u32 %v8183_v50, %v5267_v41  ;;  %vm8238_vm1 = vmor %vm2054_vm8, %vm2055_vm0  ;;  %v6578_v56 = vld [vmem:[#allocation5 + $0x394] sm:$0xf0]  ;;  %v5491_v19 = vld [vmem:[#allocation5 + $0x278] sm:$0xf0] }
 0x21d   :  { %2993 = vmatpush.bf16.msrb.mxu3 %v5658_v57  ;;  %v5173_v55 = vmul.f32 -1.442695, %v8203_v60  ;;  %v1774_v36 = vadd.f32 %v1773_v53, %v917_v40  ;;  %v2047_v38 = vsel %vm8141_vm14, %v8149_v42, %v2042_v7  ;;  %v2053_v0 = vadd.f32 %v8157_v44, %v2052_v30  ;;  %2981 = vmatpush.bf16.msrb.mxu2 %v5578_v32  ;;  %v5179_v40 = vld [vmem:[#allocation5 + $0x8] sm:$0xf0]  ;;  %v5251_v32 = vld [vmem:[#allocation5 + $0x98] sm:$0xf0] }
 0x21e   :  { %6823 = vpow2.f32 %v5166_v10  ;;  %v5570_v5 = vor.u32 %v6562_v49, %v5569_v3  ;;  %v2106_v12 = vmul.f32 %v2047_v38, %v7995_v45  ;;  %3009 = vmatpush.bf16.msra.mxu0 %v5198_v16  ;;  %v5190_v42 = vor.u32 %v6465_v37, %v5187_v24  ;;  %v6507_v41 = vld [vmem:[#allocation5 + $0x164] sm:$0xf]  ;;  %v5355_v3 = vld [vmem:[#allocation5 + $0x168] sm:$0xf0]  ;;  %v6576_v16 = vld [vmem:[#allocation5 + $0x384] sm:$0xf0] }
 0x21f   :  { %3021 = vmatpush.bf16.msra.mxu1 %v5278_v52  ;;  %v6822_v25 = vpop.eup %6821  ;;  %6825 = vpow2.f32 %v5173_v55  ;;  %v8242_v57 = vadd.f32 %v1787_v43, %v1774_v36  ;;  %v1942_v22 = vsel %vm8164_vm9, %v8112_v31, %v1937_v28  ;;  %v2057_v45 = vsel %vm8238_vm1, %v8157_v44, %v2053_v0  ;;  %v6541_v31 = vld [vmem:[#allocation5 + $0x274] sm:$0xf]  ;;  %v6539_v49 = vld [vmem:[#allocation5 + $0x264] sm:$0xf]  ;;  %v5483_v37 = vld [vmem:[#allocation5 + $0x268] sm:$0xf0] }
 0x220   :  { %v8250_v23 = vadd.f32 1.0, %v6822_v25  ;;  %v5642_v15 = vor.u32 %v6580_v21, %v5641_v26  ;;  %v8253_v29 = vpack.c.bf16 %v2106_v12, %v8137_v27  ;;  %v2062_v50 = vsel %vm8171_vm10, %v8175_v58, %v2057_v45  ;;  %v6481_v52 = vld [vmem:[#allocation5 + $0x94] sm:$0xf]  ;;  %v8270_v30 = vld [vmem:[#allocation5 + $0x84] sm:$0xf] }
 0x221   :  { %2994 = vmatpush.bf16.msrb.mxu3 %v5650_v62  ;;  %v5174_v1 = vmul.f32 -1.442695, %v8242_v57  ;;  %v2107_v59 = vmul.f32 %v2062_v50, %v8021_v51  ;;  %2982 = vmatpush.bf16.msrb.mxu2 %v5570_v5  ;;  %v5262_v44 = vor.u32 %v8223_v63, %v8225_v14  ;;  %v5562_v27 = vor.u32 %v6560_v33, %v8227_v39  ;;  %v5625_v51 = vld [vmem:[#allocation5 + $0x380] sm:$0xf]  ;;  %v5243_v10 = vld [vmem:[#allocation5 + $0x88] sm:$0xf0] }
 0x222   :  { %6827 = vrcp.f32 %v8250_v23  ;;  %v2099_v6 = vmul.f32 %v1942_v22, %v7923_v11  ;;  %3010 = vmatpush.bf16.msra.mxu0 %v5190_v42  ;;  %v5182_v58 = vor.u32 %v6463_v8, %v5179_v40  ;;  %v5366_v34 = vor.u32 %v6509_v13, %v5363_v35  ;;  %v6525_v62 = vld [vmem:[#allocation5 + $0x1f4] sm:$0xf]  ;;  %v5427_v7 = vld [vmem:[#allocation5 + $0x1f8] sm:$0xf0]  ;;  %v6523_v33 = vld [vmem:[#allocation5 + $0x1e4] sm:$0xf] }
 0x223   :  { %3022 = vmatpush.bf16.msra.mxu1 %v5270_v47  ;;  %6829 = vpow2.f32 %v5174_v1  ;;  %2956 = vmatmul.bf16.vlgmr.msrb.gmra.mxu0 %v8253_v29  ;;  %v5634_v28 = vor.u32 %v6578_v56, %v5633_v2  ;;  %v5494_v61 = vor.u32 %v6541_v31, %v5491_v19  ;;  %v5254_v21 = vor.u32 %v6481_v52, %v5251_v32  ;;  %v6557_v55 = vld [vmem:[#allocation5 + $0x2f4] sm:$0xf]  ;;  %v5555_v36 = vld [vmem:[#allocation5 + $0x2f8] sm:$0xf0]  ;;  %v5419_v42 = vld [vmem:[#allocation5 + $0x1e8] sm:$0xf0] }
 0x224   :  { %v6824_v53 = vpop.eup %6823  ;;  %v8266_v9 = vpack.c.bf16 %v2107_v59, %v2099_v6  ;;  %v5358_v47 = vor.u32 %v6507_v41, %v5355_v3  ;;  %v6505_v63 = vld [vmem:[#allocation5 + $0x154] sm:$0xf]  ;;  %v5347_v14 = vld [vmem:[#allocation5 + $0x158] sm:$0xf0]  ;;  %v5626_v38 = vor.u32 %v6576_v16, %v5625_v51  ;;  %v5486_v0 = vor.u32 %v6539_v49, %v5483_v37  ;;  %v8286_v22 = vld [vmem:[#allocation5 + $0x2e4] sm:$0xf] }
 0x225   :  { %2995 = vmatpush.bf16.msrb.mxu3 %v5642_v15  ;;  %v6826_v24 = vpop.eup %6825  ;;  %v8268_v11 = vadd.f32 1.0, %v6824_v53  ;;  %2983 = vmatpush.bf16.msrb.mxu2 %v5562_v27  ;;  %v6537_v5 = vld [vmem:[#allocation5 + $0x254] sm:$0xf]  ;;  %v5475_v43 = vld [vmem:[#allocation5 + $0x258] sm:$0xf0]  ;;  %v1955_v12 = vand.u32 2147483648, %v8250_v23  ;;  %v5430_v46 = vor.u32 %v6525_v62, %v5427_v7  ;;  %v5246_v35 = vor.u32 %v8270_v30, %v5243_v10 }
 0x226   :  { %v8272_v26 = vadd.f32 1.0, %v6826_v24  ;;  %3011 = vmatpush.bf16.msra.mxu0 %v5182_v58  ;;  %v1953_v25 = vand.u32 2147483647, %v8250_v23  ;;  %2970 = vmatmul.bf16.vlgmr.msrb.gmra.mxu1 %v8266_v9  ;;  %v8288_v45 = vld [vmem:[#allocation5 + $0x2e8] sm:$0xf0]  ;;  %v5558_v2 = vor.u32 %v6557_v55, %v5555_v36  ;;  %v5350_v56 = vor.u32 %v6505_v63, %v5347_v14 }
 0x227   :  { %3023 = vmatpush.bf16.msra.mxu1 %v5262_v44  ;;  %6831 = vrcp.f32 %v8268_v11  ;;  %v6503_v50 = vld [vmem:[#allocation5 + $0x144] sm:$0xf]  ;;  %v5339_v1 = vld [vmem:[#allocation5 + $0x148] sm:$0xf0]  ;;  %vm1949_vm2 = vweird.f32 %v8250_v23  ;;  %v5478_v31 = vor.u32 %v6537_v5, %v5475_v43  ;;  %v8292_v44 = vld [vmem:[#allocation5 + $0x1d4] sm:$0xf]  ;;  %vm1964_vm4 = vweird.f32 %v8268_v11 }
 0x228   :  { %v8275_v39 = vpop.eup %6827  ;;  %6833 = vrcp.f32 %v8272_v26  ;;  %v6535_v19 = vld [vmem:[#allocation5 + $0x244] sm:$0xf]  ;;  %v5467_v59 = vld [vmem:[#allocation5 + $0x248] sm:$0xf0]  ;;  %vm8297_vm3 = vcmp.eq.f32.partialorder %v1953_v25, 8.507059e+37  ;;  %v8301_v6 = vor.u32 1.1754944e-38, %v1955_v12  ;;  %v5342_v24 = vor.u32 %v6503_v50, %v5339_v1 }
 0x229   :  { %3032 = vmatpush.bf16.msra.mxu2 %v5366_v34  ;;  %2996 = vmatpush.bf16.msrb.mxu3 %v5634_v28  ;;  %v6830_v8 = vpop.eup %6829  ;;  %v1945_v40 = vmul.f32 %v8275_v39, %v8250_v23  ;;  %v1968_v58 = vand.u32 2147483647, %v8268_v11  ;;  %v5422_v34 = vor.u32 %v6523_v33, %v5419_v42  ;;  %v5411_v41 = vld [vmem:[#allocation5 + $0x1d8] sm:$0xf0]  ;;  %v1970_v53 = vand.u32 2147483648, %v8268_v11 }
 0x22a   :  { %3060 = vmatpush.bf16.msrb.mxu0 %v5494_v61  ;;  %v8283_v13 = vadd.f32 1.0, %v6830_v8  ;;  %v5550_v28 = vor.u32 %v8286_v22, %v8288_v45  ;;  %v8312_v61 = vld [vmem:[#allocation5 + $0x2d4] sm:$0xf]  ;;  %v8314_v16 = vld [vmem:[#allocation5 + $0x2d8] sm:$0xf0]  ;;  %vm1950_vm5 = vweird.f32 %v8275_v39  ;;  %v2075_v55 = vand.u32 2147483648, %v8272_v26 }
 0x22b   :  { %3024 = vmatpush.bf16.msra.mxu1 %v5254_v21  ;;  %v1946_v15 = vsub.f32 1.0, %v1945_v40  ;;  %v6501_v30 = vld [vmem:[#allocation5 + $0x134] sm:$0xf]  ;;  %v5331_v10 = vld [vmem:[#allocation5 + $0x138] sm:$0xf0]  ;;  %vm8322_vm6 = vcmp.eq.f32.partialorder %v1968_v58, 8.507059e+37  ;;  %vm2069_vm7 = vweird.f32 %v8272_v26  ;;  %vm8334_vm12 = vmor %vm1949_vm2, %vm1950_vm5  ;;  %v5542_v40 = vor.u32 %v8312_v61, %v8314_v16 }
 0x22c   :  { %6835 = vrcp.f32 %v8283_v13  ;;  %v6533_v62 = vld [vmem:[#allocation5 + $0x234] sm:$0xf]  ;;  %v2073_v7 = vand.u32 2147483647, %v8272_v26  ;;  %v5459_v36 = vld [vmem:[#allocation5 + $0x238] sm:$0xf0]  ;;  %v5334_v25 = vor.u32 %v6501_v30, %v5331_v10  ;;  %vm2084_vm15 = vweird.f32 %v8283_v13 }
 0x22d   :  { %3033 = vmatpush.bf16.msra.mxu2 %v5358_v47  ;;  %2997 = vmatpush.bf16.msrb.mxu3 %v5626_v38  ;;  %v8294_v27 = vpop.eup %6831  ;;  %v1947_v52 = vmul.f32 %v8275_v39, %v1946_v15  ;;  %v5470_v47 = vor.u32 %v6535_v19, %v5467_v59  ;;  %v5414_v38 = vor.u32 %v8292_v44, %v5411_v41  ;;  %v5403_v5 = vld [vmem:[#allocation5 + $0x1c8] sm:$0xf0]  ;;  %v8342_v12 = vld [vmem:[#allocation5 + $0x2c4] sm:$0xf]  ;;  %v2076_v50 = vor.u32 1.1754944e-38, %v2075_v55 }
 0x22e   :  { %3061 = vmatpush.bf16.msrb.mxu0 %v5486_v0  ;;  %v8304_v3 = vpop.eup %6833  ;;  %v1960_v51 = vmul.f32 %v8294_v27, %v8268_v11  ;;  %v6519_v0 = vld [vmem:[#allocation5 + $0x1c4] sm:$0xf]  ;;  %vm1965_vm14 = vweird.f32 %v8294_v27  ;;  %v5323_v45 = vld [vmem:[#allocation5 + $0x128] sm:$0xf0]  ;;  %vm8354_vm9 = vcmp.eq.f32.partialorder %v2073_v7, 8.507059e+37 }
 0x22f   :  { %3025 = vmatpush.bf16.msra.mxu1 %v5246_v35  ;;  %v1948_v49 = vadd.f32 %v8275_v39, %v1947_v52  ;;  %v2065_v37 = vmul.f32 %v8304_v3, %v8272_v26  ;;  %vm2070_vm8 = vweird.f32 %v8304_v3  ;;  %v6499_v22 = vld [vmem:[#allocation5 + $0x124] sm:$0xf]  ;;  %v5451_v1 = vld [vmem:[#allocation5 + $0x228] sm:$0xf0]  ;;  %vm8362_vm10 = vmor %vm1964_vm4, %vm1965_vm14  ;;  %v2088_v52 = vand.u32 2147483647, %v8283_v13 }
 0x230   :  { %v1961_v21 = vsub.f32 1.0, %v1960_v51  ;;  %v6531_v15 = vld [vmem:[#allocation5 + $0x224] sm:$0xf]  ;;  %v5406_v58 = vor.u32 %v6519_v0, %v5403_v5  ;;  %vm2071_vm11 = vmor %vm2069_vm7, %vm2070_vm8  ;;  %v2090_v51 = vand.u32 2147483648, %v8283_v13  ;;  %v5326_v61 = vor.u32 %v6499_v22, %v5323_v45  ;;  %v6549_v26 = vld [vmem:[#allocation5 + $0x2b4] sm:$0xf] }
 0x231   :  { %3046 = vmatpush.bf16.msra.mxu3 %v5430_v46  ;;  %3034 = vmatpush.bf16.msra.mxu2 %v5350_v56  ;;  %v2066_v14 = vsub.f32 1.0, %v2065_v37  ;;  %v8344_v46 = vld [vmem:[#allocation5 + $0x2c8] sm:$0xf0]  ;;  %v1952_v23 = vsel %vm8334_vm12, %v8275_v39, %v1948_v49  ;;  %v5462_v39 = vor.u32 %v6533_v62, %v5459_v36  ;;  %v1971_v49 = vor.u32 1.1754944e-38, %v1970_v53  ;;  %v5315_v10 = vld [vmem:[#allocation5 + $0x118] sm:$0xf0] }
 0x232   :  { %3062 = vmatpush.bf16.msrb.mxu0 %v5478_v31  ;;  %v8328_v43 = vpop.eup %6835  ;;  %v1962_v8 = vmul.f32 %v8294_v27, %v1961_v21  ;;  %v6517_v31 = vld [vmem:[#allocation5 + $0x1b4] sm:$0xf]  ;;  %v1957_v41 = vsel %vm8297_vm3, %v8301_v6, %v1952_v23  ;;  %v5523_v6 = vld [vmem:[#allocation5 + $0x2b8] sm:$0xf0]  ;;  %v6515_v7 = vld [vmem:[#allocation5 + $0x1a4] sm:$0xf] }
 0x233   :  { %3074 = vmatpush.bf16.msrb.mxu1 %v5558_v2  ;;  %v2067_v42 = vmul.f32 %v8304_v3, %v2066_v14  ;;  %v2080_v35 = vmul.f32 %v8328_v43, %v8283_v13  ;;  %3012 = vmatmul.bf16.vlgmr.msra.gmra.mxu0 %v7927_v17  ;;  %vm2085_vm13 = vweird.f32 %v8328_v43  ;;  %v6529_v11 = vld [vmem:[#allocation5 + $0x214] sm:$0xf]  ;;  %v5443_v53 = vld [vmem:[#allocation5 + $0x218] sm:$0xf0]  ;;  %v5387_v36 = vld [vmem:[#allocation5 + $0x1a8] sm:$0xf0] }
 0x234   :  { %v1963_v2 = vadd.f32 %v8294_v27, %v1962_v8  ;;  %vm2086_vm0 = vmor %vm2084_vm15, %vm2085_vm13  ;;  %vm2089_vm1 = vcmp.eq.f32.partialorder %v2088_v52, 8.507059e+37  ;;  %v6495_v0 = vld [vmem:[#allocation5 + $0x104] sm:$0xf]  ;;  %v5446_v63 = vor.u32 %v6529_v11, %v5443_v53  ;;  %v5307_v33 = vld [vmem:[#allocation5 + $0x108] sm:$0xf0] }
 0x235   :  { %3047 = vmatpush.bf16.msra.mxu3 %v5422_v34  ;;  %3035 = vmatpush.bf16.msra.mxu2 %v5342_v24  ;;  %v2068_v59 = vadd.f32 %v8304_v3, %v2067_v42  ;;  %v2081_v44 = vsub.f32 1.0, %v2080_v35  ;;  %v5395_v34 = vld [vmem:[#allocation5 + $0x1b8] sm:$0xf0]  ;;  %v5454_v24 = vor.u32 %v6531_v15, %v5451_v1  ;;  %v6527_v8 = vld [vmem:[#allocation5 + $0x204] sm:$0xf]  ;;  %v5310_v56 = vor.u32 %v6495_v0, %v5307_v33  ;;  %v8406_v1 = vpop.permute.xlu1 %3124 }
 0x236   :  { %3063 = vmatpush.bf16.msrb.mxu0 %v5470_v47  ;;  %v1967_v17 = vsel %vm8362_vm10, %v8294_v27, %v1963_v2  ;;  %v5398_v30 = vor.u32 %v6517_v31, %v5395_v34  ;;  %v6497_v27 = vld [vmem:[#allocation5 + $0x114] sm:$0xf]  ;;  %3026 = vmatmul.bf16.vlgmr.msra.gmra.mxu1 %v7963_v4  ;;  %v2091_v47 = vor.u32 1.1754944e-38, %v2090_v51  ;;  %v5619_v23 = vld [vmem:[#allocation5 + $0x378] sm:$0xf0]  ;;  %vm3129_vm4 = vcmp.eq.s32.totalorder %v8406_v1, 1 }
 0x237   :  { %3075 = vmatpush.bf16.msrb.mxu1 %v5550_v28  ;;  %v5534_v28 = vor.u32 %v8342_v12, %v8344_v46  ;;  %v2072_v16 = vsel %vm2071_vm11, %v8304_v3, %v2068_v59  ;;  %v2082_v32 = vmul.f32 %v8328_v43, %v2081_v44  ;;  %v2100_v3 = vmul.f32 %v1957_v41, %v8145_v20  ;;  %v6513_v42 = vld [vmem:[#allocation5 + $0x194] sm:$0xf]  ;;  %v5379_v35 = vld [vmem:[#allocation5 + $0x198] sm:$0xf0]  ;;  %v5801_v22 = vld [vmem:[#allocation8 + $0xe0] sm:$0xf] }
 0x238   :  { %v2077_v37 = vsel %vm8354_vm9, %v2076_v50, %v2072_v16  ;;  %v1972_v55 = vsel %vm8322_vm6, %v1971_v49, %v1967_v17  ;;  %v5526_v20 = vor.u32 %v6549_v26, %v5523_v6  ;;  %v5318_v4 = vor.u32 %v6497_v27, %v5315_v10  ;;  %v6685_v45 = vld [vmem:[#allocation8 + $0xec] sm:$0xf0]  ;;  %v6571_v59 = vld [vmem:[#allocation5 + $0x364] sm:$0xf]  ;;  %v5611_v44 = vld [vmem:[#allocation5 + $0x368] sm:$0xf0] }
 0x239   :  { %3048 = vmatpush.bf16.msra.mxu3 %v5414_v38  ;;  %3036 = vmatpush.bf16.msra.mxu2 %v5334_v25  ;;  %v2108_v62 = vmul.f32 %v2077_v37, %v8203_v60  ;;  %v2083_v21 = vadd.f32 %v8328_v43, %v2082_v32  ;;  %v6547_v60 = vld [vmem:[#allocation5 + $0x2a4] sm:$0xf]  ;;  %v5515_v38 = vld [vmem:[#allocation5 + $0x2a8] sm:$0xf0]  ;;  %v2101_v25 = vmul.f32 %v1972_v55, %v8193_v18  ;;  %v5785_v34 = vld [vmem:[#allocation8 + $0xc0] sm:$0xf] }
 0x23a   :  { %3064 = vmatpush.bf16.msrb.mxu0 %v5462_v39  ;;  %v5390_v46 = vor.u32 %v6515_v7, %v5387_v36  ;;  %v5518_v2 = vor.u32 %v6547_v60, %v5515_v38  ;;  %v5507_v39 = vld [vmem:[#allocation5 + $0x298] sm:$0xf0]  ;;  %v5382_v31 = vor.u32 %v6513_v42, %v5379_v35  ;;  %v5802_v19 = vor.u32 %v6685_v45, %v5801_v22  ;;  %v6511_v52 = vld [vmem:[#allocation5 + $0x184] sm:$0xf]  ;;  %v6681_v41 = vld [vmem:[#allocation8 + $0xcc] sm:$0xf0]  ;;  %v8414_v22 = vpop.permute.xlu0 %3154 }
 0x23b   :  { %3076 = vmatpush.bf16.msrb.mxu1 %v5542_v40  ;;  %v8398_v14 = vpack.c.bf16 %v2108_v62, %v2100_v3  ;;  %v2087_v13 = vsel %vm2086_vm0, %v8328_v43, %v2083_v21  ;;  %v5435_v40 = vld [vmem:[#allocation5 + $0x208] sm:$0xf0]  ;;  %v6573_v43 = vld [vmem:[#allocation5 + $0x374] sm:$0xf]  ;;  %v5614_v17 = vor.u32 %v6571_v59, %v5611_v44  ;;  %v6543_v16 = vld [vmem:[#allocation5 + $0x284] sm:$0xf]  ;;  %v5786_v49 = vor.u32 %v6681_v41, %v5785_v34  ;;  %v8409_v62 = vpop.permute.xlu2 %3139 }
 0x23c   :  { %v2092_v5 = vsel %vm2089_vm1, %v2091_v47, %v2087_v13  ;;  %v5438_v18 = vor.u32 %v6527_v8, %v5435_v40  ;;  %v5622_v50 = vor.u32 %v6573_v43, %v5619_v23  ;;  %v5499_v32 = vld [vmem:[#allocation5 + $0x288] sm:$0xf0]  ;;  %v6683_v26 = vld [vmem:[#allocation8 + $0xe4] sm:$0xf]  ;;  %v5803_v37 = vld [vmem:[#allocation8 + $0xf0] sm:$0xf0] }
 0x23d   :  { %3049 = vmatpush.bf16.msra.mxu3 %v5406_v58  ;;  %3037 = vmatpush.bf16.msra.mxu2 %v5326_v61  ;;  %v2109_v12 = vmul.f32 %v2092_v5, %v8242_v57  ;;  %v6545_v57 = vld [vmem:[#allocation5 + $0x294] sm:$0xf]  ;;  %v5371_v58 = vld [vmem:[#allocation5 + $0x188] sm:$0xf0]  ;;  %v5683_v61 = vld [vmem:[#allocation5 + $0x3f8] sm:$0xf0]  ;;  %v5502_v21 = vor.u32 %v6543_v16, %v5499_v32  ;;  %v5806_v7 = vor.u32 %v6683_v26, %v5803_v37  ;;  %v3128_v5 = vpop.permute.xlu1 %3127 }
 0x23e   :  { %3065 = vmatpush.bf16.msrb.mxu0 %v5454_v24  ;;  %2984 = vmatmul.bf16.vlgmr.msrb.gmra.mxu2 %v8398_v14  ;;  %v5510_v51 = vor.u32 %v6545_v57, %v5507_v39  ;;  %v5374_v6 = vor.u32 %v6511_v52, %v5371_v58  ;;  %v6569_v24 = vld [vmem:[#allocation5 + $0x354] sm:$0xf]  ;;  %v5769_v10 = vld [vmem:[#allocation8 + $0xa0] sm:$0xf]  ;;  %v6677_v3 = vld [vmem:[#allocation8 + $0xac] sm:$0xf0] }
 0x23f   :  { %3077 = vmatpush.bf16.msrb.mxu1 %v5534_v28  ;;  %v8404_v15 = vpack.c.bf16 %v2109_v12, %v2101_v25  ;;  %v6589_v28 = vld [vmem:[#allocation5 + $0x3f4] sm:$0xf]  ;;  %v6587_v11 = vld [vmem:[#allocation5 + $0x3e4] sm:$0xf]  ;;  %v5675_v53 = vld [vmem:[#allocation5 + $0x3e8] sm:$0xf0] }
 0x240   :  { %v5686_v27 = vor.u32 %v6589_v28, %v5683_v61  ;;  %v6679_v47 = vld [vmem:[#allocation8 + $0xc4] sm:$0xf]  ;;  %v5787_v36 = vld [vmem:[#allocation8 + $0xd0] sm:$0xf0]  ;;  %v5595_v13 = vld [vmem:[#allocation5 + $0x348] sm:$0xf0] }
 0x241   :  { %3050 = vmatpush.bf16.msra.mxu3 %v5398_v30  ;;  %3038 = vmatpush.bf16.msra.mxu2 %v5318_v4  ;;  %v5603_v30 = vld [vmem:[#allocation5 + $0x358] sm:$0xf0]  ;;  %v6567_v60 = vld [vmem:[#allocation5 + $0x344] sm:$0xf]  ;;  %v5678_v4 = vor.u32 %v6587_v11, %v5675_v53  ;;  %v5753_v38 = vld [vmem:[#allocation8 + $0x80] sm:$0xf]  ;;  %v5790_v33 = vor.u32 %v6679_v47, %v5787_v36 }
 0x242   :  { %3066 = vmatpush.bf16.msrb.mxu0 %v5446_v63  ;;  %2998 = vmatmul.bf16.vlgmr.msrb.gmra.mxu3 %v8404_v15  ;;  %v5606_v55 = vor.u32 %v6569_v24, %v5603_v30  ;;  %v6673_v0 = vld [vmem:[#allocation8 + $0x8c] sm:$0xf0]  ;;  %v5667_v63 = vld [vmem:[#allocation5 + $0x3d8] sm:$0xf0]  ;;  %v5598_v8 = vor.u32 %v6567_v60, %v5595_v13  ;;  %v6675_v40 = vld [vmem:[#allocation8 + $0xa4] sm:$0xf] }
 0x243   :  { %3078 = vmatpush.bf16.msrb.mxu1 %v5526_v20  ;;  %v5770_v20 = vor.u32 %v6677_v3, %v5769_v10  ;;  %v5754_v25 = vor.u32 %v6673_v0, %v5753_v38  ;;  %v5771_v12 = vld [vmem:[#allocation8 + $0xb0] sm:$0xf0]  ;;  %v5587_v43 = vld [vmem:[#allocation5 + $0x338] sm:$0xf0]  ;;  %v5737_v42 = vld [vmem:[#allocation8 + $0x60] sm:$0xf]  ;;  %v3143_v57 = vpop.permute.xlu2 %3142 }
 0x244   :  { %v6669_v35 = vld [vmem:[#allocation8 + $0x6c] sm:$0xf0]  ;;  %v6583_v45 = vld [vmem:[#allocation5 + $0x3c4] sm:$0xf]  ;;  %v5755_v39 = vld [vmem:[#allocation8 + $0x90] sm:$0xf0] }
 0x245   :  { %3051 = vmatpush.bf16.msra.mxu3 %v5390_v46  ;;  %3039 = vmatpush.bf16.msra.mxu2 %v5310_v56  ;;  %v6565_v46 = vld [vmem:[#allocation5 + $0x334] sm:$0xf]  ;;  %v8419_v56 = vld [vmem:[%s8748_s8] sm:$0xf]  ;;  %v6665_v52 = vld [vmem:[#allocation8 + $0x4c] sm:$0xf0] }
 0x246   :  { %3067 = vmatpush.bf16.msrb.mxu0 %v5438_v18  ;;  %v5590_v18 = vor.u32 %v6565_v46, %v5587_v43  ;;  %v5721_v44 = vld [vmem:[#allocation8 + $0x40] sm:$0xf]  ;;  %v3131_v58 = vperm.slane %v8419_v56, 0  ;;  %vm3130_vm2 = vcmp.eq.s32.totalorder %v3128_v5, 1  ;;  %v6581_v34 = vld [vmem:[#allocation5 + $0x3b4] sm:$0xf] }
 0x247   :  { %3079 = vmatpush.bf16.msrb.mxu1 %v5518_v2  ;;  %v5659_v2 = vld [vmem:[#allocation5 + $0x3c8] sm:$0xf0]  ;;  %v5651_v41 = vld [vmem:[#allocation5 + $0x3b8] sm:$0xf0]  ;;  %vm3144_vm3 = vcmp.eq.s32.totalorder %v8409_v62, 1  ;;  %v5722_v16 = vor.u32 %v6665_v52, %v5721_v44  ;;  %vm3145_vm5 = vcmp.eq.s32.totalorder %v3143_v57, 1 }
 0x248   :  { %v5662_v59 = vor.u32 %v6583_v45, %v5659_v2  ;;  %v6667_v61 = vld [vmem:[#allocation8 + $0x64] sm:$0xf]  ;;  %v5739_v32 = vld [vmem:[#allocation8 + $0x70] sm:$0xf0]  ;;  %v5705_v37 = vld [vmem:[#allocation8 + $0x20] sm:$0xf] }
 0x249   :  { %3088 = vmatpush.bf16.msrb.mxu2 %v5622_v50  ;;  %3052 = vmatpush.bf16.msra.mxu3 %v5382_v31  ;;  %v6671_v50 = vld [vmem:[#allocation8 + $0x84] sm:$0xf]  ;;  %v6561_v26 = vld [vmem:[#allocation5 + $0x314] sm:$0xf]  ;;  %v6661_v24 = vld [vmem:[#allocation8 + $0x2c] sm:$0xf0]  ;;  %v5742_v11 = vor.u32 %v6667_v61, %v5739_v32 }
 0x24a   :  { %3438 = vmatpush.bf16.msra.mxu0 %v5802_v19  ;;  %v6563_v31 = vld [vmem:[#allocation5 + $0x324] sm:$0xf]  ;;  %v5579_v19 = vld [vmem:[#allocation5 + $0x328] sm:$0xf0]  ;;  %v3146_v30 = vperm.slane %v8419_v56, 1  ;;  %v5706_v36 = vor.u32 %v6661_v24, %v5705_v37  ;;  %vm3159_vm7 = vcmp.eq.s32.totalorder %v8414_v22, 1 }
 0x24b   :  { %3080 = vmatpush.bf16.msrb.mxu1 %v5510_v51  ;;  %3068 = vmatmul.bf16.vlgmr.msrb.gmra.mxu0 %v8253_v29  ;;  %v6585_v29 = vld [vmem:[#allocation5 + $0x3d4] sm:$0xf]  ;;  %v5758_v51 = vor.u32 %v6671_v50, %v5755_v39  ;;  %v5582_v28 = vor.u32 %v6563_v31, %v5579_v19  ;;  %v6579_v10 = vld [vmem:[#allocation5 + $0x3a4] sm:$0xf]  ;;  %v5643_v3 = vld [vmem:[#allocation5 + $0x3a8] sm:$0xf0] }
 0x24c   :  { %v5670_v23 = vor.u32 %v6585_v29, %v5667_v63  ;;  %v6559_v60 = vld [vmem:[#allocation5 + $0x304] sm:$0xf]  ;;  %v5563_v13 = vld [vmem:[#allocation5 + $0x308] sm:$0xf0]  ;;  %v5689_v1 = vld [vmem:[#allocation8] sm:$0xf]  ;;  %v3170_v63 = vpop.permute.xlu2 %3169 }
 0x24d   :  { %3089 = vmatpush.bf16.msrb.mxu2 %v5614_v17  ;;  %3053 = vmatpush.bf16.msra.mxu3 %v5374_v6  ;;  %v3158_v17 = vpop.permute.xlu1 %3157  ;;  %v5571_v6 = vld [vmem:[#allocation5 + $0x318] sm:$0xf0]  ;;  %v6657_v38 = vld [vmem:[#allocation8 + $0xc] sm:$0xf0]  ;;  %v5809_v0 = vld [vmem:[#allocation8 + $0xe8] sm:$0xf] }
 0x24e   :  { %3439 = vmatpush.bf16.msra.mxu0 %v5786_v49  ;;  %3040 = vmatmul.bf16.vlgmr.msra.gmra.mxu2 %v8066_v54  ;;  %v5774_v54 = vor.u32 %v6675_v40, %v5771_v12  ;;  %v5654_v49 = vor.u32 %v6581_v34, %v5651_v41  ;;  %vm3160_vm6 = vcmp.eq.s32.totalorder %v3158_v17, 1  ;;  %v5574_v53 = vor.u32 %v6561_v26, %v5571_v6  ;;  %v6686_v5 = vld [vmem:[#allocation8 + $0xf4] sm:$0xf0]  ;;  %v5707_v62 = vld [vmem:[#allocation8 + $0x30] sm:$0xf0] }
 0x24f   :  { %3081 = vmatpush.bf16.msrb.mxu1 %v5502_v21  ;;  %v3161_v21 = vperm.slane %v8419_v56, 2  ;;  %v5566_v12 = vor.u32 %v6559_v60, %v5563_v13  ;;  %v3176_v46 = vperm.slane %v8419_v56, 3  ;;  %v5690_v43 = vor.u32 %v6657_v38, %v5689_v1  ;;  %v5793_v2 = vld [vmem:[#allocation8 + $0xc8] sm:$0xf]  ;;  %v6575_v50 = vld [vmem:[#allocation5 + $0x384] sm:$0xf] }
 0x250   :  { %vm3174_vm14 = vcmp.eq.s32.totalorder %v3170_v63, 1  ;;  %v5627_v57 = vld [vmem:[#allocation5 + $0x388] sm:$0xf0]  ;;  %v5811_v39 = vld [vmem:[#allocation8 + $0xf8] sm:$0xf0] }
 0x251   :  { %3102 = vmatpush.bf16.msrb.mxu3 %v5686_v27  ;;  %3090 = vmatpush.bf16.msrb.mxu2 %v5606_v55  ;;  %v3132_v27 = vsel %vm3129_vm4, %v3131_v58, 0.0  ;;  %v5723_v55 = vld [vmem:[#allocation8 + $0x50] sm:$0xf0]  ;;  %v6655_v22 = vld [vmem:[#allocation8 + $0x4] sm:$0xf]  ;;  %v5630_v52 = vor.u32 %v6575_v50, %v5627_v57 }
 0x252   :  { %3440 = vmatpush.bf16.msra.mxu0 %v5770_v20  ;;  %3082 = vmatmul.bf16.vlgmr.msrb.gmra.mxu1 %v8266_v9  ;;  %v5738_v9 = vor.u32 %v6669_v35, %v5737_v42  ;;  %v3173_v20 = vpop.permute.xlu0 %3172  ;;  %v3147_v29 = vsel %vm3144_vm3, %v3146_v30, %v3132_v27  ;;  %v6659_v42 = vld [vmem:[#allocation8 + $0x24] sm:$0xf]  ;;  %v6678_v34 = vld [vmem:[#allocation8 + $0xb4] sm:$0xf0]  ;;  %v5795_v61 = vld [vmem:[#allocation8 + $0xd8] sm:$0xf0] }
 0x253   :  { %3452 = vmatpush.bf16.msra.mxu1 %v5806_v7  ;;  %3054 = vmatmul.bf16.vlgmr.msra.gmra.mxu3 %v8083_v48  ;;  %v3133_v48 = vsel %vm3130_vm2, %v3131_v58, 0.0  ;;  %v6663_v7 = vld [vmem:[#allocation8 + $0x44] sm:$0xf]  ;;  %vm3175_vm12 = vcmp.eq.s32.totalorder %v3173_v20, 1  ;;  %v3162_v35 = vsel %vm3159_vm7, %v3161_v21, %v3147_v29  ;;  %v5710_v56 = vor.u32 %v6659_v42, %v5707_v62  ;;  %v5777_v58 = vld [vmem:[#allocation8 + $0xa8] sm:$0xf] }
 0x254   :  { %v3148_v47 = vsel %vm3145_vm5, %v3146_v30, %v3133_v48  ;;  %v3177_v31 = vsel %vm3174_vm14, %v3176_v46, %v3162_v35  ;;  %v5778_v17 = vor.u32 %v6678_v34, %v5777_v58  ;;  %v6674_v32 = vld [vmem:[#allocation8 + $0x94] sm:$0xf0]  ;;  %v6676_v6 = vld [vmem:[#allocation8 + $0xac] sm:$0xf]  ;;  %v5779_v48 = vld [vmem:[#allocation8 + $0xb8] sm:$0xf0] }
 0x255   :  { %3103 = vmatpush.bf16.msrb.mxu3 %v5678_v4  ;;  %3091 = vmatpush.bf16.msrb.mxu2 %v5598_v8  ;;  %v5646_v4 = vor.u32 %v6579_v10, %v5643_v3  ;;  %v5635_v8 = vld [vmem:[#allocation5 + $0x398] sm:$0xf0]  ;;  %v3163_v40 = vsel %vm3160_vm6, %v3161_v21, %v3148_v47  ;;  %v6670_v37 = vld [vmem:[#allocation8 + $0x74] sm:$0xf0]  ;;  %v5782_v24 = vor.u32 %v6676_v6, %v5779_v48  ;;  %v6672_v30 = vld [vmem:[#allocation8 + $0x8c] sm:$0xf] }
 0x256   :  { %3441 = vmatpush.bf16.msra.mxu0 %v5754_v25  ;;  %v5726_v25 = vor.u32 %v6663_v7, %v5723_v55  ;;  %v5763_v27 = vld [vmem:[#allocation8 + $0x98] sm:$0xf0]  ;;  %v5729_v3 = vld [vmem:[#allocation8 + $0x48] sm:$0xf]  ;;  %v6666_v21 = vld [vmem:[#allocation8 + $0x54] sm:$0xf0] }
 0x257   :  { %3453 = vmatpush.bf16.msra.mxu1 %v5790_v33  ;;  %v6577_v33 = vld [vmem:[#allocation5 + $0x394] sm:$0xf]  ;;  %v5747_v7 = vld [vmem:[#allocation8 + $0x78] sm:$0xf0]  ;;  %v5730_v55 = vor.u32 %v6666_v21, %v5729_v3  ;;  %v6662_v47 = vld [vmem:[#allocation8 + $0x34] sm:$0xf0] }
 0x258   :  { %v5638_v45 = vor.u32 %v6577_v33, %v5635_v8  ;;  %v5731_v60 = vld [vmem:[#allocation8 + $0x58] sm:$0xf0]  ;;  %v5697_v1 = vld [vmem:[#allocation8 + $0x8] sm:$0xf]  ;;  %v6656_v33 = vld [vmem:[#allocation8 + $0xc] sm:$0xf] }
 0x259   :  { %3104 = vmatpush.bf16.msrb.mxu3 %v5670_v23  ;;  %3092 = vmatpush.bf16.msrb.mxu2 %v5590_v18  ;;  %v5810_v23 = vor.u32 %v6686_v5, %v5809_v0  ;;  %v3178_v18 = vsel %vm3175_vm12, %v3176_v46, %v3163_v40  ;;  %v6660_v0 = vld [vmem:[#allocation8 + $0x2c] sm:$0xf]  ;;  %v5715_v5 = vld [vmem:[#allocation8 + $0x38] sm:$0xf0]  ;;  %v6619_v46 = vld [vmem:[#allocation7 + $0xe4] sm:$0xf] }
 0x25a   :  { %3442 = vmatpush.bf16.msra.mxu0 %v5738_v9  ;;  %v6684_v9 = vld [vmem:[#allocation8 + $0xec] sm:$0xf]  ;;  %v8439_v44 = vpack.c.bf16 %v3178_v18, %v3177_v31  ;;  %v5718_v63 = vor.u32 %v6660_v0, %v5715_v5  ;;  %v5699_v8 = vld [vmem:[#allocation8 + $0x18] sm:$0xf0]  ;;  %v5913_v42 = vld [vmem:[#allocation7 + $0xc0] sm:$0xf] }
 0x25b   :  { %3454 = vmatpush.bf16.msra.mxu1 %v5774_v54  ;;  %v6682_v54 = vld [vmem:[#allocation8 + $0xd4] sm:$0xf0]  ;;  %v5814_v41 = vor.u32 %v6684_v9, %v5811_v39  ;;  %v5702_v40 = vor.u32 %v6656_v33, %v5699_v8  ;;  %v6617_v62 = vld [vmem:[#allocation7 + $0xcc] sm:$0xf0]  ;;  %v5897_v50 = vld [vmem:[#allocation7 + $0xa0] sm:$0xf] }
 0x25c   :  { %v5794_v19 = vor.u32 %v6682_v54, %v5793_v2  ;;  %v5915_v2 = vld [vmem:[#allocation7 + $0xd0] sm:$0xf0]  ;;  %v5914_v54 = vor.u32 %v6617_v62, %v5913_v42  ;;  %v6613_v57 = vld [vmem:[#allocation7 + $0xac] sm:$0xf0]  ;;  %v5881_v31 = vld [vmem:[#allocation7 + $0x80] sm:$0xf] }
 0x25d   :  { %3105 = vmatpush.bf16.msrb.mxu3 %v5662_v59  ;;  %3093 = vmatpush.bf16.msrb.mxu2 %v5582_v28  ;;  %v5691_v59 = vld [vmem:[#allocation8 + $0x10] sm:$0xf0]  ;;  %v6680_v28 = vld [vmem:[#allocation8 + $0xcc] sm:$0xf]  ;;  %v5898_v9 = vor.u32 %v6613_v57, %v5897_v50  ;;  %v5865_v34 = vld [vmem:[#allocation7 + $0x60] sm:$0xf] }
 0x25e   :  { %3443 = vmatpush.bf16.msra.mxu0 %v5722_v16  ;;  %v5761_v16 = vld [vmem:[#allocation8 + $0x88] sm:$0xf]  ;;  %v5798_v26 = vor.u32 %v6680_v28, %v5795_v61  ;;  %v5899_v39 = vld [vmem:[#allocation7 + $0xb0] sm:$0xf0]  ;;  %v6593_v3 = vld [vmem:[#allocation7 + $0xc] sm:$0xf0] }
 0x25f   :  { %3455 = vmatpush.bf16.msra.mxu1 %v5758_v51  ;;  %v5694_v51 = vor.u32 %v6655_v22, %v5691_v59  ;;  %v6607_v59 = vld [vmem:[#allocation7 + $0x84] sm:$0xf]  ;;  %v5867_v61 = vld [vmem:[#allocation7 + $0x70] sm:$0xf0]  ;;  %v6653_v0 = vld [vmem:[#allocation7 + $0x1ec] sm:$0xf0] }
 0x260   :  { %v5851_v6 = vld [vmem:[#allocation7 + $0x50] sm:$0xf0]  ;;  %v6651_v5 = vld [vmem:[#allocation7 + $0x1e4] sm:$0xf]  ;;  %v5921_v33 = vld [vmem:[#allocation7 + $0xc8] sm:$0xf] }
 0x261   :  { %3106 = vmatpush.bf16.msrb.mxu3 %v5654_v49  ;;  %3094 = vmatpush.bf16.msrb.mxu2 %v5574_v53  ;;  %v5745_v49 = vld [vmem:[#allocation8 + $0x68] sm:$0xf]  ;;  %v6668_v53 = vld [vmem:[#allocation8 + $0x6c] sm:$0xf]  ;;  %v6618_v8 = vld [vmem:[#allocation7 + $0xd4] sm:$0xf0] }
 0x262   :  { %3444 = vmatpush.bf16.msra.mxu0 %v5706_v36  ;;  %v5746_v10 = vor.u32 %v6670_v37, %v5745_v49  ;;  %v5750_v20 = vor.u32 %v6668_v53, %v5747_v7  ;;  %v6664_v36 = vld [vmem:[#allocation8 + $0x4c] sm:$0xf]  ;;  %v5833_v49 = vld [vmem:[#allocation7 + $0x20] sm:$0xf]  ;;  %v6597_v37 = vld [vmem:[#allocation7 + $0x2c] sm:$0xf0] }
 0x263   :  { %3456 = vmatpush.bf16.msra.mxu1 %v5742_v11  ;;  %v5766_v11 = vor.u32 %v6672_v30, %v5763_v27  ;;  %v5734_v38 = vor.u32 %v6664_v36, %v5731_v60  ;;  %v5834_v30 = vor.u32 %v6597_v37, %v5833_v49  ;;  %v5835_v27 = vld [vmem:[#allocation7 + $0x30] sm:$0xf0]  ;;  %v6620_v36 = vld [vmem:[#allocation7 + $0xec] sm:$0xf]  ;;  %v6649_v62 = vld [vmem:[#allocation7 + $0x1cc] sm:$0xf0] }
 0x264   :  { %v5819_v53 = vld [vmem:[#allocation7 + $0x10] sm:$0xf0]  ;;  %v6614_v50 = vld [vmem:[#allocation7 + $0xb4] sm:$0xf0]  ;;  %v6612_v57 = vld [vmem:[#allocation7 + $0xac] sm:$0xf] }
 0x265   :  { %3107 = vmatpush.bf16.msrb.mxu3 %v5646_v4  ;;  %3095 = vmatpush.bf16.msrb.mxu2 %v5566_v12  ;;  %v6658_v4 = vld [vmem:[#allocation8 + $0x14] sm:$0xf0]  ;;  %v6621_v12 = vld [vmem:[#allocation7 + $0xec] sm:$0xf0]  ;;  %v5873_v37 = vld [vmem:[#allocation7 + $0x68] sm:$0xf] }
 0x266   :  { %3445 = vmatpush.bf16.msra.mxu0 %v5690_v43  ;;  %v5698_v29 = vor.u32 %v6658_v4, %v5697_v1 }
 0x267   :  { %3457 = vmatpush.bf16.msra.mxu1 %v5726_v25  ;;  %v5929_v25 = vld [vmem:[#allocation7 + $0xe0] sm:$0xf] }
 0x268   :  { %3096 = vmatmul.bf16.vlgmr.msrb.gmra.mxu2 %v8398_v14  ;;  %v5762_v14 = vor.u32 %v6674_v32, %v5761_v16  ;;  %v5930_v43 = vor.u32 %v6621_v12, %v5929_v25  ;;  %v6601_v16 = vld [vmem:[#allocation7 + $0x4c] sm:$0xf0]  ;;  %v5922_v12 = vor.u32 %v6618_v8, %v5921_v33 }
 0x269   :  { %3466 = vmatpush.bf16.msra.mxu2 %v5810_v23  ;;  %3108 = vmatpush.bf16.msrb.mxu3 %v5638_v45  ;;  %v5931_v23 = vld [vmem:[#allocation7 + $0xf0] sm:$0xf0]  ;;  %v6615_v45 = vld [vmem:[#allocation7 + $0xc4] sm:$0xf] }
 0x26a   :  { %3446 = vmatmul.bf16.vlgmr.msra.gmra.mxu0 %v8439_v44  ;;  %v5934_v35 = vor.u32 %v6619_v46, %v5931_v23  ;;  %v5918_v18 = vor.u32 %v6615_v45, %v5915_v2  ;;  %v6616_v46 = vld [vmem:[#allocation7 + $0xcc] sm:$0xf]  ;;  %v6041_v23 = vld [vmem:[#allocation7 + $0x1c0] sm:$0xf]  ;;  %v6043_v45 = vld [vmem:[#allocation7 + $0x1d0] sm:$0xf0] }
 0x26b   :  { %3458 = vmatpush.bf16.msra.mxu1 %v5710_v56  ;;  %3814 = vmatpush.bf16.msrb.mxu0 %v5930_v43  ;;  %v6611_v56 = vld [vmem:[#allocation7 + $0xa4] sm:$0xf]  ;;  %v5923_v43 = vld [vmem:[#allocation7 + $0xd8] sm:$0xf0]  ;;  %v6042_v2 = vor.u32 %v6649_v62, %v6041_v23  ;;  %v5977_v23 = vld [vmem:[#allocation7 + $0x140] sm:$0xf] }
 0x26c   :  { %v5902_v22 = vor.u32 %v6611_v56, %v5899_v39  ;;  %v5926_v42 = vor.u32 %v6616_v46, %v5923_v43  ;;  %v5907_v39 = vld [vmem:[#allocation7 + $0xb8] sm:$0xf0]  ;;  %v6631_v62 = vld [vmem:[#allocation7 + $0x144] sm:$0xf] }
 0x26d   :  { %3467 = vmatpush.bf16.msra.mxu2 %v5794_v19  ;;  %3109 = vmatpush.bf16.msrb.mxu3 %v5630_v52  ;;  %v6609_v19 = vld [vmem:[#allocation7 + $0x8c] sm:$0xf0] }
 0x26e   :  { %v5882_v52 = vor.u32 %v6609_v19, %v5881_v31  ;;  %v5910_v19 = vor.u32 %v6612_v57, %v5907_v39  ;;  %v5843_v39 = vld [vmem:[#allocation7 + $0x38] sm:$0xf0] }
 0x26f   :  { %3459 = vmatpush.bf16.msra.mxu1 %v5694_v51  ;;  %3815 = vmatpush.bf16.msrb.mxu0 %v5914_v54  ;;  %v6603_v51 = vld [vmem:[#allocation7 + $0x64] sm:$0xf] }
 0x270   :  { %3110 = vmatmul.bf16.vlgmr.msrb.gmra.mxu3 %v8404_v15  ;;  %v5713_v15 = vld [vmem:[#allocation8 + $0x28] sm:$0xf]  ;;  %v5870_v32 = vor.u32 %v6603_v51, %v5867_v61 }
 0x271   :  { %3480 = vmatpush.bf16.msra.mxu3 %v5814_v41  ;;  %3468 = vmatpush.bf16.msra.mxu2 %v5778_v17  ;;  %v5714_v13 = vor.u32 %v6662_v47, %v5713_v15  ;;  %v6605_v41 = vld [vmem:[#allocation7 + $0x6c] sm:$0xf0]  ;;  %v5849_v17 = vld [vmem:[#allocation7 + $0x40] sm:$0xf]  ;;  %v5937_v47 = vld [vmem:[#allocation7 + $0xe8] sm:$0xf] }
 0x272   :  { %3460 = vmatmul.bf16.vlgmr.msra.gmra.mxu1 %v8439_v44  ;;  %v5866_v28 = vor.u32 %v6605_v41, %v5865_v34  ;;  %v5850_v48 = vor.u32 %v6601_v16, %v5849_v17  ;;  %v5889_v34 = vld [vmem:[#allocation7 + $0x88] sm:$0xf]  ;;  %v6610_v41 = vld [vmem:[#allocation7 + $0x94] sm:$0xf0]  ;;  %v6608_v17 = vld [vmem:[#allocation7 + $0x8c] sm:$0xf] }
 0x273   :  { %3816 = vmatpush.bf16.msrb.mxu0 %v5898_v9  ;;  %v5890_v61 = vor.u32 %v6610_v41, %v5889_v34  ;;  %v5891_v16 = vld [vmem:[#allocation7 + $0x98] sm:$0xf0] }
 0x275   :  { %3481 = vmatpush.bf16.msra.mxu3 %v5798_v26  ;;  %3469 = vmatpush.bf16.msra.mxu2 %v5762_v14  ;;  %v6599_v26 = vld [vmem:[#allocation7 + $0x44] sm:$0xf] }
 0x276   :  { %v5854_v14 = vor.u32 %v6599_v26, %v5851_v6  ;;  %v5894_v26 = vor.u32 %v6608_v17, %v5891_v16  ;;  %v6641_v6 = vld [vmem:[#allocation7 + $0x18c] sm:$0xf0]  ;;  %v6592_v17 = vld [vmem:[#allocation7 + $0xc] sm:$0xf] }
 0x277   :  { %3817 = vmatpush.bf16.msrb.mxu0 %v5882_v52 }
 0x279   :  { %3482 = vmatpush.bf16.msra.mxu3 %v5782_v24  ;;  %3470 = vmatpush.bf16.msra.mxu2 %v5746_v10  ;;  %v6595_v24 = vld [vmem:[#allocation7 + $0x24] sm:$0xf]  ;;  %v5817_v10 = vld [vmem:[#allocation7] sm:$0xf] }
 0x27a   :  { %v5838_v21 = vor.u32 %v6595_v24, %v5835_v27  ;;  %v5818_v7 = vor.u32 %v6593_v3, %v5817_v10  ;;  %v6606_v24 = vld [vmem:[#allocation7 + $0x74] sm:$0xf0]  ;;  %v8458_v27 = vld [vmem:[%s8747_s7] sm:$0x3] }
 0x27b   :  { %3818 = vmatpush.bf16.msrb.mxu0 %v5866_v28  ;;  %v8449_v1 = vpop.f32.mrf.mxu1 }
 0x27d   :  { %3483 = vmatpush.bf16.msra.mxu3 %v5766_v11  ;;  %3471 = vmatpush.bf16.msra.mxu2 %v5730_v55  ;;  %v6591_v11 = vld [vmem:[#allocation7 + $0x4] sm:$0xf]  ;;  %v8447_v55 = vpop.f32.mrf.mxu0 }
 0x27e   :  { %v5822_v15 = vor.u32 %v6591_v11, %v5819_v53  ;;  %v5875_v11 = vld [vmem:[#allocation7 + $0x78] sm:$0xf0] }
 0x27f   :  { %3819 = vmatpush.bf16.msrb.mxu0 %v5850_v48  ;;  %v6639_v48 = vld [vmem:[#allocation7 + $0x184] sm:$0xf] }
 0x281   :  { %3484 = vmatpush.bf16.msra.mxu3 %v5750_v20  ;;  %3472 = vmatpush.bf16.msra.mxu2 %v5714_v13  ;;  %v6622_v20 = vld [vmem:[#allocation7 + $0xf4] sm:$0xf0]  ;;  %v5939_v13 = vld [vmem:[#allocation7 + $0xf8] sm:$0xf0] }
 0x282   :  { %v5938_v60 = vor.u32 %v6622_v20, %v5937_v47  ;;  %v5942_v4 = vor.u32 %v6620_v36, %v5939_v13  ;;  %v6635_v47 = vld [vmem:[#allocation7 + $0x164] sm:$0xf]  ;;  %v5995_v36 = vld [vmem:[#allocation7 + $0x170] sm:$0xf0]  ;;  %v6602_v13 = vld [vmem:[#allocation7 + $0x54] sm:$0xf0] }
 0x283   :  { %3820 = vmatpush.bf16.msrb.mxu0 %v5834_v30  ;;  %v2917_v51 = vpop.f32.mrf.mxu1  ;;  %v6604_v30 = vld [vmem:[#allocation7 + $0x6c] sm:$0xf] }
 0x284   :  { %v5878_v53 = vor.u32 %v6604_v30, %v5875_v11  ;;  %v6625_v30 = vld [vmem:[#allocation7 + $0x10c] sm:$0xf0]  ;;  %v6065_v11 = vld [vmem:[#allocation7 + $0x1e8] sm:$0xf] }
 0x285   :  { %3485 = vmatpush.bf16.msra.mxu3 %v5734_v38  ;;  %3473 = vmatpush.bf16.msra.mxu2 %v5698_v29  ;;  %v6057_v38 = vld [vmem:[#allocation7 + $0x1e0] sm:$0xf]  ;;  %v2903_v56 = vpop.f32.mrf.mxu0 }
 0x286   :  { %v6058_v29 = vor.u32 %v6653_v0, %v6057_v38  ;;  %v6600_v0 = vld [vmem:[#allocation7 + $0x4c] sm:$0xf] }
 0x287   :  { %3821 = vmatpush.bf16.msrb.mxu0 %v5818_v7  ;;  %v5993_v7 = vld [vmem:[#allocation7 + $0x160] sm:$0xf] }
 0x288   :  { %3474 = vmatmul.bf16.vlgmr.msra.gmra.mxu2 %v8439_v44  ;;  %3828 = vmatpush.bf16.msrb.mxu1 %v6058_v29  ;;  %v5998_v29 = vor.u32 %v6635_v47, %v5995_v36  ;;  %v6652_v36 = vld [vmem:[#allocation7 + $0x1ec] sm:$0xf] }
 0x289   :  { %3486 = vmatpush.bf16.msra.mxu3 %v5718_v63  ;;  %3842 = vmatpush.bf16.msrb.mxu2 %v5934_v35  ;;  %v6059_v63 = vld [vmem:[#allocation7 + $0x1f0] sm:$0xf0]  ;;  %v6647_v35 = vld [vmem:[#allocation7 + $0x1c4] sm:$0xf] }
 0x28a   :  { %v6062_v25 = vor.u32 %v6651_v5, %v6059_v63  ;;  %v6046_v54 = vor.u32 %v6647_v35, %v6043_v45  ;;  %v5859_v5 = vld [vmem:[#allocation7 + $0x58] sm:$0xf0] }
 0x28b   :  { %3870 = vmatpush.bf16.msra.mxu0 %v5938_v60  ;;  %v5857_v60 = vld [vmem:[#allocation7 + $0x48] sm:$0xf] }
 0x28c   :  { %3829 = vmatpush.bf16.msrb.mxu1 %v6042_v2  ;;  %v5858_v63 = vor.u32 %v6602_v13, %v5857_v60  ;;  %v5979_v2 = vld [vmem:[#allocation7 + $0x150] sm:$0xf0]  ;;  %v6067_v60 = vld [vmem:[#allocation7 + $0x1f8] sm:$0xf0] }
 0x28d   :  { %3487 = vmatpush.bf16.msra.mxu3 %v5702_v40  ;;  %3843 = vmatpush.bf16.msrb.mxu2 %v5918_v18  ;;  %v8451_v40 = vpop.f32.mrf.mxu2  ;;  %v5905_v18 = vld [vmem:[#allocation7 + $0xa8] sm:$0xf]  ;;  %v5982_v57 = vor.u32 %v6631_v62, %v5979_v2  ;;  %v6646_v62 = vld [vmem:[#allocation7 + $0x1b4] sm:$0xf0] }
 0x28e   :  { %v5906_v9 = vor.u32 %v6614_v50, %v5905_v18  ;;  %v6598_v18 = vld [vmem:[#allocation7 + $0x34] sm:$0xf0] }
 0x28f   :  { %3871 = vmatpush.bf16.msra.mxu0 %v5922_v12 }
 0x290   :  { %3488 = vmatmul.bf16.vlgmr.msra.gmra.mxu3 %v8439_v44  ;;  %v5883_v44 = vld [vmem:[#allocation7 + $0x90] sm:$0xf0] }
 0x291   :  { %3844 = vmatpush.bf16.msrb.mxu2 %v5902_v22  ;;  %v5886_v58 = vor.u32 %v6607_v59, %v5883_v44  ;;  %3856 = vmatpush.bf16.msrb.mxu3 %v6062_v25  ;;  %v6025_v22 = vld [vmem:[#allocation7 + $0x1a0] sm:$0xf]  ;;  %v6645_v59 = vld [vmem:[#allocation7 + $0x1ac] sm:$0xf0]  ;;  %v6643_v44 = vld [vmem:[#allocation7 + $0x1a4] sm:$0xf]  ;;  %v5862_v25 = vor.u32 %v6600_v0, %v5859_v5 }
 0x292   :  { %v6026_v52 = vor.u32 %v6645_v59, %v6025_v22  ;;  %v6629_v59 = vld [vmem:[#allocation7 + $0x12c] sm:$0xf0]  ;;  %v6049_v0 = vld [vmem:[#allocation7 + $0x1c8] sm:$0xf]  ;;  %v6650_v5 = vld [vmem:[#allocation7 + $0x1d4] sm:$0xf0] }
 0x293   :  { %v8453_v31 = vpop.f32.mrf.mxu3  ;;  %3872 = vmatpush.bf16.msra.mxu0 %v5906_v9 }
 0x294   :  { %3830 = vmatpush.bf16.msrb.mxu1 %v6026_v52  ;;  %v5963_v52 = vld [vmem:[#allocation7 + $0x130] sm:$0xf0] }
 0x295   :  { %3845 = vmatpush.bf16.msrb.mxu2 %v5886_v58  ;;  %3857 = vmatpush.bf16.msrb.mxu3 %v6046_v54  ;;  %v6027_v58 = vld [vmem:[#allocation7 + $0x1b0] sm:$0xf0]  ;;  %v2931_v10 = vpop.f32.mrf.mxu2  ;;  %v5841_v54 = vld [vmem:[#allocation7 + $0x28] sm:$0xf] }
 0x296   :  { %v6030_v28 = vor.u32 %v6643_v44, %v6027_v58  ;;  %v5842_v9 = vor.u32 %v6598_v18, %v5841_v54  ;;  %v6627_v44 = vld [vmem:[#allocation7 + $0x124] sm:$0xf] }
 0x297   :  { %3873 = vmatpush.bf16.msra.mxu0 %v5890_v61  ;;  %v5966_v41 = vor.u32 %v6627_v44, %v5963_v52  ;;  %v6594_v61 = vld [vmem:[#allocation7 + $0x14] sm:$0xf0]  ;;  %v6636_v52 = vld [vmem:[#allocation7 + $0x16c] sm:$0xf] }
 0x298   :  { %v6638_v44 = vld [vmem:[#allocation7 + $0x174] sm:$0xf0] }
 0x299   :  { %3846 = vmatpush.bf16.msrb.mxu2 %v5870_v32  ;;  %v6009_v32 = vld [vmem:[#allocation7 + $0x180] sm:$0xf]  ;;  %3858 = vmatpush.bf16.msrb.mxu3 %v6030_v28 }
 0x29a   :  { %v6010_v49 = vor.u32 %v6641_v6, %v6009_v32 }
 0x29b   :  { %v2945_v33 = vpop.f32.mrf.mxu3 }
 0x29c   :  { %3831 = vmatpush.bf16.msrb.mxu1 %v6010_v49 }
 0x29d   :  { %3847 = vmatpush.bf16.msrb.mxu2 %v5854_v14  ;;  %v6011_v14 = vld [vmem:[#allocation7 + $0x190] sm:$0xf0] }
 0x29e   :  { %v6014_v3 = vor.u32 %v6639_v48, %v6011_v14 }
 0x2a0   :  { %v2957_v20 = vpop.f32.mrf.mxu0  ;;  %3859 = vmatpush.bf16.msrb.mxu3 %v6014_v3 }
 0x2a1   :  { %3848 = vmatpush.bf16.msrb.mxu2 %v5838_v21  ;;  %v5874_v21 = vor.u32 %v6606_v24, %v5873_v37  ;;  %v5945_v24 = vld [vmem:[#allocation7 + $0x100] sm:$0xf] }
 0x2a2   :  { %v5946_v3 = vor.u32 %v6625_v30, %v5945_v24  ;;  %v5971_v30 = vld [vmem:[#allocation7 + $0x138] sm:$0xf0] }
 0x2a3   :  { %3874 = vmatpush.bf16.msra.mxu0 %v5874_v21  ;;  %v2971_v8 = vpop.f32.mrf.mxu1  ;;  %v5947_v21 = vld [vmem:[#allocation7 + $0x110] sm:$0xf0] }
 0x2a4   :  { %3860 = vmatpush.bf16.msrb.mxu3 %v5998_v29  ;;  %v6648_v29 = vld [vmem:[#allocation7 + $0x1cc] sm:$0xf] }
 0x2a5   :  { %3849 = vmatpush.bf16.msrb.mxu2 %v5822_v15  ;;  %v6637_v15 = vld [vmem:[#allocation7 + $0x16c] sm:$0xf0] }
 0x2a6   :  { %v5994_v38 = vor.u32 %v6637_v15, %v5993_v7 }
 0x2a7   :  { %3875 = vmatpush.bf16.msra.mxu0 %v5858_v63 }
 0x2a8   :  { %3832 = vmatpush.bf16.msrb.mxu1 %v5994_v38  ;;  %3861 = vmatpush.bf16.msrb.mxu3 %v5982_v57  ;;  %v6642_v57 = vld [vmem:[#allocation7 + $0x194] sm:$0xf0] }
 0x2a9   :  { %3898 = vmatpush.bf16.msra.mxu2 %v5942_v4  ;;  %v2248_v4 = vperm.slane %v8458_v27, 0 }
 0x2ab   :  { %v2902_v12 = vadd.f32 %v8447_v55, %v2248_v4  ;;  %v2904_v46 = vadd.f32 %v2903_v56, %v2248_v4  ;;  %v6596_v55 = vld [vmem:[#allocation7 + $0x2c] sm:$0xf]  ;;  %v5961_v56 = vld [vmem:[#allocation7 + $0x120] sm:$0xf]  ;;  %3876 = vmatpush.bf16.msra.mxu0 %v5842_v9  ;;  %v2973_v6 = vpop.f32.mrf.mxu1 }
 0x2ac   :  { %v5846_v22 = vor.u32 %v6596_v55, %v5843_v39  ;;  %v5962_v34 = vor.u32 %v6629_v59, %v5961_v56  ;;  %3862 = vmatpush.bf16.msrb.mxu3 %v5966_v41  ;;  %v6640_v9 = vld [vmem:[#allocation7 + $0x18c] sm:$0xf]  ;;  %v6019_v39 = vld [vmem:[#allocation7 + $0x198] sm:$0xf0]  ;;  %v6001_v59 = vld [vmem:[#allocation7 + $0x168] sm:$0xf] }
 0x2ad   :  { %3899 = vmatpush.bf16.msra.mxu2 %v5926_v42  ;;  %v6633_v42 = vld [vmem:[#allocation7 + $0x14c] sm:$0xf0]  ;;  %v2916_v35 = vadd.f32 %v8449_v1, %v2902_v12  ;;  %v2918_v50 = vadd.f32 %v2917_v51, %v2904_v46  ;;  %v2959_v1 = vpop.f32.mrf.mxu0  ;;  %v5825_v51 = vld [vmem:[#allocation7 + $0x8] sm:$0xf]  ;;  %v6051_v12 = vld [vmem:[#allocation7 + $0x1d8] sm:$0xf0]  ;;  %v6022_v56 = vor.u32 %v6640_v9, %v6019_v39 }
 0x2ae   :  { %v5978_v45 = vor.u32 %v6633_v42, %v5977_v23  ;;  %v6054_v46 = vor.u32 %v6648_v29, %v6051_v12  ;;  %v6033_v42 = vld [vmem:[#allocation7 + $0x1a8] sm:$0xf]  ;;  %v6634_v41 = vld [vmem:[#allocation7 + $0x154] sm:$0xf0] }
 0x2af   :  { %v2932_v58 = vadd.f32 %v2931_v10, %v2918_v50  ;;  %v6623_v10 = vld [vmem:[#allocation7 + $0x104] sm:$0xf]  ;;  %v6017_v50 = vld [vmem:[#allocation7 + $0x188] sm:$0xf] }
 0x2b0   :  { %3833 = vmatpush.bf16.msrb.mxu1 %v5978_v45  ;;  %v5950_v15 = vor.u32 %v6623_v10, %v5947_v21  ;;  %v6035_v45 = vld [vmem:[#allocation7 + $0x1b8] sm:$0xf0]  ;;  %v6018_v55 = vor.u32 %v6642_v57, %v6017_v50  ;;  %v6129_v50 = vld [vmem:[#allocation10 + $0x60] sm:$0xf]  ;;  %v6700_v57 = vld [vmem:[#allocation10 + $0x64] sm:$0xf0] }
 0x2b1   :  { %3900 = vmatpush.bf16.msra.mxu2 %v5910_v19  ;;  %v2930_v19 = vadd.f32 %v8451_v40, %v2916_v35  ;;  %v2946_v32 = vadd.f32 %v2945_v33, %v2932_v58  ;;  %v5826_v40 = vor.u32 %v6594_v61, %v5825_v51  ;;  %v6644_v35 = vld [vmem:[#allocation7 + $0x1ac] sm:$0xf]  ;;  %v6002_v58 = vor.u32 %v6638_v44, %v6001_v59  ;;  %v5987_v61 = vld [vmem:[#allocation7 + $0x158] sm:$0xf0]  ;;  %v6121_v59 = vld [vmem:[#allocation10 + $0x50] sm:$0xf] }
 0x2b2   :  { %3863 = vmatpush.bf16.msrb.mxu3 %v5950_v15  ;;  %v6038_v18 = vor.u32 %v6644_v35, %v6035_v45  ;;  %v6632_v51 = vld [vmem:[#allocation7 + $0x14c] sm:$0xf]  ;;  %v6698_v44 = vld [vmem:[#allocation10 + $0x54] sm:$0xf0] }
 0x2b3   :  { %v2944_v16 = vadd.f32 %v8453_v31, %v2930_v19  ;;  %v2960_v49 = vadd.f32 %v2959_v1, %v2946_v32  ;;  %3877 = vmatpush.bf16.msra.mxu0 %v5826_v40  ;;  %v3027_v2 = vpop.f32.mrf.mxu1  ;;  %v6003_v1 = vld [vmem:[#allocation7 + $0x178] sm:$0xf0]  ;;  %v5990_v40 = vor.u32 %v6632_v51, %v5987_v61 }
 0x2b4   :  { %3834 = vmatpush.bf16.msrb.mxu1 %v5962_v34  ;;  %v5985_v34 = vld [vmem:[#allocation7 + $0x148] sm:$0xf] }
 0x2b5   :  { %3901 = vmatpush.bf16.msra.mxu2 %v5894_v26  ;;  %v5827_v26 = vld [vmem:[#allocation7 + $0x18] sm:$0xf0]  ;;  %v2958_v14 = vadd.f32 %v2957_v20, %v2944_v16  ;;  %v2974_v7 = vadd.f32 %v2973_v6, %v2960_v49  ;;  %v6070_v20 = vor.u32 %v6652_v36, %v6067_v60  ;;  %v3013_v63 = vpop.f32.mrf.mxu0  ;;  %v5986_v32 = vor.u32 %v6634_v41, %v5985_v34  ;;  %v5969_v6 = vld [vmem:[#allocation7 + $0x128] sm:$0xf]  ;;  %v6113_v41 = vld [vmem:[#allocation10 + $0x40] sm:$0xf] }
 0x2b6   :  { %v5830_v48 = vor.u32 %v6592_v17, %v5827_v26  ;;  %v2249_v26 = vperm.slane %v8458_v27, 1  ;;  %v5955_v27 = vld [vmem:[#allocation7 + $0x118] sm:$0xf0] }
 0x2b7   :  { %v2972_v31 = vadd.f32 %v2971_v8, %v2958_v14  ;;  %3912 = vmatpush.bf16.msra.mxu3 %v6070_v20  ;;  %v6628_v14 = vld [vmem:[#allocation7 + $0x12c] sm:$0xf] }
 0x2b8   :  { %3835 = vmatpush.bf16.msrb.mxu1 %v5946_v3  ;;  %v3014_v10 = vadd.f32 %v3013_v63, %v2249_v26  ;;  %v5974_v21 = vor.u32 %v6628_v14, %v5971_v30  ;;  %v6265_v14 = vld [vmem:[#allocation10 + $0x170] sm:$0xf]  ;;  %v6177_v30 = vld [vmem:[#allocation10 + $0xc0] sm:$0xf] }
 0x2b9   :  { %3902 = vmatpush.bf16.msra.mxu2 %v5878_v53  ;;  %v6654_v53 = vld [vmem:[#allocation7 + $0x1f4] sm:$0xf0] }
 0x2ba   :  { %v6066_v47 = vor.u32 %v6654_v53, %v6065_v11  ;;  %v5953_v11 = vld [vmem:[#allocation7 + $0x108] sm:$0xf]  ;;  %v6626_v53 = vld [vmem:[#allocation7 + $0x114] sm:$0xf0]  ;;  %v3028_v15 = vadd.f32 %v3027_v2, %v3014_v10  ;;  %v6137_v2 = vld [vmem:[#allocation10 + $0x70] sm:$0xf] }
 0x2bb   :  { %3913 = vmatpush.bf16.msra.mxu3 %v6054_v46  ;;  %v3029_v17 = vpop.f32.mrf.mxu1  ;;  %v6712_v10 = vld [vmem:[#allocation10 + $0xc4] sm:$0xf0] }
 0x2bc   :  { %3884 = vmatpush.bf16.msra.mxu1 %v6066_v47 }
 0x2bd   :  { %3903 = vmatpush.bf16.msra.mxu2 %v5862_v25  ;;  %v6050_v25 = vor.u32 %v6650_v5, %v6049_v0  ;;  %v3015_v19 = vpop.f32.mrf.mxu0 }
 0x2be   :  { %v3016_v3 = vadd.f32 %v3015_v19, %v2249_v26  ;;  %v6718_v19 = vld [vmem:[#allocation10 + $0xf4] sm:$0xf0] }
 0x2bf   :  { %3914 = vmatpush.bf16.msra.mxu3 %v6038_v18 }
 0x2c0   :  { %3885 = vmatpush.bf16.msra.mxu1 %v6050_v25  ;;  %v3030_v47 = vadd.f32 %v3029_v17, %v3016_v3  ;;  %v6185_v17 = vld [vmem:[#allocation10 + $0xd0] sm:$0xf]  ;;  %v6178_v3 = vor.u32 %v6712_v10, %v6177_v30  ;;  %v6726_v30 = vld [vmem:[#allocation10 + $0x134] sm:$0xf0] }
 0x2c1   :  { %v8462_v43 = vpop.f32.mrf.mxu2  ;;  %3904 = vmatpush.bf16.msra.mxu2 %v5846_v22 }
 0x2c2   :  { %v2986_v13 = vadd.f32 %v8462_v43, %v2972_v31  ;;  %v6034_v43 = vor.u32 %v6646_v62, %v6033_v42  ;;  %v6624_v31 = vld [vmem:[#allocation7 + $0x10c] sm:$0xf] }
 0x2c3   :  { %3915 = vmatpush.bf16.msra.mxu3 %v6022_v56  ;;  %v5958_v36 = vor.u32 %v6624_v31, %v5955_v27  ;;  %v6201_v56 = vld [vmem:[#allocation10 + $0xf0] sm:$0xf]  ;;  %v6257_v31 = vld [vmem:[#allocation10 + $0x160] sm:$0xf]  ;;  %v6732_v27 = vld [vmem:[#allocation10 + $0x164] sm:$0xf0] }
 0x2c4   :  { %3886 = vmatpush.bf16.msra.mxu1 %v6034_v43 }
 0x2c5   :  { %v2999_v28 = vpop.f32.mrf.mxu3  ;;  %3905 = vmatpush.bf16.msra.mxu2 %v5830_v48  ;;  %v6630_v48 = vld [vmem:[#allocation7 + $0x134] sm:$0xf0] }
 0x2c6   :  { %v3000_v33 = vadd.f32 %v2999_v28, %v2986_v13  ;;  %v6006_v28 = vor.u32 %v6636_v52, %v6003_v1  ;;  %v5970_v24 = vor.u32 %v6630_v48, %v5969_v6  ;;  %v6122_v52 = vor.u32 %v6698_v44, %v6121_v59  ;;  %v6716_v1 = vld [vmem:[#allocation10 + $0xe4] sm:$0xf0]  ;;  %v6105_v6 = vld [vmem:[#allocation10 + $0x30] sm:$0xf]  ;;  %v6694_v48 = vld [vmem:[#allocation10 + $0x34] sm:$0xf0] }
 0x2c8   :  { %3887 = vmatpush.bf16.msra.mxu1 %v6018_v55  ;;  %3916 = vmatpush.bf16.msra.mxu3 %v6006_v28  ;;  %v3069_v49 = vpop.f32.mrf.mxu0  ;;  %v6130_v55 = vor.u32 %v6700_v57, %v6129_v50  ;;  %v6696_v28 = vld [vmem:[#allocation10 + $0x44] sm:$0xf0] }
 0x2c9   :  { %v2987_v37 = vpop.f32.mrf.mxu2  ;;  %v6114_v51 = vor.u32 %v6696_v28, %v6113_v41  ;;  %v6748_v57 = vld [vmem:[#allocation10 + $0x1e4] sm:$0xf0]  ;;  %v6153_v28 = vld [vmem:[#allocation10 + $0x90] sm:$0xf] }
 0x2ca   :  { %v2988_v4 = vadd.f32 %v2987_v37, %v2974_v7  ;;  %v5954_v7 = vor.u32 %v6626_v53, %v5953_v11  ;;  %v6097_v11 = vld [vmem:[#allocation10 + $0x20] sm:$0xf]  ;;  %v6692_v53 = vld [vmem:[#allocation10 + $0x24] sm:$0xf0] }
 0x2cc   :  { %3888 = vmatpush.bf16.msra.mxu1 %v6002_v58  ;;  %3917 = vmatpush.bf16.msra.mxu3 %v5990_v40  ;;  %v6193_v58 = vld [vmem:[#allocation10 + $0xe0] sm:$0xf] }
 0x2cd   :  { %v3001_v38 = vpop.f32.mrf.mxu3  ;;  %v6194_v34 = vor.u32 %v6716_v1, %v6193_v58  ;;  %v6701_v58 = vld [vmem:[#allocation10 + $0x74] sm:$0xf]  ;;  %v6139_v1 = vld [vmem:[#allocation10 + $0x78] sm:$0xf0] }
 0x2ce   :  { %v3002_v8 = vadd.f32 %v3001_v38, %v2988_v4  ;;  %v6142_v41 = vor.u32 %v6701_v58, %v6139_v1  ;;  %v6217_v58 = vld [vmem:[#allocation10 + $0x110] sm:$0xf]  ;;  %v6722_v1 = vld [vmem:[#allocation10 + $0x114] sm:$0xf0] }
 0x2cf   :  { %v3083_v60 = vpop.f32.mrf.mxu1 }
 0x2d0   :  { %v3179_v23 = vpack.c.bf16 %v3002_v8, %v3000_v33  ;;  %3889 = vmatpush.bf16.msra.mxu1 %v5986_v32  ;;  %3918 = vmatpush.bf16.msra.mxu3 %v5974_v21  ;;  %v3071_v5 = vpop.f32.mrf.mxu0 }
 0x2d1   :  { %v3041_v54 = vpop.f32.mrf.mxu2 }
 0x2d2   :  { %3822 = vmatmul.bf16.vlgmr.msrb.gmra.mxu0 %v3179_v23  ;;  %3850 = vmatmul.bf16.vlgmr.msrb.gmra.mxu2 %v3179_v23  ;;  %v3042_v13 = vadd.f32 %v3041_v54, %v3028_v15  ;;  %v6702_v54 = vld [vmem:[#allocation10 + $0x74] sm:$0xf0]  ;;  %v6258_v15 = vor.u32 %v6732_v27, %v6257_v31  ;;  %v6145_v27 = vld [vmem:[#allocation10 + $0x80] sm:$0xf] }
 0x2d3   :  { %v6138_v18 = vor.u32 %v6702_v54, %v6137_v2  ;;  %v6321_v2 = vld [vmem:[#allocation10 + $0x1e0] sm:$0xf] }
 0x2d4   :  { %3890 = vmatpush.bf16.msra.mxu1 %v5970_v24  ;;  %3919 = vmatpush.bf16.msra.mxu3 %v5958_v36 }
 0x2d5   :  { %4498 = vmatpush.bf16.msrb.mxu0 %v6138_v18 }
 0x2d6   :  { %v3055_v22 = vpop.f32.mrf.mxu3 }
 0x2d7   :  { %v3056_v38 = vadd.f32 %v3055_v22, %v3042_v13  ;;  %v3085_v8 = vpop.f32.mrf.mxu1  ;;  %v6202_v22 = vor.u32 %v6718_v19, %v6201_v56  ;;  %v6710_v13 = vld [vmem:[#allocation10 + $0xb4] sm:$0xf0]  ;;  %v6322_v56 = vor.u32 %v6748_v57, %v6321_v2  ;;  %v6081_v19 = vld [vmem:[#allocation10] sm:$0xf]  ;;  %v6297_v2 = vld [vmem:[#allocation10 + $0x1b0] sm:$0xf] }
 0x2d8   :  { %3891 = vmatpush.bf16.msra.mxu1 %v5954_v7  ;;  %v6098_v7 = vor.u32 %v6692_v53, %v6097_v11  ;;  %v6131_v53 = vld [vmem:[#allocation10 + $0x68] sm:$0xf0] }
 0x2d9   :  { %v3043_v16 = vpop.f32.mrf.mxu2  ;;  %v3070_v63 = vadd.f32 %v3069_v49, %v3056_v38  ;;  %4499 = vmatpush.bf16.msrb.mxu0 %v6130_v55  ;;  %v6106_v49 = vor.u32 %v6694_v48, %v6105_v6 }
 0x2da   :  { %v3044_v4 = vadd.f32 %v3043_v16, %v3030_v47  ;;  %v6714_v16 = vld [vmem:[#allocation10 + $0xd4] sm:$0xf0] }
 0x2db   :  { %v3084_v12 = vadd.f32 %v3083_v60, %v3070_v63  ;;  %v6186_v40 = vor.u32 %v6714_v16, %v6185_v17  ;;  %v6313_v17 = vld [vmem:[#allocation10 + $0x1d0] sm:$0xf] }
 0x2dd   :  { %4500 = vmatpush.bf16.msrb.mxu0 %v6122_v52  ;;  %v6728_v52 = vld [vmem:[#allocation10 + $0x144] sm:$0xf0] }
 0x2de   :  { %v3057_v37 = vpop.f32.mrf.mxu3 }
 0x2df   :  { %v3058_v0 = vadd.f32 %v3057_v37, %v3044_v4  ;;  %v6734_v37 = vld [vmem:[#allocation10 + $0x174] sm:$0xf0]  ;;  %v6329_v4 = vld [vmem:[#allocation10 + $0x1f0] sm:$0xf] }
 0x2e0   :  { %v6266_v24 = vor.u32 %v6734_v37, %v6265_v14  ;;  %v6746_v14 = vld [vmem:[#allocation10 + $0x1d4] sm:$0xf0] }
 0x2e1   :  { %v3072_v33 = vadd.f32 %v3071_v5, %v3058_v0  ;;  %4501 = vmatpush.bf16.msrb.mxu0 %v6114_v51  ;;  %v6750_v0 = vld [vmem:[#allocation10 + $0x1f4] sm:$0xf0]  ;;  %v6314_v37 = vor.u32 %v6746_v14, %v6313_v17  ;;  %v6713_v14 = vld [vmem:[#allocation10 + $0xd4] sm:$0xf] }
 0x2e2   :  { %3878 = vmatmul.bf16.vlgmr.msra.gmra.mxu0 %v3179_v23  ;;  %3906 = vmatmul.bf16.vlgmr.msra.gmra.mxu2 %v3179_v23  ;;  %v6330_v5 = vor.u32 %v6750_v0, %v6329_v4  ;;  %v6706_v51 = vld [vmem:[#allocation10 + $0x94] sm:$0xf0]  ;;  %v6744_v4 = vld [vmem:[#allocation10 + $0x1c4] sm:$0xf0] }
 0x2e3   :  { %v3086_v46 = vadd.f32 %v3085_v8, %v3072_v33  ;;  %4526 = vmatpush.bf16.msrb.mxu2 %v6266_v24  ;;  %v6089_v33 = vld [vmem:[#allocation10 + $0x10] sm:$0xf]  ;;  %v6690_v8 = vld [vmem:[#allocation10 + $0x14] sm:$0xf0]  ;;  %v6154_v48 = vor.u32 %v6706_v51, %v6153_v28  ;;  %v6115_v28 = vld [vmem:[#allocation10 + $0x48] sm:$0xf0] }
 0x2e4   :  { %v6233_v24 = vld [vmem:[#allocation10 + $0x130] sm:$0xf] }
 0x2e5   :  { %4502 = vmatpush.bf16.msrb.mxu0 %v6106_v49  ;;  %v6234_v11 = vor.u32 %v6726_v30, %v6233_v24  ;;  %v6209_v30 = vld [vmem:[#allocation10 + $0x100] sm:$0xf] }
 0x2e7   :  { %v8469_v9 = vpop.f32.mrf.mxu0  ;;  %4527 = vmatpush.bf16.msrb.mxu2 %v6258_v15  ;;  %v6704_v15 = vld [vmem:[#allocation10 + $0x84] sm:$0xf0] }
 0x2e9   :  { %4503 = vmatpush.bf16.msrb.mxu0 %v6098_v7 }
 0x2eb   :  { %v3097_v20 = vpop.f32.mrf.mxu2 }
 0x2ec   :  { %v3098_v23 = vadd.f32 %v3097_v20, %v3084_v12  ;;  %v6169_v20 = vld [vmem:[#allocation10 + $0xb0] sm:$0xf] }
 0x2ed   :  { %v6170_v38 = vor.u32 %v6710_v13, %v6169_v20  ;;  %v6146_v13 = vor.u32 %v6704_v15, %v6145_v27  ;;  %v6733_v15 = vld [vmem:[#allocation10 + $0x174] sm:$0xf] }
 0x2ef   :  { %v8473_v61 = vpop.f32.mrf.mxu1  ;;  %v8475_v32 = vpop.f32.mrf.mxu0 }
 0x2f3   :  { %v3111_v29 = vpop.f32.mrf.mxu3  ;;  %v3099_v25 = vpop.f32.mrf.mxu2 }
 0x2f4   :  { %v3100_v42 = vadd.f32 %v3099_v25, %v3086_v46  ;;  %v3112_v35 = vadd.f32 %v3111_v29, %v3098_v23  ;;  %v8486_v29 = vld [vmem:[%s8751_s11] sm:$0xf]  ;;  %v6249_v25 = vld [vmem:[#allocation10 + $0x150] sm:$0xf]  ;;  %v6090_v23 = vor.u32 %v6690_v8, %v6089_v33  ;;  %v6724_v8 = vld [vmem:[#allocation10 + $0x124] sm:$0xf0] }
 0x2f5   :  { %v3928_v46 = vperm.slane %v8486_v29, 0  ;;  %v3929_v6 = vperm.slane %v8486_v29, 1  ;;  %v6225_v33 = vld [vmem:[#allocation10 + $0x120] sm:$0xf] }
 0x2f6   :  { %4504 = vmatpush.bf16.msrb.mxu0 %v6090_v23 }
 0x2f7   :  { %v8481_v36 = vpop.f32.mrf.mxu1 }
 0x2fb   :  { %v3113_v62 = vpop.f32.mrf.mxu3 }
 0x2fc   :  { %v3114_v43 = vadd.f32 %v3113_v62, %v3100_v42  ;;  %v6730_v42 = vld [vmem:[#allocation10 + $0x154] sm:$0xf0] }
 0x2fe   :  { %v3180_v45 = vpack.c.bf16 %v3114_v43, %v3112_v35  ;;  %v6250_v35 = vor.u32 %v6730_v42, %v6249_v25  ;;  %v6161_v43 = vld [vmem:[#allocation10 + $0xa0] sm:$0xf]  ;;  %v6226_v42 = vor.u32 %v6724_v8, %v6225_v33 }
 0x300   :  { %3836 = vmatmul.bf16.vlgmr.msrb.gmra.mxu1 %v3180_v45  ;;  %3864 = vmatmul.bf16.vlgmr.msrb.gmra.mxu3 %v3180_v45 }
 0x301   :  { %4512 = vmatpush.bf16.msrb.mxu1 %v6202_v22  ;;  %4540 = vmatpush.bf16.msrb.mxu3 %v6330_v5  ;;  %v6241_v22 = vld [vmem:[#allocation10 + $0x140] sm:$0xf] }
 0x302   :  { %4528 = vmatpush.bf16.msrb.mxu2 %v6250_v35  ;;  %v6123_v35 = vld [vmem:[#allocation10 + $0x58] sm:$0xf0] }
 0x305   :  { %4513 = vmatpush.bf16.msrb.mxu1 %v6194_v34  ;;  %4541 = vmatpush.bf16.msrb.mxu3 %v6322_v56  ;;  %v6242_v34 = vor.u32 %v6728_v52, %v6241_v22  ;;  %v6715_v56 = vld [vmem:[#allocation10 + $0xe4] sm:$0xf] }
 0x307   :  { %4529 = vmatpush.bf16.msrb.mxu2 %v6242_v34 }
 0x309   :  { %4514 = vmatpush.bf16.msrb.mxu1 %v6186_v40  ;;  %4542 = vmatpush.bf16.msrb.mxu3 %v6314_v37 }
 0x30b   :  { %v8471_v39 = vpop.f32.mrf.mxu2  ;;  %4530 = vmatpush.bf16.msrb.mxu2 %v6234_v11 }
 0x30d   :  { %4515 = vmatpush.bf16.msrb.mxu1 %v6178_v3 }
 0x30f   :  { %4531 = vmatpush.bf16.msrb.mxu2 %v6226_v42 }
 0x310   :  { %3892 = vmatmul.bf16.vlgmr.msra.gmra.mxu1 %v3180_v45  ;;  %3920 = vmatmul.bf16.vlgmr.msra.gmra.mxu3 %v3180_v45  ;;  %v6708_v45 = vld [vmem:[#allocation10 + $0xa4] sm:$0xf0] }
 0x311   :  { %4516 = vmatpush.bf16.msrb.mxu1 %v6170_v38  ;;  %v6162_v50 = vor.u32 %v6708_v45, %v6161_v43  ;;  %v6203_v38 = vld [vmem:[#allocation10 + $0xf8] sm:$0xf0] }
 0x313   :  { %v8477_v26 = vpop.f32.mrf.mxu2  ;;  %v8479_v21 = vpop.f32.mrf.mxu3 }
 0x315   :  { %4517 = vmatpush.bf16.msrb.mxu1 %v6162_v50 }
 0x319   :  { %4518 = vmatpush.bf16.msrb.mxu1 %v6154_v48  ;;  %v6740_v48 = vld [vmem:[#allocation10 + $0x1a4] sm:$0xf0] }
 0x31b   :  { %v8488_v63 = vpop.f32.mrf.mxu3 }
 0x31d   :  { %4519 = vmatpush.bf16.msrb.mxu1 %v6146_v13 }
 0x34f   :  { %v3823_v47 = vpop.f32.mrf.mxu0 }
 0x350   :  { %v3824_v12 = vadd.f32 %v3823_v47, %v8469_v9  ;;  %v6688_v9 = vld [vmem:[#allocation10 + $0x4] sm:$0xf0]  ;;  %v6305_v47 = vld [vmem:[#allocation10 + $0x1c0] sm:$0xf] }
 0x351   :  { %v6082_v44 = vor.u32 %v6688_v9, %v6081_v19  ;;  %v6306_v0 = vor.u32 %v6744_v4, %v6305_v47  ;;  %v6195_v19 = vld [vmem:[#allocation10 + $0xe8] sm:$0xf0]  ;;  %v6267_v47 = vld [vmem:[#allocation10 + $0x178] sm:$0xf0] }
 0x352   :  { %v6198_v52 = vor.u32 %v6715_v56, %v6195_v19  ;;  %v6259_v19 = vld [vmem:[#allocation10 + $0x168] sm:$0xf0] }
 0x353   :  { %4505 = vmatpush.bf16.msrb.mxu0 %v6082_v44  ;;  %4543 = vmatpush.bf16.msrb.mxu3 %v6306_v0  ;;  %v6738_v0 = vld [vmem:[#allocation10 + $0x194] sm:$0xf0] }
 0x355   :  { %v3851_v60 = vpop.f32.mrf.mxu2 }
 0x356   :  { %v3852_v16 = vadd.f32 %v3851_v60, %v8473_v61  ;;  %v6699_v61 = vld [vmem:[#allocation10 + $0x64] sm:$0xf] }
 0x357   :  { %v3825_v54 = vpop.f32.mrf.mxu0  ;;  %4554 = vmatpush.bf16.msra.mxu0 %v6142_v41  ;;  %v6134_v7 = vor.u32 %v6699_v61, %v6131_v53  ;;  %v6695_v41 = vld [vmem:[#allocation10 + $0x44] sm:$0xf]  ;;  %v6693_v53 = vld [vmem:[#allocation10 + $0x34] sm:$0xf] }
 0x358   :  { %v3826_v10 = vadd.f32 %v3825_v54, %v8475_v32  ;;  %v6717_v32 = vld [vmem:[#allocation10 + $0xf4] sm:$0xf]  ;;  %v6742_v54 = vld [vmem:[#allocation10 + $0x1b4] sm:$0xf0] }
 0x359   :  { %v6206_v5 = vor.u32 %v6717_v32, %v6203_v38  ;;  %v6270_v32 = vor.u32 %v6733_v15, %v6267_v47  ;;  %v6281_v38 = vld [vmem:[#allocation10 + $0x190] sm:$0xf]  ;;  %v6709_v47 = vld [vmem:[#allocation10 + $0xb4] sm:$0xf] }
 0x35b   :  { %4555 = vmatpush.bf16.msra.mxu0 %v6134_v7  ;;  %4568 = vmatpush.bf16.msra.mxu1 %v6206_v5 }
 0x35d   :  { %v8492_v55 = vpop.f32.mrf.mxu2 }
 0x35e   :  { %v3854_v50 = vadd.f32 %v8492_v55, %v8481_v36  ;;  %v3930_v36 = vperm.slane %v8486_v29, 2  ;;  %v6218_v55 = vor.u32 %v6722_v1, %v6217_v58  ;;  %v6736_v58 = vld [vmem:[#allocation10 + $0x184] sm:$0xf0] }
 0x35f   :  { %v3879_v25 = vpop.f32.mrf.mxu0  ;;  %4569 = vmatpush.bf16.msra.mxu1 %v6198_v52  ;;  %v6273_v52 = vld [vmem:[#allocation10 + $0x180] sm:$0xf] }
 0x360   :  { %v3880_v9 = vadd.f32 %v3879_v25, %v8471_v39  ;;  %v6289_v39 = vld [vmem:[#allocation10 + $0x1a0] sm:$0xf]  ;;  %4532 = vmatpush.bf16.msrb.mxu2 %v6218_v55 }
 0x361   :  { %v6290_v37 = vor.u32 %v6740_v48, %v6289_v39 }
 0x365   :  { %v8511_v43 = vpop.f32.mrf.mxu2 }
 0x366   :  { %v3908_v33 = vadd.f32 %v8511_v43, %v8479_v21 }
 0x367   :  { %v3881_v13 = vpop.f32.mrf.mxu0 }
 0x36d   :  { %v3909_v8 = vpop.f32.mrf.mxu2 }
 0x37d   :  { %v3837_v62 = vpop.f32.mrf.mxu1 }
 0x37e   :  { %v3838_v18 = vadd.f32 %v3837_v62, %v3824_v12  ;;  %v6697_v62 = vld [vmem:[#allocation10 + $0x54] sm:$0xf] }
 0x37f   :  { %v6126_v45 = vor.u32 %v6697_v62, %v6123_v35  ;;  %v6711_v35 = vld [vmem:[#allocation10 + $0xc4] sm:$0xf] }
 0x380   :  { %v8496_v59 = vadd.f32 %v3928_v46, %v3838_v18 }
 0x381   :  { %4556 = vmatpush.bf16.msra.mxu0 %v6126_v45  ;;  %v6179_v45 = vld [vmem:[#allocation10 + $0xc8] sm:$0xf0] }
 0x382   :  { %v6071_v40 = vmul.f32 -1.442695, %v8496_v59 }
 0x383   :  { %v3865_v49 = vpop.f32.mrf.mxu3 }
 0x384   :  { %6837 = vpow2.f32 %v6071_v40  ;;  %v3866_v3 = vadd.f32 %v3865_v49, %v3852_v16  ;;  %v6118_v40 = vor.u32 %v6695_v41, %v6115_v28  ;;  %v6187_v49 = vld [vmem:[#allocation10 + $0xd8] sm:$0xf0] }
 0x385   :  { %v3839_v31 = vpop.f32.mrf.mxu1  ;;  %v6190_v24 = vor.u32 %v6713_v14, %v6187_v49 }
 0x386   :  { %v8504_v60 = vadd.f32 %v3929_v6, %v3866_v3  ;;  %v3840_v20 = vadd.f32 %v3839_v31, %v3826_v10  ;;  %v6720_v10 = vld [vmem:[#allocation10 + $0x104] sm:$0xf0]  ;;  %4557 = vmatpush.bf16.msra.mxu0 %v6118_v40  ;;  %v6107_v31 = vld [vmem:[#allocation10 + $0x38] sm:$0xf0] }
 0x387   :  { %4570 = vmatpush.bf16.msra.mxu1 %v6190_v24  ;;  %v6110_v27 = vor.u32 %v6693_v53, %v6107_v31  ;;  %v6274_v24 = vor.u32 %v6736_v58, %v6273_v52 }
 0x388   :  { %v6072_v12 = vmul.f32 -1.442695, %v8504_v60  ;;  %v8509_v23 = vadd.f32 %v3928_v46, %v3840_v20  ;;  %v6298_v46 = vor.u32 %v6742_v54, %v6297_v2  ;;  %v3882_v2 = vadd.f32 %v3881_v13, %v8477_v26 }
 0x389   :  { %v6282_v54 = vor.u32 %v6738_v0, %v6281_v38  ;;  %v6182_v26 = vor.u32 %v6711_v35, %v6179_v45  ;;  %v6749_v38 = vld [vmem:[#allocation10 + $0x1f4] sm:$0xf]  ;;  %v6331_v0 = vld [vmem:[#allocation10 + $0x1f8] sm:$0xf0] }
 0x38a   :  { %v6838_v18 = vpop.eup %6837  ;;  %6839 = vpow2.f32 %v6072_v12  ;;  %v6075_v57 = vmul.f32 -1.442695, %v8509_v23  ;;  %4544 = vmatpush.bf16.msrb.mxu3 %v6298_v46  ;;  %v3931_v12 = vperm.slane %v8486_v29, 3  ;;  %4558 = vmatpush.bf16.msra.mxu0 %v6110_v27  ;;  %v3910_v46 = vadd.f32 %v3909_v8, %v8488_v63 }
 0x38b   :  { %v8517_v22 = vadd.f32 1.0, %v6838_v18  ;;  %v3867_v44 = vpop.f32.mrf.mxu3  ;;  %v6691_v18 = vld [vmem:[#allocation10 + $0x24] sm:$0xf]  ;;  %4571 = vmatpush.bf16.msra.mxu1 %v6182_v26 }
 0x38c   :  { %6841 = vpow2.f32 %v6075_v57  ;;  %v3868_v34 = vadd.f32 %v3867_v44, %v3854_v50  ;;  %v6099_v50 = vld [vmem:[#allocation10 + $0x28] sm:$0xf0]  ;;  %v6731_v57 = vld [vmem:[#allocation10 + $0x164] sm:$0xf] }
 0x38d   :  { %6843 = vrcp.f32 %v8517_v22  ;;  %v3893_v51 = vpop.f32.mrf.mxu1  ;;  %vm3981_vm8 = vweird.f32 %v8517_v22  ;;  %v3985_v63 = vand.u32 2147483647, %v8517_v22  ;;  %v6102_v55 = vor.u32 %v6691_v18, %v6099_v50 }
 0x38e   :  { %v8523_v17 = vadd.f32 %v3929_v6, %v3868_v34  ;;  %v3894_v16 = vadd.f32 %v3893_v51, %v3880_v9  ;;  %v6210_v6 = vor.u32 %v6720_v10, %v6209_v30  ;;  %4545 = vmatpush.bf16.msrb.mxu3 %v6290_v37  ;;  %v6262_v41 = vor.u32 %v6731_v57, %v6259_v19  ;;  %v6091_v57 = vld [vmem:[#allocation10 + $0x18] sm:$0xf0] }
 0x38f   :  { %v3987_v51 = vand.u32 2147483648, %v8517_v22  ;;  %4559 = vmatpush.bf16.msra.mxu0 %v6102_v55  ;;  %vm8576_vm10 = vcmp.eq.f32.partialorder %v3985_v63, 8.507059e+37  ;;  %v6334_v50 = vor.u32 %v6749_v38, %v6331_v0 }
 0x390   :  { %v6840_v3 = vpop.eup %6839  ;;  %v6076_v11 = vmul.f32 -1.442695, %v8523_v17  ;;  %v8528_v61 = vadd.f32 %v3930_v36, %v3894_v16  ;;  %4533 = vmatpush.bf16.msrb.mxu2 %v6210_v6 }
 0x391   :  { %v8530_v7 = vadd.f32 1.0, %v6840_v3  ;;  %v3988_v27 = vor.u32 1.1754944e-38, %v3987_v51 }
 0x392   :  { %v6842_v20 = vpop.eup %6841  ;;  %6845 = vpow2.f32 %v6076_v11  ;;  %v6073_v4 = vmul.f32 -1.442695, %v8528_v61  ;;  %4546 = vmatpush.bf16.msrb.mxu3 %v6282_v54 }
 0x393   :  { %v8533_v5 = vpop.eup %6843  ;;  %6847 = vrcp.f32 %v8530_v7  ;;  %v3921_v25 = vpop.f32.mrf.mxu3  ;;  %v8541_v62 = vadd.f32 1.0, %v6842_v20  ;;  %v4000_v39 = vand.u32 2147483647, %v8530_v7  ;;  %v4002_v49 = vand.u32 2147483648, %v8530_v7  ;;  %v6171_v20 = vld [vmem:[#allocation10 + $0xb8] sm:$0xf0] }
 0x394   :  { %v3977_v42 = vmul.f32 %v8533_v5, %v8517_v22  ;;  %6849 = vpow2.f32 %v6073_v4  ;;  %4582 = vmatpush.bf16.msra.mxu2 %v6270_v32  ;;  %v3922_v21 = vadd.f32 %v3921_v25, %v3908_v33  ;;  %vm3982_vm9 = vweird.f32 %v8533_v5 }
 0x395   :  { %v3895_v43 = vpop.f32.mrf.mxu1  ;;  %6851 = vrcp.f32 %v8541_v62  ;;  %v4045_v37 = vand.u32 2147483647, %v8541_v62  ;;  %v4047_v30 = vand.u32 2147483648, %v8541_v62  ;;  %vm3996_vm11 = vweird.f32 %v8530_v7  ;;  %vm8595_vm15 = vmor %vm3981_vm8, %vm3982_vm9 }
 0x396   :  { %v3978_v56 = vsub.f32 1.0, %v3977_v42  ;;  %v8549_v9 = vadd.f32 %v3931_v12, %v3922_v21  ;;  %v3896_v44 = vadd.f32 %v3895_v43, %v3882_v2  ;;  %4547 = vmatpush.bf16.msrb.mxu3 %v6274_v24  ;;  %v8584_v4 = vor.u32 1.1754944e-38, %v4002_v49  ;;  %v6689_v43 = vld [vmem:[#allocation10 + $0x14] sm:$0xf]  ;;  %v6323_v49 = vld [vmem:[#allocation10 + $0x1e8] sm:$0xf0] }
 0x397   :  { %vm8586_vm13 = vcmp.eq.f32.partialorder %v4045_v37, 8.507059e+37  ;;  %v4048_v25 = vor.u32 1.1754944e-38, %v4047_v30  ;;  %vm8604_vm1 = vcmp.eq.f32.partialorder %v4000_v39, 8.507059e+37  ;;  %v6174_v21 = vor.u32 %v6709_v47, %v6171_v20  ;;  %v6687_v30 = vld [vmem:[#allocation10 + $0x4] sm:$0xf] }
 0x398   :  { %v6846_v1 = vpop.eup %6845  ;;  %v3979_v34 = vmul.f32 %v8533_v5, %v3978_v56  ;;  %v6074_v40 = vmul.f32 -1.442695, %v8549_v9  ;;  %4583 = vmatpush.bf16.msra.mxu2 %v6262_v41  ;;  %v8569_v10 = vadd.f32 %v3930_v36, %v3896_v44  ;;  %vm4041_vm2 = vweird.f32 %v8541_v62  ;;  %v6251_v56 = vld [vmem:[#allocation10 + $0x158] sm:$0xf0] }
 0x399   :  { %v8553_v28 = vpop.eup %6847  ;;  %v8557_v16 = vadd.f32 1.0, %v6846_v1  ;;  %4572 = vmatpush.bf16.msra.mxu1 %v6174_v21  ;;  %v6094_v51 = vor.u32 %v6689_v43, %v6091_v57  ;;  %v6235_v43 = vld [vmem:[#allocation10 + $0x138] sm:$0xf0] }
 0x39a   :  { %v6850_v48 = vpop.eup %6849  ;;  %v3992_v14 = vmul.f32 %v8553_v28, %v8530_v7  ;;  %v3980_v11 = vadd.f32 %v8533_v5, %v3979_v34  ;;  %vm3997_vm0 = vweird.f32 %v8553_v28  ;;  %v6077_v22 = vmul.f32 -1.442695, %v8569_v10  ;;  %4596 = vmatpush.bf16.msra.mxu3 %v6334_v50  ;;  %v6299_v41 = vld [vmem:[#allocation10 + $0x1b8] sm:$0xf0] }
 0x39b   :  { %6853 = vrcp.f32 %v8557_v16  ;;  %v8571_v3 = vpop.eup %6851  ;;  %v8574_v53 = vadd.f32 1.0, %v6850_v48  ;;  %v3923_v15 = vpop.f32.mrf.mxu3  ;;  %v4060_v42 = vand.u32 2147483647, %v8557_v16  ;;  %v4062_v26 = vand.u32 2147483648, %v8557_v16  ;;  %vm8624_vm4 = vmor %vm3996_vm11, %vm3997_vm0  ;;  %v6163_v48 = vld [vmem:[#allocation10 + $0xa8] sm:$0xf0]  ;;  %4560 = vmatpush.bf16.msra.mxu0 %v6094_v51 }
 0x39c   :  { %v3993_v6 = vsub.f32 1.0, %v3992_v14  ;;  %6855 = vpow2.f32 %v6074_v40  ;;  %v4037_v36 = vmul.f32 %v8571_v3, %v8541_v62  ;;  %v3984_v35 = vsel %vm8595_vm15, %v8533_v5, %v3980_v11  ;;  %v6729_v5 = vld [vmem:[#allocation10 + $0x154] sm:$0xf]  ;;  %v6707_v40 = vld [vmem:[#allocation10 + $0xa4] sm:$0xf] }
 0x39d   :  { %6857 = vrcp.f32 %v8574_v53  ;;  %v3924_v2 = vadd.f32 %v3923_v15, %v3910_v46  ;;  %vm4042_vm3 = vweird.f32 %v8571_v3  ;;  %v3989_v52 = vsel %vm8576_vm10, %v3988_v27, %v3984_v35  ;;  %v6747_v14 = vld [vmem:[#allocation10 + $0x1e4] sm:$0xf]  ;;  %v6243_v27 = vld [vmem:[#allocation10 + $0x148] sm:$0xf0]  ;;  %v6315_v35 = vld [vmem:[#allocation10 + $0x1d8] sm:$0xf0] }
 0x39e   :  { %v3994_v13 = vmul.f32 %v8553_v28, %v3993_v6  ;;  %v4038_v8 = vsub.f32 1.0, %v4037_v36  ;;  %6859 = vpow2.f32 %v6077_v22  ;;  %vm4043_vm5 = vmor %vm4041_vm2, %vm4042_vm3  ;;  %vm8641_vm6 = vcmp.eq.f32.partialorder %v4060_v42, 8.507059e+37  ;;  %v6745_v42 = vld [vmem:[#allocation10 + $0x1d4] sm:$0xf] }
 0x39f   :  { %v8633_v63 = vadd.f32 %v3931_v12, %v3924_v2  ;;  %v6254_v39 = vor.u32 %v6729_v5, %v6251_v56  ;;  %v4096_v11 = vmul.f32 %v3989_v52, %v8496_v59  ;;  %vm4056_vm12 = vweird.f32 %v8557_v16  ;;  %v6725_v22 = vld [vmem:[#allocation10 + $0x134] sm:$0xf]  ;;  %v6743_v5 = vld [vmem:[#allocation10 + $0x1c4] sm:$0xf]  ;;  %v6307_v56 = vld [vmem:[#allocation10 + $0x1c8] sm:$0xf0] }
 0x3a0   :  { %v4039_v18 = vmul.f32 %v8571_v3, %v4038_v8  ;;  %v3995_v44 = vadd.f32 %v8553_v28, %v3994_v13  ;;  %v4063_v47 = vor.u32 1.1754944e-38, %v4062_v26  ;;  %v6166_v20 = vor.u32 %v6707_v40, %v6163_v48  ;;  %v6723_v26 = vld [vmem:[#allocation10 + $0x124] sm:$0xf] }
 0x3a1   :  { %v8609_v54 = vpop.eup %6853  ;;  %4584 = vmatpush.bf16.msra.mxu2 %v6254_v39  ;;  %v6078_v31 = vmul.f32 -1.442695, %v8633_v63  ;;  %v6326_v13 = vor.u32 %v6747_v14, %v6323_v49  ;;  %v6318_v57 = vor.u32 %v6745_v42, %v6315_v35  ;;  %v6721_v14 = vld [vmem:[#allocation10 + $0x114] sm:$0xf]  ;;  %v6219_v49 = vld [vmem:[#allocation10 + $0x118] sm:$0xf0]  ;;  %vm4011_vm9 = vweird.f32 %v8574_v53 }
 0x3a2   :  { %v6856_v19 = vpop.eup %6855  ;;  %v4052_v46 = vmul.f32 %v8609_v54, %v8557_v16  ;;  %v4040_v1 = vadd.f32 %v8571_v3, %v4039_v18  ;;  %v3999_v62 = vsel %vm8624_vm4, %v8553_v28, %v3995_v44  ;;  %vm4057_vm7 = vweird.f32 %v8609_v54  ;;  %v6727_v28 = vld [vmem:[#allocation10 + $0x144] sm:$0xf]  ;;  %v6705_v16 = vld [vmem:[#allocation10 + $0x94] sm:$0xf]  ;;  %4573 = vmatpush.bf16.msra.mxu1 %v6166_v20  ;;  %v6147_v18 = vld [vmem:[#allocation10 + $0x88] sm:$0xf0] }
 0x3a3   :  { %v8629_v34 = vadd.f32 1.0, %v6856_v19  ;;  %v8635_v55 = vpop.eup %6857  ;;  %v4004_v32 = vsel %vm8604_vm1, %v8584_v4, %v3999_v62  ;;  %vm4058_vm14 = vmor %vm4056_vm12, %vm4057_vm7  ;;  %4597 = vmatpush.bf16.msra.mxu3 %v6326_v13  ;;  %v6246_v8 = vor.u32 %v6727_v28, %v6243_v27  ;;  %v4015_v62 = vand.u32 2147483647, %v8574_v53  ;;  %v6211_v20 = vld [vmem:[#allocation10 + $0x108] sm:$0xf0] }
 0x3a4   :  { %v4053_v7 = vsub.f32 1.0, %v4052_v46  ;;  %v4044_v29 = vsel %vm4043_vm5, %v8571_v3, %v4040_v1  ;;  %v4007_v12 = vmul.f32 %v8635_v55, %v8574_v53  ;;  %v6083_v3 = vld [vmem:[#allocation10 + $0x8] sm:$0xf0]  ;;  %v6860_v36 = vpop.eup %6859  ;;  %v4097_v2 = vmul.f32 %v4004_v32, %v8504_v60 }
 0x3a5   :  { %6861 = vrcp.f32 %v8629_v34  ;;  %v4049_v37 = vsel %vm8586_vm13, %v4048_v25, %v4044_v29  ;;  %v6086_v33 = vor.u32 %v6687_v30, %v6083_v3  ;;  %v6155_v25 = vld [vmem:[#allocation10 + $0x98] sm:$0xf0]  ;;  %4585 = vmatpush.bf16.msra.mxu2 %v6246_v8  ;;  %v6227_v60 = vld [vmem:[#allocation10 + $0x128] sm:$0xf0]  ;;  %v6310_v1 = vor.u32 %v6743_v5, %v6307_v56  ;;  %v6739_v3 = vld [vmem:[#allocation10 + $0x1a4] sm:$0xf] }
 0x3a6   :  { %v4054_v24 = vmul.f32 %v8609_v54, %v4053_v7  ;;  %v4100_v6 = vmul.f32 %v4049_v37, %v8509_v23  ;;  %v4008_v59 = vsub.f32 1.0, %v4007_v12  ;;  %v8668_v23 = vadd.f32 1.0, %v6860_v36  ;;  %v6741_v7 = vld [vmem:[#allocation10 + $0x1b4] sm:$0xf] }
 0x3a7   :  { %6863 = vpow2.f32 %v6078_v31  ;;  %4561 = vmatpush.bf16.msra.mxu0 %v6086_v33  ;;  %v6158_v50 = vor.u32 %v6705_v16, %v6155_v25  ;;  %4598 = vmatpush.bf16.msra.mxu3 %v6318_v57  ;;  %v6230_v40 = vor.u32 %v6723_v26, %v6227_v60  ;;  %vm4012_vm8 = vweird.f32 %v8635_v55  ;;  %v6737_v16 = vld [vmem:[#allocation10 + $0x194] sm:$0xf]  ;;  %v6275_v57 = vld [vmem:[#allocation10 + $0x188] sm:$0xf0] }
 0x3a8   :  { %v4055_v15 = vadd.f32 %v8609_v54, %v4054_v24  ;;  %v8664_v38 = vpack.c.bf16 %v4100_v6, %v4096_v11  ;;  %6865 = vrcp.f32 %v8668_v23  ;;  %v4009_v44 = vmul.f32 %v8635_v55, %v4008_v59  ;;  %v6291_v11 = vld [vmem:[#allocation10 + $0x1a8] sm:$0xf0]  ;;  %vm8696_vm10 = vmor %vm4011_vm9, %vm4012_vm8 }
 0x3a9   :  { %4574 = vmatpush.bf16.msra.mxu1 %v6158_v50  ;;  %v4017_v37 = vand.u32 2147483648, %v8574_v53  ;;  %v6302_v24 = vor.u32 %v6741_v7, %v6299_v41  ;;  %v4075_v31 = vand.u32 2147483647, %v8668_v23  ;;  %v4077_v28 = vand.u32 2147483648, %v8668_v23  ;;  %v6735_v50 = vld [vmem:[#allocation10 + $0x184] sm:$0xf] }
 0x3aa   :  { %v4059_v0 = vsel %vm4058_vm14, %v8609_v54, %v4055_v15  ;;  %4506 = vmatmul.bf16.vlgmr.msrb.gmra.mxu0 %v8664_v38  ;;  %v6703_v54 = vld [vmem:[#allocation10 + $0x84] sm:$0xf]  ;;  %v4010_v29 = vadd.f32 %v8635_v55, %v4009_v44  ;;  %v6222_v27 = vor.u32 %v6721_v14, %v6219_v49  ;;  %v6294_v32 = vor.u32 %v6739_v3, %v6291_v11 }
 0x3ab   :  { %v8671_v4 = vpop.eup %6861  ;;  %v4064_v45 = vsel %vm8641_vm6, %v4063_v47, %v4059_v0  ;;  %v6150_v52 = vor.u32 %v6703_v54, %v6147_v18  ;;  %4599 = vmatpush.bf16.msra.mxu3 %v6310_v1  ;;  %v6719_v47 = vld [vmem:[#allocation10 + $0x104] sm:$0xf]  ;;  %v4018_v13 = vor.u32 1.1754944e-38, %v4017_v37  ;;  %vm4016_vm13 = vcmp.eq.f32.partialorder %v4015_v62, 8.507059e+37  ;;  %v6283_v0 = vld [vmem:[#allocation10 + $0x198] sm:$0xf0] }
 0x3ac   :  { %v4101_v21 = vmul.f32 %v4064_v45, %v8523_v17  ;;  %v4022_v46 = vmul.f32 %v8671_v4, %v8629_v34  ;;  %v6238_v17 = vor.u32 %v6725_v22, %v6235_v43  ;;  %v4014_v36 = vsel %vm8696_vm10, %v8635_v55, %v4010_v29 }
 0x3ad   :  { %v6864_v58 = vpop.eup %6863  ;;  %4575 = vmatpush.bf16.msra.mxu1 %v6150_v52  ;;  %vm4071_vm15 = vweird.f32 %v8668_v23  ;;  %v4019_v8 = vsel %vm4016_vm13, %v4018_v13, %v4014_v36  ;;  %vm4027_vm0 = vweird.f32 %v8671_v4  ;;  %v4078_v55 = vor.u32 1.1754944e-38, %v4077_v28 }
 0x3ae   :  { %v8679_v19 = vpack.c.bf16 %v4101_v21, %v4097_v2  ;;  %v6866_v51 = vpop.eup %6865  ;;  %v8685_v39 = vadd.f32 1.0, %v6864_v58  ;;  %4586 = vmatpush.bf16.msra.mxu2 %v6238_v17  ;;  %v4023_v12 = vsub.f32 1.0, %v4022_v46  ;;  %v6214_v25 = vor.u32 %v6719_v47, %v6211_v20 }
 0x3af   :  { %v4067_v48 = vmul.f32 %v6866_v51, %v8668_v23  ;;  %vm4072_vm11 = vweird.f32 %v6866_v51  ;;  %4600 = vmatpush.bf16.msra.mxu3 %v6302_v24  ;;  %vm4076_vm2 = vcmp.eq.f32.partialorder %v4075_v31, 8.507059e+37  ;;  %v4030_v22 = vand.u32 2147483647, %v8629_v34 }
 0x3b0   :  { %4520 = vmatmul.bf16.vlgmr.msrb.gmra.mxu1 %v8679_v19  ;;  %6867 = vrcp.f32 %v8685_v39  ;;  %v4024_v53 = vmul.f32 %v8671_v4, %v4023_v12  ;;  %vm4073_vm1 = vmor %vm4071_vm15, %vm4072_vm11  ;;  %v4032_v23 = vand.u32 2147483648, %v8629_v34  ;;  %v6286_v21 = vor.u32 %v6737_v16, %v6283_v0 }
 0x3b1   :  { %v4068_v30 = vsub.f32 1.0, %v4067_v48  ;;  %v4098_v43 = vmul.f32 %v4019_v8, %v8528_v61  ;;  %vm4026_vm3 = vweird.f32 %v8629_v34  ;;  %v4090_v56 = vand.u32 2147483647, %v8685_v39 }
 0x3b2   :  { %4587 = vmatpush.bf16.msra.mxu2 %v6230_v40  ;;  %v4025_v42 = vadd.f32 %v8671_v4, %v4024_v53  ;;  %vm8718_vm4 = vmor %vm4026_vm3, %vm4027_vm0  ;;  %v4033_v44 = vor.u32 1.1754944e-38, %v4032_v23  ;;  %v6278_v46 = vor.u32 %v6735_v50, %v6275_v57  ;;  %vm4031_vm6 = vcmp.eq.f32.partialorder %v4030_v22, 8.507059e+37 }
 0x3b3   :  { %v4069_v15 = vmul.f32 %v6866_v51, %v4068_v30  ;;  %4601 = vmatpush.bf16.msra.mxu3 %v6294_v32  ;;  %vm4086_vm7 = vweird.f32 %v8685_v39  ;;  %vm4091_vm14 = vcmp.eq.f32.partialorder %v4090_v56, 8.507059e+37 }
 0x3b4   :  { %v4029_v61 = vsel %vm8718_vm4, %v8671_v4, %v4025_v42 }
 0x3b5   :  { %v4070_v59 = vadd.f32 %v6866_v51, %v4069_v15  ;;  %v4034_v60 = vsel %vm4031_vm6, %v4033_v44, %v4029_v61 }
 0x3b6   :  { %v6868_v33 = vpop.eup %6867  ;;  %4588 = vmatpush.bf16.msra.mxu2 %v6222_v27  ;;  %v4099_v4 = vmul.f32 %v4034_v60, %v8549_v9 }
 0x3b7   :  { %v4074_v35 = vsel %vm4073_vm1, %v6866_v51, %v4070_v59  ;;  %v4082_v45 = vmul.f32 %v6868_v33, %v8685_v39  ;;  %vm4087_vm5 = vweird.f32 %v6868_v33  ;;  %4602 = vmatpush.bf16.msra.mxu3 %v6286_v21 }
 0x3b8   :  { %v4079_v2 = vsel %vm4076_vm2, %v4078_v55, %v4074_v35  ;;  %vm4088_vm12 = vmor %vm4086_vm7, %vm4087_vm5 }
 0x3b9   :  { %v4102_v54 = vmul.f32 %v4079_v2, %v8569_v10  ;;  %v4083_v18 = vsub.f32 1.0, %v4082_v45 }
 0x3ba   :  { %4562 = vmatmul.bf16.vlgmr.msra.gmra.mxu0 %v8664_v38  ;;  %v4092_v38 = vand.u32 2147483648, %v8685_v39  ;;  %4589 = vmatpush.bf16.msra.mxu2 %v6214_v25 }
 0x3bb   :  { %v4106_v34 = vpack.c.bf16 %v4102_v54, %v4098_v43  ;;  %v4084_v10 = vmul.f32 %v6868_v33, %v4083_v18  ;;  %4603 = vmatpush.bf16.msra.mxu3 %v6278_v46 }
 0x3bc   :  { %v4093_v17 = vor.u32 1.1754944e-38, %v4092_v38 }
 0x3bd   :  { %v4085_v26 = vadd.f32 %v6868_v33, %v4084_v10  ;;  %4534 = vmatmul.bf16.vlgmr.msrb.gmra.mxu2 %v4106_v34 }
 0x3bf   :  { %v4089_v52 = vsel %vm4088_vm12, %v6868_v33, %v4085_v26 }
 0x3c0   :  { %4576 = vmatmul.bf16.vlgmr.msra.gmra.mxu1 %v8679_v19  ;;  %v4094_v58 = vsel %vm4091_vm14, %v4093_v17, %v4089_v52  ;;  %v4172_v19 = vld [vmem:[%s8753_s13] sm:$0x3]  ;;  %s7039_s13 = smov [#allocation11]  }
 0x3c1   :  { %v4103_v1 = vmul.f32 %v4094_v58, %v8633_v63  ;;  %v4174_v39 = vperm.slane %v4172_v19, 0  ;;  %v4175_v3 = vperm.slane %v4172_v19, 1  ;;  %s4618_s23 = sshll.u32 %s7039_s13, 4  ;;  %s4619_s23 = int_to_ptr.vmem [resolvable:$true] %s4618_s23 }
 0x3c3   :  { %v4107_v7 = vpack.c.bf16 %v4103_v1, %v4099_v4 }
 0x3c5   :  { %4548 = vmatmul.bf16.vlgmr.msrb.gmra.mxu3 %v4107_v7 }
 0x3cd   :  { %4590 = vmatmul.bf16.vlgmr.msra.gmra.mxu2 %v4106_v34 }
 0x3d5   :  { %4604 = vmatmul.bf16.vlgmr.msra.gmra.mxu3 %v4107_v7 }
 0x427   :  { %v4507_v41 = vpop.f32.mrf.mxu0 }
 0x428   :  { %v4508_v29 = vadd.f32 %v4507_v41, %v4174_v39 }
 0x42d   :  { %v4521_v51 = vpop.f32.mrf.mxu1 }
 0x42e   :  { %v4522_v48 = vadd.f32 %v4521_v51, %v4508_v29 }
 0x42f   :  { %v4509_v12 = vpop.f32.mrf.mxu0 }
 0x430   :  { %v4510_v37 = vadd.f32 %v4509_v12, %v4174_v39 }
 0x435   :  { %v4523_v14 = vpop.f32.mrf.mxu1 }
 0x436   :  { %v4524_v24 = vadd.f32 %v4523_v14, %v4510_v37 }
 0x437   :  { %v4563_v30 = vpop.f32.mrf.mxu0 }
 0x438   :  { %v4564_v36 = vadd.f32 %v4563_v30, %v4175_v3 }
 0x43d   :  { %v4577_v6 = vpop.f32.mrf.mxu1 }
 0x43e   :  { %v4578_v53 = vadd.f32 %v4577_v6, %v4564_v36 }
 0x43f   :  { %v4565_v47 = vpop.f32.mrf.mxu0 }
 0x440   :  { %v4535_v40 = vpop.f32.mrf.mxu2  ;;  %v4566_v59 = vadd.f32 %v4565_v47, %v4175_v3 }
 0x441   :  { %v4536_v49 = vadd.f32 %v4535_v40, %v4522_v48 }
 0x445   :  { %v4579_v32 = vpop.f32.mrf.mxu1 }
 0x446   :  { %v4580_v0 = vadd.f32 %v4579_v32, %v4566_v59 }
 0x448   :  { %v4549_v9 = vpop.f32.mrf.mxu3  ;;  %v4537_v62 = vpop.f32.mrf.mxu2 }
 0x449   :  { %v4550_v63 = vadd.f32 %v4549_v9, %v4536_v49  ;;  %v4538_v11 = vadd.f32 %v4537_v62, %v4524_v24 }
 0x44b   :  { %4610 = vst [vmem:[#allocation11] sm:$0xff] %v4550_v63 }
 0x450   :  { %v4551_v31 = vpop.f32.mrf.mxu3  ;;  %v4591_v27 = vpop.f32.mrf.mxu2 }
 0x451   :  { %v4552_v28 = vadd.f32 %v4551_v31, %v4538_v11  ;;  %v4592_v15 = vadd.f32 %v4591_v27, %v4578_v53 }
 0x453   :  { %4612 = vst [vmem:[#allocation11 + $0x10] sm:$0xff] %v4552_v28 }
 0x458   :  { %v4605_v20 = vpop.f32.mrf.mxu3  ;;  %v4593_v16 = vpop.f32.mrf.mxu2 }
 0x459   :  { %v4606_v13 = vadd.f32 %v4605_v20, %v4592_v15  ;;  %v4594_v33 = vadd.f32 %v4593_v16, %v4580_v0 }
 0x45b   :  { %4611 = vst [vmem:[#allocation11 + $0x8] sm:$0xff] %v4606_v13 }
 0x460   :  { %v4607_v8 = vpop.f32.mrf.mxu3 }
 0x461   :  { %v4608_v55 = vadd.f32 %v4607_v8, %v4594_v33 }
 0x463   :  { %4613 = vst [vmem:[#allocation11 + $0x18] sm:$0xff] %v4608_v55 }
 0x464   :  { %4626 = dma.vmem_to_hbm [thread:$0]  %s4619_s23, 512, %s4621_s22, [#allocation4], %s7025_s27, %s7025_s27, %s7026_s28  }
 0x465   :  { %7019 = dma.done.wait [#allocation4], 512  }
 0x466   :  { %7020 = vsyncadd [#allocation4], 4294966784 }
 0x467   :  { %4631 = vsyncpa [#allocation3], 1 }
 0x468   :  { %4632 = vsyncpa [#allocation6], 1 }
 0x469   :  { %4633 = vsyncpa [#allocation9], 1 }
 0x46a   :  { %4634 = vsyncpa [#allocation4], 1 }

</bundles_post_ra>
